<compile_context>
chip_gen: v7x
topology: tpu7x:2x2x1
jax: 0.10.0
libtpu: 0.0.40
codegen_flags: <defaults>
</compile_context>

<pallas_src>
import functools
import math

import jax
import jax.numpy as jnp
from jax import lax
from jax.experimental import pallas as pl
from jax.experimental.pallas import tpu as pltpu

_NVR = 10  # packed small-vector rows per layer


# ----------------------------------------------------------------------------
# Fused decoder kernel: single invocation, static unrolled layer loop.
# ----------------------------------------------------------------------------

def _decoder_kernel(tgt_ref, mem_ref,
                    sa_wqkv_ref, sa_wo_ref,
                    ca_wqkv_ref, ca_wo_ref,
                    fc1_w_ref, fc2_w_ref,
                    vec_ref, out_ref,
                    *, num_layers, num_heads, batch, eps):
    R, E = out_ref.shape
    Rm = mem_ref.shape[0]
    F = fc1_w_ref.shape[-1]
    H = num_heads
    D = E // H
    B = batch
    scale = 1.0 / math.sqrt(D)

    def vrow(row, width):
        # One packed small vector as a (1, width) block (broadcasts over rows).
        return vec_ref[row:row + 1, 0:width]

    def layer_norm(y, w, b):
        mu = jnp.mean(y, axis=-1, keepdims=True)
        var = jnp.mean((y - mu) ** 2, axis=-1, keepdims=True)
        return (y - mu) * lax.rsqrt(var + eps) * w + b

    # Cross-batch additive masks, built once and reused for every layer and
    # both attention blocks.  Rows are (seq, batch)-flattened: row r -> batch r % B.
    def make_mask(nq, nk):
        qb = lax.broadcasted_iota(jnp.int32, (nq, nk), 0) % B
        kb = lax.broadcasted_iota(jnp.int32, (nq, nk), 1) % B
        return jnp.where(qb == kb, 0.0, -1e30).astype(jnp.float32)

    self_mask = make_mask(R, R)
    cross_mask = make_mask(R, Rm)

    x = tgt_ref[...].astype(jnp.float32)       # (R,  E)
    mem = mem_ref[...].astype(jnp.float32)     # (Rm, E)

    def mha(xq, xkv, w_qkv, b_qkv, w_o, b_o, mask, is_self_attn):
        # Fused in-projection: w_qkv is (E, 3E) = [Wq | Wk | Wv].
        if is_self_attn:
            qkv = jnp.dot(xq, w_qkv, preferred_element_type=jnp.float32) + b_qkv
            q, k, v = qkv[:, :E], qkv[:, E:2 * E], qkv[:, 2 * E:]
        else:
            q = jnp.dot(xq, w_qkv[:, :E],
                        preferred_element_type=jnp.float32) + b_qkv[:, :E]
            kv = jnp.dot(xkv, w_qkv[:, E:],
                         preferred_element_type=jnp.float32) + b_qkv[:, E:]
            k, v = kv[:, :E], kv[:, E:]

        out = None
        for h in range(H):                      # static unroll over heads
            sl = slice(h * D, (h + 1) * D)
            # q_h @ k_h^T without explicit transpose (contract last dims).
            s = lax.dot_general(q[:, sl] * scale, k[:, sl],
                                (((1,), (1,)), ((), ())),
                                preferred_element_type=jnp.float32)
            s = s + mask
            m = jnp.max(s, axis=-1, keepdims=True)
            p = jnp.exp(s - m)
            p = p * pl.reciprocal(jnp.sum(p, axis=-1, keepdims=True), approx=False)
            pv = jnp.dot(p, v[:, sl], preferred_element_type=jnp.float32)
            # Fold the head concat into the output projection.
            contrib = jnp.dot(pv, w_o[sl, :], preferred_element_type=jnp.float32)
            out = contrib if out is None else out + contrib
        return out + b_o

    for l in range(num_layers):                 # static unroll over layers
        base = l * _NVR
        ln1_w, ln1_b = vrow(base + 4, E), vrow(base + 5, E)

        # --- self attention + add & norm ---
        a = mha(x, x, sa_wqkv_ref[l], vrow(base + 0, 3 * E),
                sa_wo_ref[l], vrow(base + 1, E), self_mask, True)
        x = layer_norm(x + a, ln1_w, ln1_b)

        # --- encoder-decoder attention + add & norm (shared LN, as in torch) ---
        a = mha(x, mem, ca_wqkv_ref[l], vrow(base + 2, 3 * E),
                ca_wo_ref[l], vrow(base + 3, E), cross_mask, False)
        x = layer_norm(x + a, ln1_w, ln1_b)

        # --- feed forward + add & norm ---
        h = jnp.maximum(
            jnp.dot(x, fc1_w_ref[l], preferred_element_type=jnp.float32)
            + vrow(base + 6, F), 0.0)
        y = jnp.dot(h, fc2_w_ref[l], preferred_element_type=jnp.float32) + vrow(base + 7, E)
        x = layer_norm(y + x, vrow(base + 8, E), vrow(base + 9, E))

    # Final LayerNorm of the whole decoder, fused.
    fbase = num_layers * _NVR
    out_ref[...] = layer_norm(x, vrow(fbase, E), vrow(fbase + 1, E)).astype(out_ref.dtype)


# ----------------------------------------------------------------------------
# Wrapper: one grid-less pallas_call for the whole decoder.
# ----------------------------------------------------------------------------

def transformer_decoder(tgt, memory, params, num_heads, eps=1e-5):
    """tgt: (L, B, E); memory: (S, B, E) -> (L, B, E)."""
    L, B, E = tgt.shape
    S = memory.shape[0]
    R, Rm = L * B, S * B
    NL = params["sa_wqkv"].shape[0]

    kernel = functools.partial(_decoder_kernel, num_layers=NL,
                               num_heads=num_heads, batch=B, eps=eps)
    vmem = pl.BlockSpec(memory_space=pltpu.MemorySpace.VMEM)

    out = pl.pallas_call(
        kernel,
        out_shape=jax.ShapeDtypeStruct((R, E), tgt.dtype),
        in_specs=[vmem] * 9,
        out_specs=vmem,
    )(
        tgt.reshape(R, E), memory.reshape(Rm, E),
        params["sa_wqkv"], params["sa_wo"],
        params["ca_wqkv"], params["ca_wo"],
        params["fc1_w"], params["fc2_w"],
        params["vec"],
    )
    return out.reshape(L, B, E)


# ----------------------------------------------------------------------------
# One-time parameter packing: PyTorch layouts -> kernel-friendly layouts.
# Big matrices are transposed & stacked on a layer axis; all small vectors
# (biases + LN params + final LN) are coalesced into ONE 128-lane-padded tensor.
# ----------------------------------------------------------------------------

def prepare_params(layers, final, model_dim, ff_dim):
    E, F = model_dim, ff_dim
    lane_w = 128
    while lane_w < max(3 * E, F):
        lane_w += 128

    def pad_row(v):
        v = v.reshape(-1)
        return jnp.pad(v, (0, lane_w - v.shape[0]))

    rows = []
    for p in layers:
        rows += [
            pad_row(p["self_attn"]["in_proj_bias"]),      # row 0: (3E,)
            pad_row(p["self_attn"]["out_proj_bias"]),     # row 1: (E,)
            pad_row(p["enc_dec_attn"]["in_proj_bias"]),   # row 2: (3E,)
            pad_row(p["enc_dec_attn"]["out_proj_bias"]),  # row 3: (E,)
            pad_row(p["ln_w"]), pad_row(p["ln_b"]),       # rows 4-5: shared attn LN
            pad_row(p["fc1_b"]), pad_row(p["fc2_b"]),     # rows 6-7: FFN biases
            pad_row(p["ff_ln_w"]), pad_row(p["ff_ln_b"]), # rows 8-9: FFN LN
        ]
    rows += [pad_row(final["w"]), pad_row(final["b"])]    # final decoder LN
    vec = jnp.stack(rows, axis=0)                          # (NL*10 + 2, lane_w)

    def st(fn):
        return jnp.stack([fn(p) for p in layers], axis=0)

    return {
        "sa_wqkv": st(lambda p: p["self_attn"]["in_proj_weight"].T),   # (NL, E, 3E)
        "sa_wo":   st(lambda p: p["self_attn"]["out_proj_weight"].T),  # (NL, E, E)
        "ca_wqkv": st(lambda p: p["enc_dec_attn"]["in_proj_weight"].T),
        "ca_wo":   st(lambda p: p["enc_dec_attn"]["out_proj_weight"].T),
        "fc1_w":   st(lambda p: p["fc1_w"].T),                         # (NL, E, F)
        "fc2_w":   st(lambda p: p["fc2_w"].T),                         # (NL, F, E)
        "vec":     vec,
    }


# ----------------------------------------------------------------------------
# Deterministic parameter init (shapes from module __init__, PyTorch layouts)
# ----------------------------------------------------------------------------

def init_params(key, model_dim, num_heads, ff_dim, num_layers):
    def mha_params(k):
        k1, k2, k3, k4 = jax.random.split(k, 4)
        return {
            "in_proj_weight": 0.05 * jax.random.normal(k1, (3 * model_dim, model_dim), jnp.float32),
            "in_proj_bias": 0.02 * jax.random.normal(k2, (3 * model_dim,), jnp.float32),
            "out_proj_weight": 0.05 * jax.random.normal(k3, (model_dim, model_dim), jnp.float32),
            "out_proj_bias": 0.02 * jax.random.normal(k4, (model_dim,), jnp.float32),
        }

    keys = jax.random.split(key, num_layers)
    layers = []
    for i in range(num_layers):
        ks = jax.random.split(keys[i], 8)
        layers.append({
            "self_attn": mha_params(ks[0]),
            "enc_dec_attn": mha_params(ks[1]),
            "ln_w": 1.0 + 0.01 * jax.random.normal(ks[2], (model_dim,), jnp.float32),
            "ln_b": 0.01 * jax.random.normal(ks[3], (model_dim,), jnp.float32),
            "fc1_w": 0.05 * jax.random.normal(ks[4], (ff_dim, model_dim), jnp.float32),
            "fc1_b": jnp.zeros((ff_dim,), jnp.float32),
            "fc2_w": 0.05 * jax.random.normal(ks[5], (model_dim, ff_dim), jnp.float32),
            "fc2_b": jnp.zeros((model_dim,), jnp.float32),
            "ff_ln_w": 1.0 + 0.01 * jax.random.normal(ks[6], (model_dim,), jnp.float32),
            "ff_ln_b": 0.01 * jax.random.normal(ks[7], (model_dim,), jnp.float32),
        })
    final = {"w": jnp.ones((model_dim,), jnp.float32),
             "b": jnp.zeros((model_dim,), jnp.float32)}
    return layers, final


# ----------------------------------------------------------------------------
# Pure-JAX reference (eval-mode semantics of the PyTorch module)
# ----------------------------------------------------------------------------

def ref_forward(tgt, memory, layers, final, num_heads):
    def ln(x, w, b, eps=1e-5):
        m = jnp.mean(x, -1, keepdims=True)
        v = jnp.mean((x - m) ** 2, -1, keepdims=True)
        return (x - m) / jnp.sqrt(v + eps) * w + b

    def mha_ref(q, k, v, p):
        L, B, E = q.shape
        S = k.shape[0]
        H = num_heads
        D = E // H
        w, bi = p["in_proj_weight"], p["in_proj_bias"]
        qp = (q @ w[:E].T + bi[:E]).reshape(L, B, H, D).transpose(1, 2, 0, 3)
        kp = (k @ w[E:2 * E].T + bi[E:2 * E]).reshape(S, B, H, D).transpose(1, 2, 0, 3)
        vp = (v @ w[2 * E:].T + bi[2 * E:]).reshape(S, B, H, D).transpose(1, 2, 0, 3)
        s = jnp.einsum("bhqd,bhkd->bhqk", qp, kp) / math.sqrt(D)
        a = jax.nn.softmax(s, axis=-1)
        o = jnp.einsum("bhqk,bhkd->bhqd", a, vp).transpose(2, 0, 1, 3).reshape(L, B, E)
        return o @ p["out_proj_weight"].T + p["out_proj_bias"]

    x = tgt
    for p in layers:
        x = ln(x + mha_ref(x, x, x, p["self_attn"]), p["ln_w"], p["ln_b"])
        x = ln(x + mha_ref(x, memory, memory, p["enc_dec_attn"]), p["ln_w"], p["ln_b"])
        residual = x
        h = jax.nn.relu(x @ p["fc1_w"].T + p["fc1_b"])
        y = h @ p["fc2_w"].T + p["fc2_b"]
        x = ln(y + residual, p["ff_ln_w"], p["ff_ln_b"])
    return ln(x, final["w"], final["b"])


# ----------------------------------------------------------------------------
# Main
# ----------------------------------------------------------------------------

if __name__ == "__main__":
    model_dim, num_heads, ff_dim, num_layers = 32, 4, 64, 2
    tgt_len, mem_len, batch = 8, 8, 2

    root = jax.random.PRNGKey(0)
    k_tgt, k_mem, k_par = jax.random.split(root, 3)
    tgt = jax.random.normal(k_tgt, (tgt_len, batch, model_dim), jnp.float32)
    memory = jax.random.normal(k_mem, (mem_len, batch, model_dim), jnp.float32)
    layers, final = init_params(k_par, model_dim, num_heads, ff_dim, num_layers)

    packed = prepare_params(layers, final, model_dim, ff_dim)  # one-time packing

    fwd = jax.jit(functools.partial(transformer_decoder, num_heads=num_heads))
    out = jax.block_until_ready(fwd(tgt, memory, packed))

    ref = jax.block_until_ready(ref_forward(tgt, memory, layers, final, num_heads))
    assert out.shape == (tgt_len, batch, model_dim)
    max_err = float(jnp.max(jnp.abs(out - ref)))
    assert jnp.allclose(out, ref, atol=1e-4, rtol=1e-4), max_err

    print("KERNEL_OK")
</pallas_src>

<mosaic_0001>
module attributes {stable_mosaic.version = 11 : i64} {
  func.func @_decoder_kernel(%arg0: memref<16x32xf32, #tpu.memory_space<vmem>>, %arg1: memref<16x32xf32, #tpu.memory_space<vmem>>, %arg2: memref<2x32x96xf32, #tpu.memory_space<vmem>>, %arg3: memref<2x32x32xf32, #tpu.memory_space<vmem>>, %arg4: memref<2x32x96xf32, #tpu.memory_space<vmem>>, %arg5: memref<2x32x32xf32, #tpu.memory_space<vmem>>, %arg6: memref<2x32x64xf32, #tpu.memory_space<vmem>>, %arg7: memref<2x64x32xf32, #tpu.memory_space<vmem>>, %arg8: memref<22x128xf32, #tpu.memory_space<vmem>>, %arg9: memref<16x32xf32, #tpu.memory_space<vmem>>) attributes {dimension_semantics = [], scalar_prefetch = 0 : i64, scratch_operands = 0 : i64, tpu.core_type = #tpu.core_type<tc>} {
    %0 = tpu.iota {dimensions = array<i32: 0>} : vector<16x16xi32>
    %c2_i32 = arith.constant 2 : i32
    %c0_i32 = arith.constant 0 : i32
    %1 = arith.cmpi eq, %c2_i32, %c0_i32 : i32
    %c1_i32 = arith.constant 1 : i32
    %2 = arith.select %1, %c1_i32, %c2_i32 : i32
    %3 = vector.broadcast %2 : i32 to vector<16x16xi32>
    %4 = arith.remsi %0, %3 : vector<16x16xi32>
    %c0_i32_0 = arith.constant 0 : i32
    %5 = vector.broadcast %c0_i32_0 : i32 to vector<16x16xi32>
    %6 = arith.cmpi ne, %4, %5 : vector<16x16xi32>
    %c0_i32_1 = arith.constant 0 : i32
    %7 = vector.broadcast %c0_i32_1 : i32 to vector<16x16xi32>
    %8 = arith.cmpi slt, %4, %7 : vector<16x16xi32>
    %c0_i32_2 = arith.constant 0 : i32
    %9 = arith.cmpi slt, %2, %c0_i32_2 : i32
    %10 = vector.broadcast %9 : i1 to vector<16x16xi1>
    %11 = vector.broadcast %10 : vector<16x16xi1> to vector<16x16xi1>
    %12 = arith.xori %8, %11 : vector<16x16xi1>
    %13 = arith.andi %12, %6 : vector<16x16xi1>
    %14 = vector.broadcast %2 : i32 to vector<16x16xi32>
    %15 = arith.addi %4, %14 : vector<16x16xi32>
    %16 = arith.select %13, %15, %4 : vector<16x16xi1>, vector<16x16xi32>
    %17 = tpu.iota {dimensions = array<i32: 1>} : vector<16x16xi32>
    %c2_i32_3 = arith.constant 2 : i32
    %c0_i32_4 = arith.constant 0 : i32
    %18 = arith.cmpi eq, %c2_i32_3, %c0_i32_4 : i32
    %c1_i32_5 = arith.constant 1 : i32
    %19 = arith.select %18, %c1_i32_5, %c2_i32_3 : i32
    %20 = vector.broadcast %19 : i32 to vector<16x16xi32>
    %21 = arith.remsi %17, %20 : vector<16x16xi32>
    %c0_i32_6 = arith.constant 0 : i32
    %22 = vector.broadcast %c0_i32_6 : i32 to vector<16x16xi32>
    %23 = arith.cmpi ne, %21, %22 : vector<16x16xi32>
    %c0_i32_7 = arith.constant 0 : i32
    %24 = vector.broadcast %c0_i32_7 : i32 to vector<16x16xi32>
    %25 = arith.cmpi slt, %21, %24 : vector<16x16xi32>
    %c0_i32_8 = arith.constant 0 : i32
    %26 = arith.cmpi slt, %19, %c0_i32_8 : i32
    %27 = vector.broadcast %26 : i1 to vector<16x16xi1>
    %28 = vector.broadcast %27 : vector<16x16xi1> to vector<16x16xi1>
    %29 = arith.xori %25, %28 : vector<16x16xi1>
    %30 = arith.andi %29, %23 : vector<16x16xi1>
    %31 = vector.broadcast %19 : i32 to vector<16x16xi32>
    %32 = arith.addi %21, %31 : vector<16x16xi32>
    %33 = arith.select %30, %32, %21 : vector<16x16xi1>, vector<16x16xi32>
    %34 = arith.cmpi eq, %16, %33 : vector<16x16xi32>
    %cst = arith.constant 0.000000e+00 : f32
    %cst_9 = arith.constant -1.000000e+30 : f32
    %35 = vector.broadcast %cst : f32 to vector<16x16xf32>
    %36 = vector.broadcast %cst_9 : f32 to vector<16x16xf32>
    %37 = arith.select %34, %35, %36 : vector<16x16xi1>, vector<16x16xf32>
    %38 = tpu.iota {dimensions = array<i32: 0>} : vector<16x16xi32>
    %c2_i32_10 = arith.constant 2 : i32
    %c0_i32_11 = arith.constant 0 : i32
    %39 = arith.cmpi eq, %c2_i32_10, %c0_i32_11 : i32
    %c1_i32_12 = arith.constant 1 : i32
    %40 = arith.select %39, %c1_i32_12, %c2_i32_10 : i32
    %41 = vector.broadcast %40 : i32 to vector<16x16xi32>
    %42 = arith.remsi %38, %41 : vector<16x16xi32>
    %c0_i32_13 = arith.constant 0 : i32
    %43 = vector.broadcast %c0_i32_13 : i32 to vector<16x16xi32>
    %44 = arith.cmpi ne, %42, %43 : vector<16x16xi32>
    %c0_i32_14 = arith.constant 0 : i32
    %45 = vector.broadcast %c0_i32_14 : i32 to vector<16x16xi32>
    %46 = arith.cmpi slt, %42, %45 : vector<16x16xi32>
    %c0_i32_15 = arith.constant 0 : i32
    %47 = arith.cmpi slt, %40, %c0_i32_15 : i32
    %48 = vector.broadcast %47 : i1 to vector<16x16xi1>
    %49 = vector.broadcast %48 : vector<16x16xi1> to vector<16x16xi1>
    %50 = arith.xori %46, %49 : vector<16x16xi1>
    %51 = arith.andi %50, %44 : vector<16x16xi1>
    %52 = vector.broadcast %40 : i32 to vector<16x16xi32>
    %53 = arith.addi %42, %52 : vector<16x16xi32>
    %54 = arith.select %51, %53, %42 : vector<16x16xi1>, vector<16x16xi32>
    %55 = tpu.iota {dimensions = array<i32: 1>} : vector<16x16xi32>
    %c2_i32_16 = arith.constant 2 : i32
    %c0_i32_17 = arith.constant 0 : i32
    %56 = arith.cmpi eq, %c2_i32_16, %c0_i32_17 : i32
    %c1_i32_18 = arith.constant 1 : i32
    %57 = arith.select %56, %c1_i32_18, %c2_i32_16 : i32
    %58 = vector.broadcast %57 : i32 to vector<16x16xi32>
    %59 = arith.remsi %55, %58 : vector<16x16xi32>
    %c0_i32_19 = arith.constant 0 : i32
    %60 = vector.broadcast %c0_i32_19 : i32 to vector<16x16xi32>
    %61 = arith.cmpi ne, %59, %60 : vector<16x16xi32>
    %c0_i32_20 = arith.constant 0 : i32
    %62 = vector.broadcast %c0_i32_20 : i32 to vector<16x16xi32>
    %63 = arith.cmpi slt, %59, %62 : vector<16x16xi32>
    %c0_i32_21 = arith.constant 0 : i32
    %64 = arith.cmpi slt, %57, %c0_i32_21 : i32
    %65 = vector.broadcast %64 : i1 to vector<16x16xi1>
    %66 = vector.broadcast %65 : vector<16x16xi1> to vector<16x16xi1>
    %67 = arith.xori %63, %66 : vector<16x16xi1>
    %68 = arith.andi %67, %61 : vector<16x16xi1>
    %69 = vector.broadcast %57 : i32 to vector<16x16xi32>
    %70 = arith.addi %59, %69 : vector<16x16xi32>
    %71 = arith.select %68, %70, %59 : vector<16x16xi1>, vector<16x16xi32>
    %72 = arith.cmpi eq, %54, %71 : vector<16x16xi32>
    %cst_22 = arith.constant 0.000000e+00 : f32
    %cst_23 = arith.constant -1.000000e+30 : f32
    %73 = vector.broadcast %cst_22 : f32 to vector<16x16xf32>
    %74 = vector.broadcast %cst_23 : f32 to vector<16x16xf32>
    %75 = arith.select %72, %73, %74 : vector<16x16xi1>, vector<16x16xf32>
    %c0 = arith.constant 0 : index
    %c0_24 = arith.constant 0 : index
    %76 = vector.load %arg0[%c0, %c0_24] : memref<16x32xf32, #tpu.memory_space<vmem>>, vector<16x32xf32>
    %c0_25 = arith.constant 0 : index
    %c0_26 = arith.constant 0 : index
    %77 = vector.load %arg1[%c0_25, %c0_26] : memref<16x32xf32, #tpu.memory_space<vmem>>, vector<16x32xf32>
    %c4 = arith.constant 4 : index
    %c0_27 = arith.constant 0 : index
    %78 = vector.load %arg8[%c4, %c0_27] : memref<22x128xf32, #tpu.memory_space<vmem>>, vector<1x32xf32>
    %c5 = arith.constant 5 : index
    %c0_28 = arith.constant 0 : index
    %79 = vector.load %arg8[%c5, %c0_28] : memref<22x128xf32, #tpu.memory_space<vmem>>, vector<1x32xf32>
    %c0_29 = arith.constant 0 : index
    %c0_30 = arith.constant 0 : index
    %c0_31 = arith.constant 0 : index
    %80 = vector.load %arg2[%c0_29, %c0_30, %c0_31] : memref<2x32x96xf32, #tpu.memory_space<vmem>>, vector<1x32x96xf32>
    %81 = vector.shape_cast %80 : vector<1x32x96xf32> to vector<32x96xf32>
    %c0_32 = arith.constant 0 : index
    %c0_33 = arith.constant 0 : index
    %82 = vector.load %arg8[%c0_32, %c0_33] : memref<22x128xf32, #tpu.memory_space<vmem>>, vector<1x96xf32>
    %c0_34 = arith.constant 0 : index
    %c0_35 = arith.constant 0 : index
    %c0_36 = arith.constant 0 : index
    %83 = vector.load %arg3[%c0_34, %c0_35, %c0_36] : memref<2x32x32xf32, #tpu.memory_space<vmem>>, vector<1x32x32xf32>
    %84 = vector.shape_cast %83 : vector<1x32x32xf32> to vector<32x32xf32>
    %c1 = arith.constant 1 : index
    %c0_37 = arith.constant 0 : index
    %85 = vector.load %arg8[%c1, %c0_37] : memref<22x128xf32, #tpu.memory_space<vmem>>, vector<1x32xf32>
    %cst_38 = arith.constant dense<0.000000e+00> : vector<16x96xf32>
    %86 = tpu.matmul %76, %81, %cst_38 {dimension_numbers = #tpu.dot_dimension_numbers<[1], [0], [0], [1], [0, 0, 1, 1], [], []>} : vector<16x32xf32>, vector<32x96xf32>, vector<16x96xf32> -> vector<16x96xf32>
    %87 = vector.broadcast %82 : vector<1x96xf32> to vector<16x96xf32>
    %88 = arith.addf %86, %87 : vector<16x96xf32>
    %89 = vector.extract_strided_slice %88 {offsets = [0, 0], sizes = [16, 32], strides = [1, 1]} : vector<16x96xf32> to vector<16x32xf32>
    %90 = vector.extract_strided_slice %88 {offsets = [0, 32], sizes = [16, 32], strides = [1, 1]} : vector<16x96xf32> to vector<16x32xf32>
    %91 = vector.extract_strided_slice %88 {offsets = [0, 64], sizes = [16, 32], strides = [1, 1]} : vector<16x96xf32> to vector<16x32xf32>
    %92 = vector.extract_strided_slice %89 {offsets = [0, 0], sizes = [16, 8], strides = [1, 1]} : vector<16x32xf32> to vector<16x8xf32>
    %cst_39 = arith.constant 0.353553385 : f32
    %93 = vector.broadcast %cst_39 : f32 to vector<16x8xf32>
    %94 = arith.mulf %92, %93 : vector<16x8xf32>
    %95 = vector.extract_strided_slice %90 {offsets = [0, 0], sizes = [16, 8], strides = [1, 1]} : vector<16x32xf32> to vector<16x8xf32>
    %cst_40 = arith.constant dense<0.000000e+00> : vector<16x16xf32>
    %96 = tpu.matmul %94, %95, %cst_40 {dimension_numbers = #tpu.dot_dimension_numbers<[1], [1], [0], [0], [0, 0, 1, 0], [], []>} : vector<16x8xf32>, vector<16x8xf32>, vector<16x16xf32> -> vector<16x16xf32>
    %97 = arith.addf %96, %37 : vector<16x16xf32>
    %cst_41 = arith.constant dense<0xFF800000> : vector<16xf32>
    %98 = vector.multi_reduction <maximumf>, %97, %cst_41 [1] : vector<16x16xf32> to vector<16xf32>
    %99 = vector.shape_cast %98 : vector<16xf32> to vector<16x1xf32>
    %100 = vector.broadcast %99 : vector<16x1xf32> to vector<16x16xf32>
    %101 = arith.subf %97, %100 : vector<16x16xf32>
    %102 = math.exp %101 : vector<16x16xf32>
    %cst_42 = arith.constant dense<0.000000e+00> : vector<16xf32>
    %103 = vector.multi_reduction <add>, %102, %cst_42 [1] : vector<16x16xf32> to vector<16xf32>
    %104 = vector.shape_cast %103 : vector<16xf32> to vector<16x1xf32>
    %105 = tpu.reciprocal %104 : vector<16x1xf32> -> vector<16x1xf32>
    %106 = vector.broadcast %105 : vector<16x1xf32> to vector<16x16xf32>
    %107 = arith.mulf %102, %106 : vector<16x16xf32>
    %108 = vector.extract_strided_slice %91 {offsets = [0, 0], sizes = [16, 8], strides = [1, 1]} : vector<16x32xf32> to vector<16x8xf32>
    %cst_43 = arith.constant dense<0.000000e+00> : vector<16x8xf32>
    %109 = tpu.matmul %107, %108, %cst_43 {dimension_numbers = #tpu.dot_dimension_numbers<[1], [0], [0], [1], [0, 0, 1, 1], [], []>} : vector<16x16xf32>, vector<16x8xf32>, vector<16x8xf32> -> vector<16x8xf32>
    %110 = vector.extract_strided_slice %84 {offsets = [0, 0], sizes = [8, 32], strides = [1, 1]} : vector<32x32xf32> to vector<8x32xf32>
    %cst_44 = arith.constant dense<0.000000e+00> : vector<16x32xf32>
    %111 = tpu.matmul %109, %110, %cst_44 {dimension_numbers = #tpu.dot_dimension_numbers<[1], [0], [0], [1], [0, 0, 1, 1], [], []>} : vector<16x8xf32>, vector<8x32xf32>, vector<16x32xf32> -> vector<16x32xf32>
    %112 = vector.extract_strided_slice %89 {offsets = [0, 8], sizes = [16, 8], strides = [1, 1]} : vector<16x32xf32> to vector<16x8xf32>
    %cst_45 = arith.constant 0.353553385 : f32
    %113 = vector.broadcast %cst_45 : f32 to vector<16x8xf32>
    %114 = arith.mulf %112, %113 : vector<16x8xf32>
    %115 = vector.extract_strided_slice %90 {offsets = [0, 8], sizes = [16, 8], strides = [1, 1]} : vector<16x32xf32> to vector<16x8xf32>
    %cst_46 = arith.constant dense<0.000000e+00> : vector<16x16xf32>
    %116 = tpu.matmul %114, %115, %cst_46 {dimension_numbers = #tpu.dot_dimension_numbers<[1], [1], [0], [0], [0, 0, 1, 0], [], []>} : vector<16x8xf32>, vector<16x8xf32>, vector<16x16xf32> -> vector<16x16xf32>
    %117 = arith.addf %116, %37 : vector<16x16xf32>
    %cst_47 = arith.constant dense<0xFF800000> : vector<16xf32>
    %118 = vector.multi_reduction <maximumf>, %117, %cst_47 [1] : vector<16x16xf32> to vector<16xf32>
    %119 = vector.shape_cast %118 : vector<16xf32> to vector<16x1xf32>
    %120 = vector.broadcast %119 : vector<16x1xf32> to vector<16x16xf32>
    %121 = arith.subf %117, %120 : vector<16x16xf32>
    %122 = math.exp %121 : vector<16x16xf32>
    %cst_48 = arith.constant dense<0.000000e+00> : vector<16xf32>
    %123 = vector.multi_reduction <add>, %122, %cst_48 [1] : vector<16x16xf32> to vector<16xf32>
    %124 = vector.shape_cast %123 : vector<16xf32> to vector<16x1xf32>
    %125 = tpu.reciprocal %124 : vector<16x1xf32> -> vector<16x1xf32>
    %126 = vector.broadcast %125 : vector<16x1xf32> to vector<16x16xf32>
    %127 = arith.mulf %122, %126 : vector<16x16xf32>
    %128 = vector.extract_strided_slice %91 {offsets = [0, 8], sizes = [16, 8], strides = [1, 1]} : vector<16x32xf32> to vector<16x8xf32>
    %cst_49 = arith.constant dense<0.000000e+00> : vector<16x8xf32>
    %129 = tpu.matmul %127, %128, %cst_49 {dimension_numbers = #tpu.dot_dimension_numbers<[1], [0], [0], [1], [0, 0, 1, 1], [], []>} : vector<16x16xf32>, vector<16x8xf32>, vector<16x8xf32> -> vector<16x8xf32>
    %130 = vector.extract_strided_slice %84 {offsets = [8, 0], sizes = [8, 32], strides = [1, 1]} : vector<32x32xf32> to vector<8x32xf32>
    %cst_50 = arith.constant dense<0.000000e+00> : vector<16x32xf32>
    %131 = tpu.matmul %129, %130, %cst_50 {dimension_numbers = #tpu.dot_dimension_numbers<[1], [0], [0], [1], [0, 0, 1, 1], [], []>} : vector<16x8xf32>, vector<8x32xf32>, vector<16x32xf32> -> vector<16x32xf32>
    %132 = arith.addf %111, %131 : vector<16x32xf32>
    %133 = vector.extract_strided_slice %89 {offsets = [0, 16], sizes = [16, 8], strides = [1, 1]} : vector<16x32xf32> to vector<16x8xf32>
    %cst_51 = arith.constant 0.353553385 : f32
    %134 = vector.broadcast %cst_51 : f32 to vector<16x8xf32>
    %135 = arith.mulf %133, %134 : vector<16x8xf32>
    %136 = vector.extract_strided_slice %90 {offsets = [0, 16], sizes = [16, 8], strides = [1, 1]} : vector<16x32xf32> to vector<16x8xf32>
    %cst_52 = arith.constant dense<0.000000e+00> : vector<16x16xf32>
    %137 = tpu.matmul %135, %136, %cst_52 {dimension_numbers = #tpu.dot_dimension_numbers<[1], [1], [0], [0], [0, 0, 1, 0], [], []>} : vector<16x8xf32>, vector<16x8xf32>, vector<16x16xf32> -> vector<16x16xf32>
    %138 = arith.addf %137, %37 : vector<16x16xf32>
    %cst_53 = arith.constant dense<0xFF800000> : vector<16xf32>
    %139 = vector.multi_reduction <maximumf>, %138, %cst_53 [1] : vector<16x16xf32> to vector<16xf32>
    %140 = vector.shape_cast %139 : vector<16xf32> to vector<16x1xf32>
    %141 = vector.broadcast %140 : vector<16x1xf32> to vector<16x16xf32>
    %142 = arith.subf %138, %141 : vector<16x16xf32>
    %143 = math.exp %142 : vector<16x16xf32>
    %cst_54 = arith.constant dense<0.000000e+00> : vector<16xf32>
    %144 = vector.multi_reduction <add>, %143, %cst_54 [1] : vector<16x16xf32> to vector<16xf32>
    %145 = vector.shape_cast %144 : vector<16xf32> to vector<16x1xf32>
    %146 = tpu.reciprocal %145 : vector<16x1xf32> -> vector<16x1xf32>
    %147 = vector.broadcast %146 : vector<16x1xf32> to vector<16x16xf32>
    %148 = arith.mulf %143, %147 : vector<16x16xf32>
    %149 = vector.extract_strided_slice %91 {offsets = [0, 16], sizes = [16, 8], strides = [1, 1]} : vector<16x32xf32> to vector<16x8xf32>
    %cst_55 = arith.constant dense<0.000000e+00> : vector<16x8xf32>
    %150 = tpu.matmul %148, %149, %cst_55 {dimension_numbers = #tpu.dot_dimension_numbers<[1], [0], [0], [1], [0, 0, 1, 1], [], []>} : vector<16x16xf32>, vector<16x8xf32>, vector<16x8xf32> -> vector<16x8xf32>
    %151 = vector.extract_strided_slice %84 {offsets = [16, 0], sizes = [8, 32], strides = [1, 1]} : vector<32x32xf32> to vector<8x32xf32>
    %cst_56 = arith.constant dense<0.000000e+00> : vector<16x32xf32>
    %152 = tpu.matmul %150, %151, %cst_56 {dimension_numbers = #tpu.dot_dimension_numbers<[1], [0], [0], [1], [0, 0, 1, 1], [], []>} : vector<16x8xf32>, vector<8x32xf32>, vector<16x32xf32> -> vector<16x32xf32>
    %153 = arith.addf %132, %152 : vector<16x32xf32>
    %154 = vector.extract_strided_slice %89 {offsets = [0, 24], sizes = [16, 8], strides = [1, 1]} : vector<16x32xf32> to vector<16x8xf32>
    %cst_57 = arith.constant 0.353553385 : f32
    %155 = vector.broadcast %cst_57 : f32 to vector<16x8xf32>
    %156 = arith.mulf %154, %155 : vector<16x8xf32>
    %157 = vector.extract_strided_slice %90 {offsets = [0, 24], sizes = [16, 8], strides = [1, 1]} : vector<16x32xf32> to vector<16x8xf32>
    %cst_58 = arith.constant dense<0.000000e+00> : vector<16x16xf32>
    %158 = tpu.matmul %156, %157, %cst_58 {dimension_numbers = #tpu.dot_dimension_numbers<[1], [1], [0], [0], [0, 0, 1, 0], [], []>} : vector<16x8xf32>, vector<16x8xf32>, vector<16x16xf32> -> vector<16x16xf32>
    %159 = arith.addf %158, %37 : vector<16x16xf32>
    %cst_59 = arith.constant dense<0xFF800000> : vector<16xf32>
    %160 = vector.multi_reduction <maximumf>, %159, %cst_59 [1] : vector<16x16xf32> to vector<16xf32>
    %161 = vector.shape_cast %160 : vector<16xf32> to vector<16x1xf32>
    %162 = vector.broadcast %161 : vector<16x1xf32> to vector<16x16xf32>
    %163 = arith.subf %159, %162 : vector<16x16xf32>
    %164 = math.exp %163 : vector<16x16xf32>
    %cst_60 = arith.constant dense<0.000000e+00> : vector<16xf32>
    %165 = vector.multi_reduction <add>, %164, %cst_60 [1] : vector<16x16xf32> to vector<16xf32>
    %166 = vector.shape_cast %165 : vector<16xf32> to vector<16x1xf32>
    %167 = tpu.reciprocal %166 : vector<16x1xf32> -> vector<16x1xf32>
    %168 = vector.broadcast %167 : vector<16x1xf32> to vector<16x16xf32>
    %169 = arith.mulf %164, %168 : vector<16x16xf32>
    %170 = vector.extract_strided_slice %91 {offsets = [0, 24], sizes = [16, 8], strides = [1, 1]} : vector<16x32xf32> to vector<16x8xf32>
    %cst_61 = arith.constant dense<0.000000e+00> : vector<16x8xf32>
    %171 = tpu.matmul %169, %170, %cst_61 {dimension_numbers = #tpu.dot_dimension_numbers<[1], [0], [0], [1], [0, 0, 1, 1], [], []>} : vector<16x16xf32>, vector<16x8xf32>, vector<16x8xf32> -> vector<16x8xf32>
    %172 = vector.extract_strided_slice %84 {offsets = [24, 0], sizes = [8, 32], strides = [1, 1]} : vector<32x32xf32> to vector<8x32xf32>
    %cst_62 = arith.constant dense<0.000000e+00> : vector<16x32xf32>
    %173 = tpu.matmul %171, %172, %cst_62 {dimension_numbers = #tpu.dot_dimension_numbers<[1], [0], [0], [1], [0, 0, 1, 1], [], []>} : vector<16x8xf32>, vector<8x32xf32>, vector<16x32xf32> -> vector<16x32xf32>
    %174 = arith.addf %153, %173 : vector<16x32xf32>
    %175 = vector.broadcast %85 : vector<1x32xf32> to vector<16x32xf32>
    %176 = arith.addf %174, %175 : vector<16x32xf32>
    %177 = arith.addf %76, %176 : vector<16x32xf32>
    %cst_63 = arith.constant dense<0.000000e+00> : vector<16xf32>
    %178 = vector.multi_reduction <add>, %177, %cst_63 [1] : vector<16x32xf32> to vector<16xf32>
    %179 = vector.shape_cast %178 : vector<16xf32> to vector<16x1xf32>
    %cst_64 = arith.constant 3.200000e+01 : f32
    %180 = vector.broadcast %cst_64 : f32 to vector<16x1xf32>
    %181 = arith.divf %179, %180 : vector<16x1xf32>
    %182 = vector.broadcast %181 : vector<16x1xf32> to vector<16x32xf32>
    %183 = arith.subf %177, %182 : vector<16x32xf32>
    %184 = arith.mulf %183, %183 : vector<16x32xf32>
    %cst_65 = arith.constant dense<0.000000e+00> : vector<16xf32>
    %185 = vector.multi_reduction <add>, %184, %cst_65 [1] : vector<16x32xf32> to vector<16xf32>
    %186 = vector.shape_cast %185 : vector<16xf32> to vector<16x1xf32>
    %cst_66 = arith.constant 3.200000e+01 : f32
    %187 = vector.broadcast %cst_66 : f32 to vector<16x1xf32>
    %188 = arith.divf %186, %187 : vector<16x1xf32>
    %189 = vector.broadcast %181 : vector<16x1xf32> to vector<16x32xf32>
    %190 = arith.subf %177, %189 : vector<16x32xf32>
    %cst_67 = arith.constant 9.99999974E-6 : f32
    %191 = vector.broadcast %cst_67 : f32 to vector<16x1xf32>
    %192 = arith.addf %188, %191 : vector<16x1xf32>
    %193 = math.rsqrt %192 : vector<16x1xf32>
    %194 = vector.broadcast %193 : vector<16x1xf32> to vector<16x32xf32>
    %195 = arith.mulf %190, %194 : vector<16x32xf32>
    %196 = vector.broadcast %78 : vector<1x32xf32> to vector<16x32xf32>
    %197 = arith.mulf %195, %196 : vector<16x32xf32>
    %198 = vector.broadcast %79 : vector<1x32xf32> to vector<16x32xf32>
    %199 = arith.addf %197, %198 : vector<16x32xf32>
    %c0_68 = arith.constant 0 : index
    %c0_69 = arith.constant 0 : index
    %c0_70 = arith.constant 0 : index
    %200 = vector.load %arg4[%c0_68, %c0_69, %c0_70] : memref<2x32x96xf32, #tpu.memory_space<vmem>>, vector<1x32x96xf32>
    %201 = vector.shape_cast %200 : vector<1x32x96xf32> to vector<32x96xf32>
    %c2 = arith.constant 2 : index
    %c0_71 = arith.constant 0 : index
    %202 = vector.load %arg8[%c2, %c0_71] : memref<22x128xf32, #tpu.memory_space<vmem>>, vector<1x96xf32>
    %c0_72 = arith.constant 0 : index
    %c0_73 = arith.constant 0 : index
    %c0_74 = arith.constant 0 : index
    %203 = vector.load %arg5[%c0_72, %c0_73, %c0_74] : memref<2x32x32xf32, #tpu.memory_space<vmem>>, vector<1x32x32xf32>
    %204 = vector.shape_cast %203 : vector<1x32x32xf32> to vector<32x32xf32>
    %c3 = arith.constant 3 : index
    %c0_75 = arith.constant 0 : index
    %205 = vector.load %arg8[%c3, %c0_75] : memref<22x128xf32, #tpu.memory_space<vmem>>, vector<1x32xf32>
    %206 = vector.extract_strided_slice %201 {offsets = [0, 0], sizes = [32, 32], strides = [1, 1]} : vector<32x96xf32> to vector<32x32xf32>
    %cst_76 = arith.constant dense<0.000000e+00> : vector<16x32xf32>
    %207 = tpu.matmul %199, %206, %cst_76 {dimension_numbers = #tpu.dot_dimension_numbers<[1], [0], [0], [1], [0, 0, 1, 1], [], []>} : vector<16x32xf32>, vector<32x32xf32>, vector<16x32xf32> -> vector<16x32xf32>
    %208 = vector.extract_strided_slice %202 {offsets = [0, 0], sizes = [1, 32], strides = [1, 1]} : vector<1x96xf32> to vector<1x32xf32>
    %209 = vector.broadcast %208 : vector<1x32xf32> to vector<16x32xf32>
    %210 = arith.addf %207, %209 : vector<16x32xf32>
    %211 = vector.extract_strided_slice %201 {offsets = [0, 32], sizes = [32, 64], strides = [1, 1]} : vector<32x96xf32> to vector<32x64xf32>
    %cst_77 = arith.constant dense<0.000000e+00> : vector<16x64xf32>
    %212 = tpu.matmul %77, %211, %cst_77 {dimension_numbers = #tpu.dot_dimension_numbers<[1], [0], [0], [1], [0, 0, 1, 1], [], []>} : vector<16x32xf32>, vector<32x64xf32>, vector<16x64xf32> -> vector<16x64xf32>
    %213 = vector.extract_strided_slice %202 {offsets = [0, 32], sizes = [1, 64], strides = [1, 1]} : vector<1x96xf32> to vector<1x64xf32>
    %214 = vector.broadcast %213 : vector<1x64xf32> to vector<16x64xf32>
    %215 = arith.addf %212, %214 : vector<16x64xf32>
    %216 = vector.extract_strided_slice %215 {offsets = [0, 0], sizes = [16, 32], strides = [1, 1]} : vector<16x64xf32> to vector<16x32xf32>
    %217 = vector.extract_strided_slice %215 {offsets = [0, 32], sizes = [16, 32], strides = [1, 1]} : vector<16x64xf32> to vector<16x32xf32>
    %218 = vector.extract_strided_slice %210 {offsets = [0, 0], sizes = [16, 8], strides = [1, 1]} : vector<16x32xf32> to vector<16x8xf32>
    %cst_78 = arith.constant 0.353553385 : f32
    %219 = vector.broadcast %cst_78 : f32 to vector<16x8xf32>
    %220 = arith.mulf %218, %219 : vector<16x8xf32>
    %221 = vector.extract_strided_slice %216 {offsets = [0, 0], sizes = [16, 8], strides = [1, 1]} : vector<16x32xf32> to vector<16x8xf32>
    %cst_79 = arith.constant dense<0.000000e+00> : vector<16x16xf32>
    %222 = tpu.matmul %220, %221, %cst_79 {dimension_numbers = #tpu.dot_dimension_numbers<[1], [1], [0], [0], [0, 0, 1, 0], [], []>} : vector<16x8xf32>, vector<16x8xf32>, vector<16x16xf32> -> vector<16x16xf32>
    %223 = arith.addf %222, %75 : vector<16x16xf32>
    %cst_80 = arith.constant dense<0xFF800000> : vector<16xf32>
    %224 = vector.multi_reduction <maximumf>, %223, %cst_80 [1] : vector<16x16xf32> to vector<16xf32>
    %225 = vector.shape_cast %224 : vector<16xf32> to vector<16x1xf32>
    %226 = vector.broadcast %225 : vector<16x1xf32> to vector<16x16xf32>
    %227 = arith.subf %223, %226 : vector<16x16xf32>
    %228 = math.exp %227 : vector<16x16xf32>
    %cst_81 = arith.constant dense<0.000000e+00> : vector<16xf32>
    %229 = vector.multi_reduction <add>, %228, %cst_81 [1] : vector<16x16xf32> to vector<16xf32>
    %230 = vector.shape_cast %229 : vector<16xf32> to vector<16x1xf32>
    %231 = tpu.reciprocal %230 : vector<16x1xf32> -> vector<16x1xf32>
    %232 = vector.broadcast %231 : vector<16x1xf32> to vector<16x16xf32>
    %233 = arith.mulf %228, %232 : vector<16x16xf32>
    %234 = vector.extract_strided_slice %217 {offsets = [0, 0], sizes = [16, 8], strides = [1, 1]} : vector<16x32xf32> to vector<16x8xf32>
    %cst_82 = arith.constant dense<0.000000e+00> : vector<16x8xf32>
    %235 = tpu.matmul %233, %234, %cst_82 {dimension_numbers = #tpu.dot_dimension_numbers<[1], [0], [0], [1], [0, 0, 1, 1], [], []>} : vector<16x16xf32>, vector<16x8xf32>, vector<16x8xf32> -> vector<16x8xf32>
    %236 = vector.extract_strided_slice %204 {offsets = [0, 0], sizes = [8, 32], strides = [1, 1]} : vector<32x32xf32> to vector<8x32xf32>
    %cst_83 = arith.constant dense<0.000000e+00> : vector<16x32xf32>
    %237 = tpu.matmul %235, %236, %cst_83 {dimension_numbers = #tpu.dot_dimension_numbers<[1], [0], [0], [1], [0, 0, 1, 1], [], []>} : vector<16x8xf32>, vector<8x32xf32>, vector<16x32xf32> -> vector<16x32xf32>
    %238 = vector.extract_strided_slice %210 {offsets = [0, 8], sizes = [16, 8], strides = [1, 1]} : vector<16x32xf32> to vector<16x8xf32>
    %cst_84 = arith.constant 0.353553385 : f32
    %239 = vector.broadcast %cst_84 : f32 to vector<16x8xf32>
    %240 = arith.mulf %238, %239 : vector<16x8xf32>
    %241 = vector.extract_strided_slice %216 {offsets = [0, 8], sizes = [16, 8], strides = [1, 1]} : vector<16x32xf32> to vector<16x8xf32>
    %cst_85 = arith.constant dense<0.000000e+00> : vector<16x16xf32>
    %242 = tpu.matmul %240, %241, %cst_85 {dimension_numbers = #tpu.dot_dimension_numbers<[1], [1], [0], [0], [0, 0, 1, 0], [], []>} : vector<16x8xf32>, vector<16x8xf32>, vector<16x16xf32> -> vector<16x16xf32>
    %243 = arith.addf %242, %75 : vector<16x16xf32>
    %cst_86 = arith.constant dense<0xFF800000> : vector<16xf32>
    %244 = vector.multi_reduction <maximumf>, %243, %cst_86 [1] : vector<16x16xf32> to vector<16xf32>
    %245 = vector.shape_cast %244 : vector<16xf32> to vector<16x1xf32>
    %246 = vector.broadcast %245 : vector<16x1xf32> to vector<16x16xf32>
    %247 = arith.subf %243, %246 : vector<16x16xf32>
    %248 = math.exp %247 : vector<16x16xf32>
    %cst_87 = arith.constant dense<0.000000e+00> : vector<16xf32>
    %249 = vector.multi_reduction <add>, %248, %cst_87 [1] : vector<16x16xf32> to vector<16xf32>
    %250 = vector.shape_cast %249 : vector<16xf32> to vector<16x1xf32>
    %251 = tpu.reciprocal %250 : vector<16x1xf32> -> vector<16x1xf32>
    %252 = vector.broadcast %251 : vector<16x1xf32> to vector<16x16xf32>
    %253 = arith.mulf %248, %252 : vector<16x16xf32>
    %254 = vector.extract_strided_slice %217 {offsets = [0, 8], sizes = [16, 8], strides = [1, 1]} : vector<16x32xf32> to vector<16x8xf32>
    %cst_88 = arith.constant dense<0.000000e+00> : vector<16x8xf32>
    %255 = tpu.matmul %253, %254, %cst_88 {dimension_numbers = #tpu.dot_dimension_numbers<[1], [0], [0], [1], [0, 0, 1, 1], [], []>} : vector<16x16xf32>, vector<16x8xf32>, vector<16x8xf32> -> vector<16x8xf32>
    %256 = vector.extract_strided_slice %204 {offsets = [8, 0], sizes = [8, 32], strides = [1, 1]} : vector<32x32xf32> to vector<8x32xf32>
    %cst_89 = arith.constant dense<0.000000e+00> : vector<16x32xf32>
    %257 = tpu.matmul %255, %256, %cst_89 {dimension_numbers = #tpu.dot_dimension_numbers<[1], [0], [0], [1], [0, 0, 1, 1], [], []>} : vector<16x8xf32>, vector<8x32xf32>, vector<16x32xf32> -> vector<16x32xf32>
    %258 = arith.addf %237, %257 : vector<16x32xf32>
    %259 = vector.extract_strided_slice %210 {offsets = [0, 16], sizes = [16, 8], strides = [1, 1]} : vector<16x32xf32> to vector<16x8xf32>
    %cst_90 = arith.constant 0.353553385 : f32
    %260 = vector.broadcast %cst_90 : f32 to vector<16x8xf32>
    %261 = arith.mulf %259, %260 : vector<16x8xf32>
    %262 = vector.extract_strided_slice %216 {offsets = [0, 16], sizes = [16, 8], strides = [1, 1]} : vector<16x32xf32> to vector<16x8xf32>
    %cst_91 = arith.constant dense<0.000000e+00> : vector<16x16xf32>
    %263 = tpu.matmul %261, %262, %cst_91 {dimension_numbers = #tpu.dot_dimension_numbers<[1], [1], [0], [0], [0, 0, 1, 0], [], []>} : vector<16x8xf32>, vector<16x8xf32>, vector<16x16xf32> -> vector<16x16xf32>
    %264 = arith.addf %263, %75 : vector<16x16xf32>
    %cst_92 = arith.constant dense<0xFF800000> : vector<16xf32>
    %265 = vector.multi_reduction <maximumf>, %264, %cst_92 [1] : vector<16x16xf32> to vector<16xf32>
    %266 = vector.shape_cast %265 : vector<16xf32> to vector<16x1xf32>
    %267 = vector.broadcast %266 : vector<16x1xf32> to vector<16x16xf32>
    %268 = arith.subf %264, %267 : vector<16x16xf32>
    %269 = math.exp %268 : vector<16x16xf32>
    %cst_93 = arith.constant dense<0.000000e+00> : vector<16xf32>
    %270 = vector.multi_reduction <add>, %269, %cst_93 [1] : vector<16x16xf32> to vector<16xf32>
    %271 = vector.shape_cast %270 : vector<16xf32> to vector<16x1xf32>
    %272 = tpu.reciprocal %271 : vector<16x1xf32> -> vector<16x1xf32>
    %273 = vector.broadcast %272 : vector<16x1xf32> to vector<16x16xf32>
    %274 = arith.mulf %269, %273 : vector<16x16xf32>
    %275 = vector.extract_strided_slice %217 {offsets = [0, 16], sizes = [16, 8], strides = [1, 1]} : vector<16x32xf32> to vector<16x8xf32>
    %cst_94 = arith.constant dense<0.000000e+00> : vector<16x8xf32>
    %276 = tpu.matmul %274, %275, %cst_94 {dimension_numbers = #tpu.dot_dimension_numbers<[1], [0], [0], [1], [0, 0, 1, 1], [], []>} : vector<16x16xf32>, vector<16x8xf32>, vector<16x8xf32> -> vector<16x8xf32>
    %277 = vector.extract_strided_slice %204 {offsets = [16, 0], sizes = [8, 32], strides = [1, 1]} : vector<32x32xf32> to vector<8x32xf32>
    %cst_95 = arith.constant dense<0.000000e+00> : vector<16x32xf32>
    %278 = tpu.matmul %276, %277, %cst_95 {dimension_numbers = #tpu.dot_dimension_numbers<[1], [0], [0], [1], [0, 0, 1, 1], [], []>} : vector<16x8xf32>, vector<8x32xf32>, vector<16x32xf32> -> vector<16x32xf32>
    %279 = arith.addf %258, %278 : vector<16x32xf32>
    %280 = vector.extract_strided_slice %210 {offsets = [0, 24], sizes = [16, 8], strides = [1, 1]} : vector<16x32xf32> to vector<16x8xf32>
    %cst_96 = arith.constant 0.353553385 : f32
    %281 = vector.broadcast %cst_96 : f32 to vector<16x8xf32>
    %282 = arith.mulf %280, %281 : vector<16x8xf32>
    %283 = vector.extract_strided_slice %216 {offsets = [0, 24], sizes = [16, 8], strides = [1, 1]} : vector<16x32xf32> to vector<16x8xf32>
    %cst_97 = arith.constant dense<0.000000e+00> : vector<16x16xf32>
    %284 = tpu.matmul %282, %283, %cst_97 {dimension_numbers = #tpu.dot_dimension_numbers<[1], [1], [0], [0], [0, 0, 1, 0], [], []>} : vector<16x8xf32>, vector<16x8xf32>, vector<16x16xf32> -> vector<16x16xf32>
    %285 = arith.addf %284, %75 : vector<16x16xf32>
    %cst_98 = arith.constant dense<0xFF800000> : vector<16xf32>
    %286 = vector.multi_reduction <maximumf>, %285, %cst_98 [1] : vector<16x16xf32> to vector<16xf32>
    %287 = vector.shape_cast %286 : vector<16xf32> to vector<16x1xf32>
    %288 = vector.broadcast %287 : vector<16x1xf32> to vector<16x16xf32>
    %289 = arith.subf %285, %288 : vector<16x16xf32>
    %290 = math.exp %289 : vector<16x16xf32>
    %cst_99 = arith.constant dense<0.000000e+00> : vector<16xf32>
    %291 = vector.multi_reduction <add>, %290, %cst_99 [1] : vector<16x16xf32> to vector<16xf32>
    %292 = vector.shape_cast %291 : vector<16xf32> to vector<16x1xf32>
    %293 = tpu.reciprocal %292 : vector<16x1xf32> -> vector<16x1xf32>
    %294 = vector.broadcast %293 : vector<16x1xf32> to vector<16x16xf32>
    %295 = arith.mulf %290, %294 : vector<16x16xf32>
    %296 = vector.extract_strided_slice %217 {offsets = [0, 24], sizes = [16, 8], strides = [1, 1]} : vector<16x32xf32> to vector<16x8xf32>
    %cst_100 = arith.constant dense<0.000000e+00> : vector<16x8xf32>
    %297 = tpu.matmul %295, %296, %cst_100 {dimension_numbers = #tpu.dot_dimension_numbers<[1], [0], [0], [1], [0, 0, 1, 1], [], []>} : vector<16x16xf32>, vector<16x8xf32>, vector<16x8xf32> -> vector<16x8xf32>
    %298 = vector.extract_strided_slice %204 {offsets = [24, 0], sizes = [8, 32], strides = [1, 1]} : vector<32x32xf32> to vector<8x32xf32>
    %cst_101 = arith.constant dense<0.000000e+00> : vector<16x32xf32>
    %299 = tpu.matmul %297, %298, %cst_101 {dimension_numbers = #tpu.dot_dimension_numbers<[1], [0], [0], [1], [0, 0, 1, 1], [], []>} : vector<16x8xf32>, vector<8x32xf32>, vector<16x32xf32> -> vector<16x32xf32>
    %300 = arith.addf %279, %299 : vector<16x32xf32>
    %301 = vector.broadcast %205 : vector<1x32xf32> to vector<16x32xf32>
    %302 = arith.addf %300, %301 : vector<16x32xf32>
    %303 = arith.addf %199, %302 : vector<16x32xf32>
    %cst_102 = arith.constant dense<0.000000e+00> : vector<16xf32>
    %304 = vector.multi_reduction <add>, %303, %cst_102 [1] : vector<16x32xf32> to vector<16xf32>
    %305 = vector.shape_cast %304 : vector<16xf32> to vector<16x1xf32>
    %cst_103 = arith.constant 3.200000e+01 : f32
    %306 = vector.broadcast %cst_103 : f32 to vector<16x1xf32>
    %307 = arith.divf %305, %306 : vector<16x1xf32>
    %308 = vector.broadcast %307 : vector<16x1xf32> to vector<16x32xf32>
    %309 = arith.subf %303, %308 : vector<16x32xf32>
    %310 = arith.mulf %309, %309 : vector<16x32xf32>
    %cst_104 = arith.constant dense<0.000000e+00> : vector<16xf32>
    %311 = vector.multi_reduction <add>, %310, %cst_104 [1] : vector<16x32xf32> to vector<16xf32>
    %312 = vector.shape_cast %311 : vector<16xf32> to vector<16x1xf32>
    %cst_105 = arith.constant 3.200000e+01 : f32
    %313 = vector.broadcast %cst_105 : f32 to vector<16x1xf32>
    %314 = arith.divf %312, %313 : vector<16x1xf32>
    %315 = vector.broadcast %307 : vector<16x1xf32> to vector<16x32xf32>
    %316 = arith.subf %303, %315 : vector<16x32xf32>
    %cst_106 = arith.constant 9.99999974E-6 : f32
    %317 = vector.broadcast %cst_106 : f32 to vector<16x1xf32>
    %318 = arith.addf %314, %317 : vector<16x1xf32>
    %319 = math.rsqrt %318 : vector<16x1xf32>
    %320 = vector.broadcast %319 : vector<16x1xf32> to vector<16x32xf32>
    %321 = arith.mulf %316, %320 : vector<16x32xf32>
    %322 = vector.broadcast %78 : vector<1x32xf32> to vector<16x32xf32>
    %323 = arith.mulf %321, %322 : vector<16x32xf32>
    %324 = vector.broadcast %79 : vector<1x32xf32> to vector<16x32xf32>
    %325 = arith.addf %323, %324 : vector<16x32xf32>
    %c0_107 = arith.constant 0 : index
    %c0_108 = arith.constant 0 : index
    %c0_109 = arith.constant 0 : index
    %326 = vector.load %arg6[%c0_107, %c0_108, %c0_109] : memref<2x32x64xf32, #tpu.memory_space<vmem>>, vector<1x32x64xf32>
    %327 = vector.shape_cast %326 : vector<1x32x64xf32> to vector<32x64xf32>
    %cst_110 = arith.constant dense<0.000000e+00> : vector<16x64xf32>
    %328 = tpu.matmul %325, %327, %cst_110 {dimension_numbers = #tpu.dot_dimension_numbers<[1], [0], [0], [1], [0, 0, 1, 1], [], []>} : vector<16x32xf32>, vector<32x64xf32>, vector<16x64xf32> -> vector<16x64xf32>
    %c6 = arith.constant 6 : index
    %c0_111 = arith.constant 0 : index
    %329 = vector.load %arg8[%c6, %c0_111] : memref<22x128xf32, #tpu.memory_space<vmem>>, vector<1x64xf32>
    %330 = vector.broadcast %329 : vector<1x64xf32> to vector<16x64xf32>
    %331 = arith.addf %328, %330 : vector<16x64xf32>
    %cst_112 = arith.constant 0.000000e+00 : f32
    %332 = vector.broadcast %cst_112 : f32 to vector<16x64xf32>
    %333 = arith.maximumf %331, %332 : vector<16x64xf32>
    %c0_113 = arith.constant 0 : index
    %c0_114 = arith.constant 0 : index
    %c0_115 = arith.constant 0 : index
    %334 = vector.load %arg7[%c0_113, %c0_114, %c0_115] : memref<2x64x32xf32, #tpu.memory_space<vmem>>, vector<1x64x32xf32>
    %335 = vector.shape_cast %334 : vector<1x64x32xf32> to vector<64x32xf32>
    %cst_116 = arith.constant dense<0.000000e+00> : vector<16x32xf32>
    %336 = tpu.matmul %333, %335, %cst_116 {dimension_numbers = #tpu.dot_dimension_numbers<[1], [0], [0], [1], [0, 0, 1, 1], [], []>} : vector<16x64xf32>, vector<64x32xf32>, vector<16x32xf32> -> vector<16x32xf32>
    %c7 = arith.constant 7 : index
    %c0_117 = arith.constant 0 : index
    %337 = vector.load %arg8[%c7, %c0_117] : memref<22x128xf32, #tpu.memory_space<vmem>>, vector<1x32xf32>
    %338 = vector.broadcast %337 : vector<1x32xf32> to vector<16x32xf32>
    %339 = arith.addf %336, %338 : vector<16x32xf32>
    %340 = arith.addf %339, %325 : vector<16x32xf32>
    %c8 = arith.constant 8 : index
    %c0_118 = arith.constant 0 : index
    %341 = vector.load %arg8[%c8, %c0_118] : memref<22x128xf32, #tpu.memory_space<vmem>>, vector<1x32xf32>
    %c9 = arith.constant 9 : index
    %c0_119 = arith.constant 0 : index
    %342 = vector.load %arg8[%c9, %c0_119] : memref<22x128xf32, #tpu.memory_space<vmem>>, vector<1x32xf32>
    %cst_120 = arith.constant dense<0.000000e+00> : vector<16xf32>
    %343 = vector.multi_reduction <add>, %340, %cst_120 [1] : vector<16x32xf32> to vector<16xf32>
    %344 = vector.shape_cast %343 : vector<16xf32> to vector<16x1xf32>
    %cst_121 = arith.constant 3.200000e+01 : f32
    %345 = vector.broadcast %cst_121 : f32 to vector<16x1xf32>
    %346 = arith.divf %344, %345 : vector<16x1xf32>
    %347 = vector.broadcast %346 : vector<16x1xf32> to vector<16x32xf32>
    %348 = arith.subf %340, %347 : vector<16x32xf32>
    %349 = arith.mulf %348, %348 : vector<16x32xf32>
    %cst_122 = arith.constant dense<0.000000e+00> : vector<16xf32>
    %350 = vector.multi_reduction <add>, %349, %cst_122 [1] : vector<16x32xf32> to vector<16xf32>
    %351 = vector.shape_cast %350 : vector<16xf32> to vector<16x1xf32>
    %cst_123 = arith.constant 3.200000e+01 : f32
    %352 = vector.broadcast %cst_123 : f32 to vector<16x1xf32>
    %353 = arith.divf %351, %352 : vector<16x1xf32>
    %354 = vector.broadcast %346 : vector<16x1xf32> to vector<16x32xf32>
    %355 = arith.subf %340, %354 : vector<16x32xf32>
    %cst_124 = arith.constant 9.99999974E-6 : f32
    %356 = vector.broadcast %cst_124 : f32 to vector<16x1xf32>
    %357 = arith.addf %353, %356 : vector<16x1xf32>
    %358 = math.rsqrt %357 : vector<16x1xf32>
    %359 = vector.broadcast %358 : vector<16x1xf32> to vector<16x32xf32>
    %360 = arith.mulf %355, %359 : vector<16x32xf32>
    %361 = vector.broadcast %341 : vector<1x32xf32> to vector<16x32xf32>
    %362 = arith.mulf %360, %361 : vector<16x32xf32>
    %363 = vector.broadcast %342 : vector<1x32xf32> to vector<16x32xf32>
    %364 = arith.addf %362, %363 : vector<16x32xf32>
    %c14 = arith.constant 14 : index
    %c0_125 = arith.constant 0 : index
    %365 = vector.load %arg8[%c14, %c0_125] : memref<22x128xf32, #tpu.memory_space<vmem>>, vector<1x32xf32>
    %c15 = arith.constant 15 : index
    %c0_126 = arith.constant 0 : index
    %366 = vector.load %arg8[%c15, %c0_126] : memref<22x128xf32, #tpu.memory_space<vmem>>, vector<1x32xf32>
    %c1_127 = arith.constant 1 : index
    %c0_128 = arith.constant 0 : index
    %c0_129 = arith.constant 0 : index
    %367 = vector.load %arg2[%c1_127, %c0_128, %c0_129] : memref<2x32x96xf32, #tpu.memory_space<vmem>>, vector<1x32x96xf32>
    %368 = vector.shape_cast %367 : vector<1x32x96xf32> to vector<32x96xf32>
    %c10 = arith.constant 10 : index
    %c0_130 = arith.constant 0 : index
    %369 = vector.load %arg8[%c10, %c0_130] : memref<22x128xf32, #tpu.memory_space<vmem>>, vector<1x96xf32>
    %c1_131 = arith.constant 1 : index
    %c0_132 = arith.constant 0 : index
    %c0_133 = arith.constant 0 : index
    %370 = vector.load %arg3[%c1_131, %c0_132, %c0_133] : memref<2x32x32xf32, #tpu.memory_space<vmem>>, vector<1x32x32xf32>
    %371 = vector.shape_cast %370 : vector<1x32x32xf32> to vector<32x32xf32>
    %c11 = arith.constant 11 : index
    %c0_134 = arith.constant 0 : index
    %372 = vector.load %arg8[%c11, %c0_134] : memref<22x128xf32, #tpu.memory_space<vmem>>, vector<1x32xf32>
    %cst_135 = arith.constant dense<0.000000e+00> : vector<16x96xf32>
    %373 = tpu.matmul %364, %368, %cst_135 {dimension_numbers = #tpu.dot_dimension_numbers<[1], [0], [0], [1], [0, 0, 1, 1], [], []>} : vector<16x32xf32>, vector<32x96xf32>, vector<16x96xf32> -> vector<16x96xf32>
    %374 = vector.broadcast %369 : vector<1x96xf32> to vector<16x96xf32>
    %375 = arith.addf %373, %374 : vector<16x96xf32>
    %376 = vector.extract_strided_slice %375 {offsets = [0, 0], sizes = [16, 32], strides = [1, 1]} : vector<16x96xf32> to vector<16x32xf32>
    %377 = vector.extract_strided_slice %375 {offsets = [0, 32], sizes = [16, 32], strides = [1, 1]} : vector<16x96xf32> to vector<16x32xf32>
    %378 = vector.extract_strided_slice %375 {offsets = [0, 64], sizes = [16, 32], strides = [1, 1]} : vector<16x96xf32> to vector<16x32xf32>
    %379 = vector.extract_strided_slice %376 {offsets = [0, 0], sizes = [16, 8], strides = [1, 1]} : vector<16x32xf32> to vector<16x8xf32>
    %cst_136 = arith.constant 0.353553385 : f32
    %380 = vector.broadcast %cst_136 : f32 to vector<16x8xf32>
    %381 = arith.mulf %379, %380 : vector<16x8xf32>
    %382 = vector.extract_strided_slice %377 {offsets = [0, 0], sizes = [16, 8], strides = [1, 1]} : vector<16x32xf32> to vector<16x8xf32>
    %cst_137 = arith.constant dense<0.000000e+00> : vector<16x16xf32>
    %383 = tpu.matmul %381, %382, %cst_137 {dimension_numbers = #tpu.dot_dimension_numbers<[1], [1], [0], [0], [0, 0, 1, 0], [], []>} : vector<16x8xf32>, vector<16x8xf32>, vector<16x16xf32> -> vector<16x16xf32>
    %384 = arith.addf %383, %37 : vector<16x16xf32>
    %cst_138 = arith.constant dense<0xFF800000> : vector<16xf32>
    %385 = vector.multi_reduction <maximumf>, %384, %cst_138 [1] : vector<16x16xf32> to vector<16xf32>
    %386 = vector.shape_cast %385 : vector<16xf32> to vector<16x1xf32>
    %387 = vector.broadcast %386 : vector<16x1xf32> to vector<16x16xf32>
    %388 = arith.subf %384, %387 : vector<16x16xf32>
    %389 = math.exp %388 : vector<16x16xf32>
    %cst_139 = arith.constant dense<0.000000e+00> : vector<16xf32>
    %390 = vector.multi_reduction <add>, %389, %cst_139 [1] : vector<16x16xf32> to vector<16xf32>
    %391 = vector.shape_cast %390 : vector<16xf32> to vector<16x1xf32>
    %392 = tpu.reciprocal %391 : vector<16x1xf32> -> vector<16x1xf32>
    %393 = vector.broadcast %392 : vector<16x1xf32> to vector<16x16xf32>
    %394 = arith.mulf %389, %393 : vector<16x16xf32>
    %395 = vector.extract_strided_slice %378 {offsets = [0, 0], sizes = [16, 8], strides = [1, 1]} : vector<16x32xf32> to vector<16x8xf32>
    %cst_140 = arith.constant dense<0.000000e+00> : vector<16x8xf32>
    %396 = tpu.matmul %394, %395, %cst_140 {dimension_numbers = #tpu.dot_dimension_numbers<[1], [0], [0], [1], [0, 0, 1, 1], [], []>} : vector<16x16xf32>, vector<16x8xf32>, vector<16x8xf32> -> vector<16x8xf32>
    %397 = vector.extract_strided_slice %371 {offsets = [0, 0], sizes = [8, 32], strides = [1, 1]} : vector<32x32xf32> to vector<8x32xf32>
    %cst_141 = arith.constant dense<0.000000e+00> : vector<16x32xf32>
    %398 = tpu.matmul %396, %397, %cst_141 {dimension_numbers = #tpu.dot_dimension_numbers<[1], [0], [0], [1], [0, 0, 1, 1], [], []>} : vector<16x8xf32>, vector<8x32xf32>, vector<16x32xf32> -> vector<16x32xf32>
    %399 = vector.extract_strided_slice %376 {offsets = [0, 8], sizes = [16, 8], strides = [1, 1]} : vector<16x32xf32> to vector<16x8xf32>
    %cst_142 = arith.constant 0.353553385 : f32
    %400 = vector.broadcast %cst_142 : f32 to vector<16x8xf32>
    %401 = arith.mulf %399, %400 : vector<16x8xf32>
    %402 = vector.extract_strided_slice %377 {offsets = [0, 8], sizes = [16, 8], strides = [1, 1]} : vector<16x32xf32> to vector<16x8xf32>
    %cst_143 = arith.constant dense<0.000000e+00> : vector<16x16xf32>
    %403 = tpu.matmul %401, %402, %cst_143 {dimension_numbers = #tpu.dot_dimension_numbers<[1], [1], [0], [0], [0, 0, 1, 0], [], []>} : vector<16x8xf32>, vector<16x8xf32>, vector<16x16xf32> -> vector<16x16xf32>
    %404 = arith.addf %403, %37 : vector<16x16xf32>
    %cst_144 = arith.constant dense<0xFF800000> : vector<16xf32>
    %405 = vector.multi_reduction <maximumf>, %404, %cst_144 [1] : vector<16x16xf32> to vector<16xf32>
    %406 = vector.shape_cast %405 : vector<16xf32> to vector<16x1xf32>
    %407 = vector.broadcast %406 : vector<16x1xf32> to vector<16x16xf32>
    %408 = arith.subf %404, %407 : vector<16x16xf32>
    %409 = math.exp %408 : vector<16x16xf32>
    %cst_145 = arith.constant dense<0.000000e+00> : vector<16xf32>
    %410 = vector.multi_reduction <add>, %409, %cst_145 [1] : vector<16x16xf32> to vector<16xf32>
    %411 = vector.shape_cast %410 : vector<16xf32> to vector<16x1xf32>
    %412 = tpu.reciprocal %411 : vector<16x1xf32> -> vector<16x1xf32>
    %413 = vector.broadcast %412 : vector<16x1xf32> to vector<16x16xf32>
    %414 = arith.mulf %409, %413 : vector<16x16xf32>
    %415 = vector.extract_strided_slice %378 {offsets = [0, 8], sizes = [16, 8], strides = [1, 1]} : vector<16x32xf32> to vector<16x8xf32>
    %cst_146 = arith.constant dense<0.000000e+00> : vector<16x8xf32>
    %416 = tpu.matmul %414, %415, %cst_146 {dimension_numbers = #tpu.dot_dimension_numbers<[1], [0], [0], [1], [0, 0, 1, 1], [], []>} : vector<16x16xf32>, vector<16x8xf32>, vector<16x8xf32> -> vector<16x8xf32>
    %417 = vector.extract_strided_slice %371 {offsets = [8, 0], sizes = [8, 32], strides = [1, 1]} : vector<32x32xf32> to vector<8x32xf32>
    %cst_147 = arith.constant dense<0.000000e+00> : vector<16x32xf32>
    %418 = tpu.matmul %416, %417, %cst_147 {dimension_numbers = #tpu.dot_dimension_numbers<[1], [0], [0], [1], [0, 0, 1, 1], [], []>} : vector<16x8xf32>, vector<8x32xf32>, vector<16x32xf32> -> vector<16x32xf32>
    %419 = arith.addf %398, %418 : vector<16x32xf32>
    %420 = vector.extract_strided_slice %376 {offsets = [0, 16], sizes = [16, 8], strides = [1, 1]} : vector<16x32xf32> to vector<16x8xf32>
    %cst_148 = arith.constant 0.353553385 : f32
    %421 = vector.broadcast %cst_148 : f32 to vector<16x8xf32>
    %422 = arith.mulf %420, %421 : vector<16x8xf32>
    %423 = vector.extract_strided_slice %377 {offsets = [0, 16], sizes = [16, 8], strides = [1, 1]} : vector<16x32xf32> to vector<16x8xf32>
    %cst_149 = arith.constant dense<0.000000e+00> : vector<16x16xf32>
    %424 = tpu.matmul %422, %423, %cst_149 {dimension_numbers = #tpu.dot_dimension_numbers<[1], [1], [0], [0], [0, 0, 1, 0], [], []>} : vector<16x8xf32>, vector<16x8xf32>, vector<16x16xf32> -> vector<16x16xf32>
    %425 = arith.addf %424, %37 : vector<16x16xf32>
    %cst_150 = arith.constant dense<0xFF800000> : vector<16xf32>
    %426 = vector.multi_reduction <maximumf>, %425, %cst_150 [1] : vector<16x16xf32> to vector<16xf32>
    %427 = vector.shape_cast %426 : vector<16xf32> to vector<16x1xf32>
    %428 = vector.broadcast %427 : vector<16x1xf32> to vector<16x16xf32>
    %429 = arith.subf %425, %428 : vector<16x16xf32>
    %430 = math.exp %429 : vector<16x16xf32>
    %cst_151 = arith.constant dense<0.000000e+00> : vector<16xf32>
    %431 = vector.multi_reduction <add>, %430, %cst_151 [1] : vector<16x16xf32> to vector<16xf32>
    %432 = vector.shape_cast %431 : vector<16xf32> to vector<16x1xf32>
    %433 = tpu.reciprocal %432 : vector<16x1xf32> -> vector<16x1xf32>
    %434 = vector.broadcast %433 : vector<16x1xf32> to vector<16x16xf32>
    %435 = arith.mulf %430, %434 : vector<16x16xf32>
    %436 = vector.extract_strided_slice %378 {offsets = [0, 16], sizes = [16, 8], strides = [1, 1]} : vector<16x32xf32> to vector<16x8xf32>
    %cst_152 = arith.constant dense<0.000000e+00> : vector<16x8xf32>
    %437 = tpu.matmul %435, %436, %cst_152 {dimension_numbers = #tpu.dot_dimension_numbers<[1], [0], [0], [1], [0, 0, 1, 1], [], []>} : vector<16x16xf32>, vector<16x8xf32>, vector<16x8xf32> -> vector<16x8xf32>
    %438 = vector.extract_strided_slice %371 {offsets = [16, 0], sizes = [8, 32], strides = [1, 1]} : vector<32x32xf32> to vector<8x32xf32>
    %cst_153 = arith.constant dense<0.000000e+00> : vector<16x32xf32>
    %439 = tpu.matmul %437, %438, %cst_153 {dimension_numbers = #tpu.dot_dimension_numbers<[1], [0], [0], [1], [0, 0, 1, 1], [], []>} : vector<16x8xf32>, vector<8x32xf32>, vector<16x32xf32> -> vector<16x32xf32>
    %440 = arith.addf %419, %439 : vector<16x32xf32>
    %441 = vector.extract_strided_slice %376 {offsets = [0, 24], sizes = [16, 8], strides = [1, 1]} : vector<16x32xf32> to vector<16x8xf32>
    %cst_154 = arith.constant 0.353553385 : f32
    %442 = vector.broadcast %cst_154 : f32 to vector<16x8xf32>
    %443 = arith.mulf %441, %442 : vector<16x8xf32>
    %444 = vector.extract_strided_slice %377 {offsets = [0, 24], sizes = [16, 8], strides = [1, 1]} : vector<16x32xf32> to vector<16x8xf32>
    %cst_155 = arith.constant dense<0.000000e+00> : vector<16x16xf32>
    %445 = tpu.matmul %443, %444, %cst_155 {dimension_numbers = #tpu.dot_dimension_numbers<[1], [1], [0], [0], [0, 0, 1, 0], [], []>} : vector<16x8xf32>, vector<16x8xf32>, vector<16x16xf32> -> vector<16x16xf32>
    %446 = arith.addf %445, %37 : vector<16x16xf32>
    %cst_156 = arith.constant dense<0xFF800000> : vector<16xf32>
    %447 = vector.multi_reduction <maximumf>, %446, %cst_156 [1] : vector<16x16xf32> to vector<16xf32>
    %448 = vector.shape_cast %447 : vector<16xf32> to vector<16x1xf32>
    %449 = vector.broadcast %448 : vector<16x1xf32> to vector<16x16xf32>
    %450 = arith.subf %446, %449 : vector<16x16xf32>
    %451 = math.exp %450 : vector<16x16xf32>
    %cst_157 = arith.constant dense<0.000000e+00> : vector<16xf32>
    %452 = vector.multi_reduction <add>, %451, %cst_157 [1] : vector<16x16xf32> to vector<16xf32>
    %453 = vector.shape_cast %452 : vector<16xf32> to vector<16x1xf32>
    %454 = tpu.reciprocal %453 : vector<16x1xf32> -> vector<16x1xf32>
    %455 = vector.broadcast %454 : vector<16x1xf32> to vector<16x16xf32>
    %456 = arith.mulf %451, %455 : vector<16x16xf32>
    %457 = vector.extract_strided_slice %378 {offsets = [0, 24], sizes = [16, 8], strides = [1, 1]} : vector<16x32xf32> to vector<16x8xf32>
    %cst_158 = arith.constant dense<0.000000e+00> : vector<16x8xf32>
    %458 = tpu.matmul %456, %457, %cst_158 {dimension_numbers = #tpu.dot_dimension_numbers<[1], [0], [0], [1], [0, 0, 1, 1], [], []>} : vector<16x16xf32>, vector<16x8xf32>, vector<16x8xf32> -> vector<16x8xf32>
    %459 = vector.extract_strided_slice %371 {offsets = [24, 0], sizes = [8, 32], strides = [1, 1]} : vector<32x32xf32> to vector<8x32xf32>
    %cst_159 = arith.constant dense<0.000000e+00> : vector<16x32xf32>
    %460 = tpu.matmul %458, %459, %cst_159 {dimension_numbers = #tpu.dot_dimension_numbers<[1], [0], [0], [1], [0, 0, 1, 1], [], []>} : vector<16x8xf32>, vector<8x32xf32>, vector<16x32xf32> -> vector<16x32xf32>
    %461 = arith.addf %440, %460 : vector<16x32xf32>
    %462 = vector.broadcast %372 : vector<1x32xf32> to vector<16x32xf32>
    %463 = arith.addf %461, %462 : vector<16x32xf32>
    %464 = arith.addf %364, %463 : vector<16x32xf32>
    %cst_160 = arith.constant dense<0.000000e+00> : vector<16xf32>
    %465 = vector.multi_reduction <add>, %464, %cst_160 [1] : vector<16x32xf32> to vector<16xf32>
    %466 = vector.shape_cast %465 : vector<16xf32> to vector<16x1xf32>
    %cst_161 = arith.constant 3.200000e+01 : f32
    %467 = vector.broadcast %cst_161 : f32 to vector<16x1xf32>
    %468 = arith.divf %466, %467 : vector<16x1xf32>
    %469 = vector.broadcast %468 : vector<16x1xf32> to vector<16x32xf32>
    %470 = arith.subf %464, %469 : vector<16x32xf32>
    %471 = arith.mulf %470, %470 : vector<16x32xf32>
    %cst_162 = arith.constant dense<0.000000e+00> : vector<16xf32>
    %472 = vector.multi_reduction <add>, %471, %cst_162 [1] : vector<16x32xf32> to vector<16xf32>
    %473 = vector.shape_cast %472 : vector<16xf32> to vector<16x1xf32>
    %cst_163 = arith.constant 3.200000e+01 : f32
    %474 = vector.broadcast %cst_163 : f32 to vector<16x1xf32>
    %475 = arith.divf %473, %474 : vector<16x1xf32>
    %476 = vector.broadcast %468 : vector<16x1xf32> to vector<16x32xf32>
    %477 = arith.subf %464, %476 : vector<16x32xf32>
    %cst_164 = arith.constant 9.99999974E-6 : f32
    %478 = vector.broadcast %cst_164 : f32 to vector<16x1xf32>
    %479 = arith.addf %475, %478 : vector<16x1xf32>
    %480 = math.rsqrt %479 : vector<16x1xf32>
    %481 = vector.broadcast %480 : vector<16x1xf32> to vector<16x32xf32>
    %482 = arith.mulf %477, %481 : vector<16x32xf32>
    %483 = vector.broadcast %365 : vector<1x32xf32> to vector<16x32xf32>
    %484 = arith.mulf %482, %483 : vector<16x32xf32>
    %485 = vector.broadcast %366 : vector<1x32xf32> to vector<16x32xf32>
    %486 = arith.addf %484, %485 : vector<16x32xf32>
    %c1_165 = arith.constant 1 : index
    %c0_166 = arith.constant 0 : index
    %c0_167 = arith.constant 0 : index
    %487 = vector.load %arg4[%c1_165, %c0_166, %c0_167] : memref<2x32x96xf32, #tpu.memory_space<vmem>>, vector<1x32x96xf32>
    %488 = vector.shape_cast %487 : vector<1x32x96xf32> to vector<32x96xf32>
    %c12 = arith.constant 12 : index
    %c0_168 = arith.constant 0 : index
    %489 = vector.load %arg8[%c12, %c0_168] : memref<22x128xf32, #tpu.memory_space<vmem>>, vector<1x96xf32>
    %c1_169 = arith.constant 1 : index
    %c0_170 = arith.constant 0 : index
    %c0_171 = arith.constant 0 : index
    %490 = vector.load %arg5[%c1_169, %c0_170, %c0_171] : memref<2x32x32xf32, #tpu.memory_space<vmem>>, vector<1x32x32xf32>
    %491 = vector.shape_cast %490 : vector<1x32x32xf32> to vector<32x32xf32>
    %c13 = arith.constant 13 : index
    %c0_172 = arith.constant 0 : index
    %492 = vector.load %arg8[%c13, %c0_172] : memref<22x128xf32, #tpu.memory_space<vmem>>, vector<1x32xf32>
    %493 = vector.extract_strided_slice %488 {offsets = [0, 0], sizes = [32, 32], strides = [1, 1]} : vector<32x96xf32> to vector<32x32xf32>
    %cst_173 = arith.constant dense<0.000000e+00> : vector<16x32xf32>
    %494 = tpu.matmul %486, %493, %cst_173 {dimension_numbers = #tpu.dot_dimension_numbers<[1], [0], [0], [1], [0, 0, 1, 1], [], []>} : vector<16x32xf32>, vector<32x32xf32>, vector<16x32xf32> -> vector<16x32xf32>
    %495 = vector.extract_strided_slice %489 {offsets = [0, 0], sizes = [1, 32], strides = [1, 1]} : vector<1x96xf32> to vector<1x32xf32>
    %496 = vector.broadcast %495 : vector<1x32xf32> to vector<16x32xf32>
    %497 = arith.addf %494, %496 : vector<16x32xf32>
    %498 = vector.extract_strided_slice %488 {offsets = [0, 32], sizes = [32, 64], strides = [1, 1]} : vector<32x96xf32> to vector<32x64xf32>
    %cst_174 = arith.constant dense<0.000000e+00> : vector<16x64xf32>
    %499 = tpu.matmul %77, %498, %cst_174 {dimension_numbers = #tpu.dot_dimension_numbers<[1], [0], [0], [1], [0, 0, 1, 1], [], []>} : vector<16x32xf32>, vector<32x64xf32>, vector<16x64xf32> -> vector<16x64xf32>
    %500 = vector.extract_strided_slice %489 {offsets = [0, 32], sizes = [1, 64], strides = [1, 1]} : vector<1x96xf32> to vector<1x64xf32>
    %501 = vector.broadcast %500 : vector<1x64xf32> to vector<16x64xf32>
    %502 = arith.addf %499, %501 : vector<16x64xf32>
    %503 = vector.extract_strided_slice %502 {offsets = [0, 0], sizes = [16, 32], strides = [1, 1]} : vector<16x64xf32> to vector<16x32xf32>
    %504 = vector.extract_strided_slice %502 {offsets = [0, 32], sizes = [16, 32], strides = [1, 1]} : vector<16x64xf32> to vector<16x32xf32>
    %505 = vector.extract_strided_slice %497 {offsets = [0, 0], sizes = [16, 8], strides = [1, 1]} : vector<16x32xf32> to vector<16x8xf32>
    %cst_175 = arith.constant 0.353553385 : f32
    %506 = vector.broadcast %cst_175 : f32 to vector<16x8xf32>
    %507 = arith.mulf %505, %506 : vector<16x8xf32>
    %508 = vector.extract_strided_slice %503 {offsets = [0, 0], sizes = [16, 8], strides = [1, 1]} : vector<16x32xf32> to vector<16x8xf32>
    %cst_176 = arith.constant dense<0.000000e+00> : vector<16x16xf32>
    %509 = tpu.matmul %507, %508, %cst_176 {dimension_numbers = #tpu.dot_dimension_numbers<[1], [1], [0], [0], [0, 0, 1, 0], [], []>} : vector<16x8xf32>, vector<16x8xf32>, vector<16x16xf32> -> vector<16x16xf32>
    %510 = arith.addf %509, %75 : vector<16x16xf32>
    %cst_177 = arith.constant dense<0xFF800000> : vector<16xf32>
    %511 = vector.multi_reduction <maximumf>, %510, %cst_177 [1] : vector<16x16xf32> to vector<16xf32>
    %512 = vector.shape_cast %511 : vector<16xf32> to vector<16x1xf32>
    %513 = vector.broadcast %512 : vector<16x1xf32> to vector<16x16xf32>
    %514 = arith.subf %510, %513 : vector<16x16xf32>
    %515 = math.exp %514 : vector<16x16xf32>
    %cst_178 = arith.constant dense<0.000000e+00> : vector<16xf32>
    %516 = vector.multi_reduction <add>, %515, %cst_178 [1] : vector<16x16xf32> to vector<16xf32>
    %517 = vector.shape_cast %516 : vector<16xf32> to vector<16x1xf32>
    %518 = tpu.reciprocal %517 : vector<16x1xf32> -> vector<16x1xf32>
    %519 = vector.broadcast %518 : vector<16x1xf32> to vector<16x16xf32>
    %520 = arith.mulf %515, %519 : vector<16x16xf32>
    %521 = vector.extract_strided_slice %504 {offsets = [0, 0], sizes = [16, 8], strides = [1, 1]} : vector<16x32xf32> to vector<16x8xf32>
    %cst_179 = arith.constant dense<0.000000e+00> : vector<16x8xf32>
    %522 = tpu.matmul %520, %521, %cst_179 {dimension_numbers = #tpu.dot_dimension_numbers<[1], [0], [0], [1], [0, 0, 1, 1], [], []>} : vector<16x16xf32>, vector<16x8xf32>, vector<16x8xf32> -> vector<16x8xf32>
    %523 = vector.extract_strided_slice %491 {offsets = [0, 0], sizes = [8, 32], strides = [1, 1]} : vector<32x32xf32> to vector<8x32xf32>
    %cst_180 = arith.constant dense<0.000000e+00> : vector<16x32xf32>
    %524 = tpu.matmul %522, %523, %cst_180 {dimension_numbers = #tpu.dot_dimension_numbers<[1], [0], [0], [1], [0, 0, 1, 1], [], []>} : vector<16x8xf32>, vector<8x32xf32>, vector<16x32xf32> -> vector<16x32xf32>
    %525 = vector.extract_strided_slice %497 {offsets = [0, 8], sizes = [16, 8], strides = [1, 1]} : vector<16x32xf32> to vector<16x8xf32>
    %cst_181 = arith.constant 0.353553385 : f32
    %526 = vector.broadcast %cst_181 : f32 to vector<16x8xf32>
    %527 = arith.mulf %525, %526 : vector<16x8xf32>
    %528 = vector.extract_strided_slice %503 {offsets = [0, 8], sizes = [16, 8], strides = [1, 1]} : vector<16x32xf32> to vector<16x8xf32>
    %cst_182 = arith.constant dense<0.000000e+00> : vector<16x16xf32>
    %529 = tpu.matmul %527, %528, %cst_182 {dimension_numbers = #tpu.dot_dimension_numbers<[1], [1], [0], [0], [0, 0, 1, 0], [], []>} : vector<16x8xf32>, vector<16x8xf32>, vector<16x16xf32> -> vector<16x16xf32>
    %530 = arith.addf %529, %75 : vector<16x16xf32>
    %cst_183 = arith.constant dense<0xFF800000> : vector<16xf32>
    %531 = vector.multi_reduction <maximumf>, %530, %cst_183 [1] : vector<16x16xf32> to vector<16xf32>
    %532 = vector.shape_cast %531 : vector<16xf32> to vector<16x1xf32>
    %533 = vector.broadcast %532 : vector<16x1xf32> to vector<16x16xf32>
    %534 = arith.subf %530, %533 : vector<16x16xf32>
    %535 = math.exp %534 : vector<16x16xf32>
    %cst_184 = arith.constant dense<0.000000e+00> : vector<16xf32>
    %536 = vector.multi_reduction <add>, %535, %cst_184 [1] : vector<16x16xf32> to vector<16xf32>
    %537 = vector.shape_cast %536 : vector<16xf32> to vector<16x1xf32>
    %538 = tpu.reciprocal %537 : vector<16x1xf32> -> vector<16x1xf32>
    %539 = vector.broadcast %538 : vector<16x1xf32> to vector<16x16xf32>
    %540 = arith.mulf %535, %539 : vector<16x16xf32>
    %541 = vector.extract_strided_slice %504 {offsets = [0, 8], sizes = [16, 8], strides = [1, 1]} : vector<16x32xf32> to vector<16x8xf32>
    %cst_185 = arith.constant dense<0.000000e+00> : vector<16x8xf32>
    %542 = tpu.matmul %540, %541, %cst_185 {dimension_numbers = #tpu.dot_dimension_numbers<[1], [0], [0], [1], [0, 0, 1, 1], [], []>} : vector<16x16xf32>, vector<16x8xf32>, vector<16x8xf32> -> vector<16x8xf32>
    %543 = vector.extract_strided_slice %491 {offsets = [8, 0], sizes = [8, 32], strides = [1, 1]} : vector<32x32xf32> to vector<8x32xf32>
    %cst_186 = arith.constant dense<0.000000e+00> : vector<16x32xf32>
    %544 = tpu.matmul %542, %543, %cst_186 {dimension_numbers = #tpu.dot_dimension_numbers<[1], [0], [0], [1], [0, 0, 1, 1], [], []>} : vector<16x8xf32>, vector<8x32xf32>, vector<16x32xf32> -> vector<16x32xf32>
    %545 = arith.addf %524, %544 : vector<16x32xf32>
    %546 = vector.extract_strided_slice %497 {offsets = [0, 16], sizes = [16, 8], strides = [1, 1]} : vector<16x32xf32> to vector<16x8xf32>
    %cst_187 = arith.constant 0.353553385 : f32
    %547 = vector.broadcast %cst_187 : f32 to vector<16x8xf32>
    %548 = arith.mulf %546, %547 : vector<16x8xf32>
    %549 = vector.extract_strided_slice %503 {offsets = [0, 16], sizes = [16, 8], strides = [1, 1]} : vector<16x32xf32> to vector<16x8xf32>
    %cst_188 = arith.constant dense<0.000000e+00> : vector<16x16xf32>
    %550 = tpu.matmul %548, %549, %cst_188 {dimension_numbers = #tpu.dot_dimension_numbers<[1], [1], [0], [0], [0, 0, 1, 0], [], []>} : vector<16x8xf32>, vector<16x8xf32>, vector<16x16xf32> -> vector<16x16xf32>
    %551 = arith.addf %550, %75 : vector<16x16xf32>
    %cst_189 = arith.constant dense<0xFF800000> : vector<16xf32>
    %552 = vector.multi_reduction <maximumf>, %551, %cst_189 [1] : vector<16x16xf32> to vector<16xf32>
    %553 = vector.shape_cast %552 : vector<16xf32> to vector<16x1xf32>
    %554 = vector.broadcast %553 : vector<16x1xf32> to vector<16x16xf32>
    %555 = arith.subf %551, %554 : vector<16x16xf32>
    %556 = math.exp %555 : vector<16x16xf32>
    %cst_190 = arith.constant dense<0.000000e+00> : vector<16xf32>
    %557 = vector.multi_reduction <add>, %556, %cst_190 [1] : vector<16x16xf32> to vector<16xf32>
    %558 = vector.shape_cast %557 : vector<16xf32> to vector<16x1xf32>
    %559 = tpu.reciprocal %558 : vector<16x1xf32> -> vector<16x1xf32>
    %560 = vector.broadcast %559 : vector<16x1xf32> to vector<16x16xf32>
    %561 = arith.mulf %556, %560 : vector<16x16xf32>
    %562 = vector.extract_strided_slice %504 {offsets = [0, 16], sizes = [16, 8], strides = [1, 1]} : vector<16x32xf32> to vector<16x8xf32>
    %cst_191 = arith.constant dense<0.000000e+00> : vector<16x8xf32>
    %563 = tpu.matmul %561, %562, %cst_191 {dimension_numbers = #tpu.dot_dimension_numbers<[1], [0], [0], [1], [0, 0, 1, 1], [], []>} : vector<16x16xf32>, vector<16x8xf32>, vector<16x8xf32> -> vector<16x8xf32>
    %564 = vector.extract_strided_slice %491 {offsets = [16, 0], sizes = [8, 32], strides = [1, 1]} : vector<32x32xf32> to vector<8x32xf32>
    %cst_192 = arith.constant dense<0.000000e+00> : vector<16x32xf32>
    %565 = tpu.matmul %563, %564, %cst_192 {dimension_numbers = #tpu.dot_dimension_numbers<[1], [0], [0], [1], [0, 0, 1, 1], [], []>} : vector<16x8xf32>, vector<8x32xf32>, vector<16x32xf32> -> vector<16x32xf32>
    %566 = arith.addf %545, %565 : vector<16x32xf32>
    %567 = vector.extract_strided_slice %497 {offsets = [0, 24], sizes = [16, 8], strides = [1, 1]} : vector<16x32xf32> to vector<16x8xf32>
    %cst_193 = arith.constant 0.353553385 : f32
    %568 = vector.broadcast %cst_193 : f32 to vector<16x8xf32>
    %569 = arith.mulf %567, %568 : vector<16x8xf32>
    %570 = vector.extract_strided_slice %503 {offsets = [0, 24], sizes = [16, 8], strides = [1, 1]} : vector<16x32xf32> to vector<16x8xf32>
    %cst_194 = arith.constant dense<0.000000e+00> : vector<16x16xf32>
    %571 = tpu.matmul %569, %570, %cst_194 {dimension_numbers = #tpu.dot_dimension_numbers<[1], [1], [0], [0], [0, 0, 1, 0], [], []>} : vector<16x8xf32>, vector<16x8xf32>, vector<16x16xf32> -> vector<16x16xf32>
    %572 = arith.addf %571, %75 : vector<16x16xf32>
    %cst_195 = arith.constant dense<0xFF800000> : vector<16xf32>
    %573 = vector.multi_reduction <maximumf>, %572, %cst_195 [1] : vector<16x16xf32> to vector<16xf32>
    %574 = vector.shape_cast %573 : vector<16xf32> to vector<16x1xf32>
    %575 = vector.broadcast %574 : vector<16x1xf32> to vector<16x16xf32>
    %576 = arith.subf %572, %575 : vector<16x16xf32>
    %577 = math.exp %576 : vector<16x16xf32>
    %cst_196 = arith.constant dense<0.000000e+00> : vector<16xf32>
    %578 = vector.multi_reduction <add>, %577, %cst_196 [1] : vector<16x16xf32> to vector<16xf32>
    %579 = vector.shape_cast %578 : vector<16xf32> to vector<16x1xf32>
    %580 = tpu.reciprocal %579 : vector<16x1xf32> -> vector<16x1xf32>
    %581 = vector.broadcast %580 : vector<16x1xf32> to vector<16x16xf32>
    %582 = arith.mulf %577, %581 : vector<16x16xf32>
    %583 = vector.extract_strided_slice %504 {offsets = [0, 24], sizes = [16, 8], strides = [1, 1]} : vector<16x32xf32> to vector<16x8xf32>
    %cst_197 = arith.constant dense<0.000000e+00> : vector<16x8xf32>
    %584 = tpu.matmul %582, %583, %cst_197 {dimension_numbers = #tpu.dot_dimension_numbers<[1], [0], [0], [1], [0, 0, 1, 1], [], []>} : vector<16x16xf32>, vector<16x8xf32>, vector<16x8xf32> -> vector<16x8xf32>
    %585 = vector.extract_strided_slice %491 {offsets = [24, 0], sizes = [8, 32], strides = [1, 1]} : vector<32x32xf32> to vector<8x32xf32>
    %cst_198 = arith.constant dense<0.000000e+00> : vector<16x32xf32>
    %586 = tpu.matmul %584, %585, %cst_198 {dimension_numbers = #tpu.dot_dimension_numbers<[1], [0], [0], [1], [0, 0, 1, 1], [], []>} : vector<16x8xf32>, vector<8x32xf32>, vector<16x32xf32> -> vector<16x32xf32>
    %587 = arith.addf %566, %586 : vector<16x32xf32>
    %588 = vector.broadcast %492 : vector<1x32xf32> to vector<16x32xf32>
    %589 = arith.addf %587, %588 : vector<16x32xf32>
    %590 = arith.addf %486, %589 : vector<16x32xf32>
    %cst_199 = arith.constant dense<0.000000e+00> : vector<16xf32>
    %591 = vector.multi_reduction <add>, %590, %cst_199 [1] : vector<16x32xf32> to vector<16xf32>
    %592 = vector.shape_cast %591 : vector<16xf32> to vector<16x1xf32>
    %cst_200 = arith.constant 3.200000e+01 : f32
    %593 = vector.broadcast %cst_200 : f32 to vector<16x1xf32>
    %594 = arith.divf %592, %593 : vector<16x1xf32>
    %595 = vector.broadcast %594 : vector<16x1xf32> to vector<16x32xf32>
    %596 = arith.subf %590, %595 : vector<16x32xf32>
    %597 = arith.mulf %596, %596 : vector<16x32xf32>
    %cst_201 = arith.constant dense<0.000000e+00> : vector<16xf32>
    %598 = vector.multi_reduction <add>, %597, %cst_201 [1] : vector<16x32xf32> to vector<16xf32>
    %599 = vector.shape_cast %598 : vector<16xf32> to vector<16x1xf32>
    %cst_202 = arith.constant 3.200000e+01 : f32
    %600 = vector.broadcast %cst_202 : f32 to vector<16x1xf32>
    %601 = arith.divf %599, %600 : vector<16x1xf32>
    %602 = vector.broadcast %594 : vector<16x1xf32> to vector<16x32xf32>
    %603 = arith.subf %590, %602 : vector<16x32xf32>
    %cst_203 = arith.constant 9.99999974E-6 : f32
    %604 = vector.broadcast %cst_203 : f32 to vector<16x1xf32>
    %605 = arith.addf %601, %604 : vector<16x1xf32>
    %606 = math.rsqrt %605 : vector<16x1xf32>
    %607 = vector.broadcast %606 : vector<16x1xf32> to vector<16x32xf32>
    %608 = arith.mulf %603, %607 : vector<16x32xf32>
    %609 = vector.broadcast %365 : vector<1x32xf32> to vector<16x32xf32>
    %610 = arith.mulf %608, %609 : vector<16x32xf32>
    %611 = vector.broadcast %366 : vector<1x32xf32> to vector<16x32xf32>
    %612 = arith.addf %610, %611 : vector<16x32xf32>
    %c1_204 = arith.constant 1 : index
    %c0_205 = arith.constant 0 : index
    %c0_206 = arith.constant 0 : index
    %613 = vector.load %arg6[%c1_204, %c0_205, %c0_206] : memref<2x32x64xf32, #tpu.memory_space<vmem>>, vector<1x32x64xf32>
    %614 = vector.shape_cast %613 : vector<1x32x64xf32> to vector<32x64xf32>
    %cst_207 = arith.constant dense<0.000000e+00> : vector<16x64xf32>
    %615 = tpu.matmul %612, %614, %cst_207 {dimension_numbers = #tpu.dot_dimension_numbers<[1], [0], [0], [1], [0, 0, 1, 1], [], []>} : vector<16x32xf32>, vector<32x64xf32>, vector<16x64xf32> -> vector<16x64xf32>
    %c16 = arith.constant 16 : index
    %c0_208 = arith.constant 0 : index
    %616 = vector.load %arg8[%c16, %c0_208] : memref<22x128xf32, #tpu.memory_space<vmem>>, vector<1x64xf32>
    %617 = vector.broadcast %616 : vector<1x64xf32> to vector<16x64xf32>
    %618 = arith.addf %615, %617 : vector<16x64xf32>
    %cst_209 = arith.constant 0.000000e+00 : f32
    %619 = vector.broadcast %cst_209 : f32 to vector<16x64xf32>
    %620 = arith.maximumf %618, %619 : vector<16x64xf32>
    %c1_210 = arith.constant 1 : index
    %c0_211 = arith.constant 0 : index
    %c0_212 = arith.constant 0 : index
    %621 = vector.load %arg7[%c1_210, %c0_211, %c0_212] : memref<2x64x32xf32, #tpu.memory_space<vmem>>, vector<1x64x32xf32>
    %622 = vector.shape_cast %621 : vector<1x64x32xf32> to vector<64x32xf32>
    %cst_213 = arith.constant dense<0.000000e+00> : vector<16x32xf32>
    %623 = tpu.matmul %620, %622, %cst_213 {dimension_numbers = #tpu.dot_dimension_numbers<[1], [0], [0], [1], [0, 0, 1, 1], [], []>} : vector<16x64xf32>, vector<64x32xf32>, vector<16x32xf32> -> vector<16x32xf32>
    %c17 = arith.constant 17 : index
    %c0_214 = arith.constant 0 : index
    %624 = vector.load %arg8[%c17, %c0_214] : memref<22x128xf32, #tpu.memory_space<vmem>>, vector<1x32xf32>
    %625 = vector.broadcast %624 : vector<1x32xf32> to vector<16x32xf32>
    %626 = arith.addf %623, %625 : vector<16x32xf32>
    %627 = arith.addf %626, %612 : vector<16x32xf32>
    %c18 = arith.constant 18 : index
    %c0_215 = arith.constant 0 : index
    %628 = vector.load %arg8[%c18, %c0_215] : memref<22x128xf32, #tpu.memory_space<vmem>>, vector<1x32xf32>
    %c19 = arith.constant 19 : index
    %c0_216 = arith.constant 0 : index
    %629 = vector.load %arg8[%c19, %c0_216] : memref<22x128xf32, #tpu.memory_space<vmem>>, vector<1x32xf32>
    %cst_217 = arith.constant dense<0.000000e+00> : vector<16xf32>
    %630 = vector.multi_reduction <add>, %627, %cst_217 [1] : vector<16x32xf32> to vector<16xf32>
    %631 = vector.shape_cast %630 : vector<16xf32> to vector<16x1xf32>
    %cst_218 = arith.constant 3.200000e+01 : f32
    %632 = vector.broadcast %cst_218 : f32 to vector<16x1xf32>
    %633 = arith.divf %631, %632 : vector<16x1xf32>
    %634 = vector.broadcast %633 : vector<16x1xf32> to vector<16x32xf32>
    %635 = arith.subf %627, %634 : vector<16x32xf32>
    %636 = arith.mulf %635, %635 : vector<16x32xf32>
    %cst_219 = arith.constant dense<0.000000e+00> : vector<16xf32>
    %637 = vector.multi_reduction <add>, %636, %cst_219 [1] : vector<16x32xf32> to vector<16xf32>
    %638 = vector.shape_cast %637 : vector<16xf32> to vector<16x1xf32>
    %cst_220 = arith.constant 3.200000e+01 : f32
    %639 = vector.broadcast %cst_220 : f32 to vector<16x1xf32>
    %640 = arith.divf %638, %639 : vector<16x1xf32>
    %641 = vector.broadcast %633 : vector<16x1xf32> to vector<16x32xf32>
    %642 = arith.subf %627, %641 : vector<16x32xf32>
    %cst_221 = arith.constant 9.99999974E-6 : f32
    %643 = vector.broadcast %cst_221 : f32 to vector<16x1xf32>
    %644 = arith.addf %640, %643 : vector<16x1xf32>
    %645 = math.rsqrt %644 : vector<16x1xf32>
    %646 = vector.broadcast %645 : vector<16x1xf32> to vector<16x32xf32>
    %647 = arith.mulf %642, %646 : vector<16x32xf32>
    %648 = vector.broadcast %628 : vector<1x32xf32> to vector<16x32xf32>
    %649 = arith.mulf %647, %648 : vector<16x32xf32>
    %650 = vector.broadcast %629 : vector<1x32xf32> to vector<16x32xf32>
    %651 = arith.addf %649, %650 : vector<16x32xf32>
    %c20 = arith.constant 20 : index
    %c0_222 = arith.constant 0 : index
    %652 = vector.load %arg8[%c20, %c0_222] : memref<22x128xf32, #tpu.memory_space<vmem>>, vector<1x32xf32>
    %c21 = arith.constant 21 : index
    %c0_223 = arith.constant 0 : index
    %653 = vector.load %arg8[%c21, %c0_223] : memref<22x128xf32, #tpu.memory_space<vmem>>, vector<1x32xf32>
    %cst_224 = arith.constant dense<0.000000e+00> : vector<16xf32>
    %654 = vector.multi_reduction <add>, %651, %cst_224 [1] : vector<16x32xf32> to vector<16xf32>
    %655 = vector.shape_cast %654 : vector<16xf32> to vector<16x1xf32>
    %cst_225 = arith.constant 3.200000e+01 : f32
    %656 = vector.broadcast %cst_225 : f32 to vector<16x1xf32>
    %657 = arith.divf %655, %656 : vector<16x1xf32>
    %658 = vector.broadcast %657 : vector<16x1xf32> to vector<16x32xf32>
    %659 = arith.subf %651, %658 : vector<16x32xf32>
    %660 = arith.mulf %659, %659 : vector<16x32xf32>
    %cst_226 = arith.constant dense<0.000000e+00> : vector<16xf32>
    %661 = vector.multi_reduction <add>, %660, %cst_226 [1] : vector<16x32xf32> to vector<16xf32>
    %662 = vector.shape_cast %661 : vector<16xf32> to vector<16x1xf32>
    %cst_227 = arith.constant 3.200000e+01 : f32
    %663 = vector.broadcast %cst_227 : f32 to vector<16x1xf32>
    %664 = arith.divf %662, %663 : vector<16x1xf32>
    %665 = vector.broadcast %657 : vector<16x1xf32> to vector<16x32xf32>
    %666 = arith.subf %651, %665 : vector<16x32xf32>
    %cst_228 = arith.constant 9.99999974E-6 : f32
    %667 = vector.broadcast %cst_228 : f32 to vector<16x1xf32>
    %668 = arith.addf %664, %667 : vector<16x1xf32>
    %669 = math.rsqrt %668 : vector<16x1xf32>
    %670 = vector.broadcast %669 : vector<16x1xf32> to vector<16x32xf32>
    %671 = arith.mulf %666, %670 : vector<16x32xf32>
    %672 = vector.broadcast %652 : vector<1x32xf32> to vector<16x32xf32>
    %673 = arith.mulf %671, %672 : vector<16x32xf32>
    %674 = vector.broadcast %653 : vector<1x32xf32> to vector<16x32xf32>
    %675 = arith.addf %673, %674 : vector<16x32xf32>
    %c0_229 = arith.constant 0 : index
    %c0_230 = arith.constant 0 : index
    %676 = vector.load %arg9[%c0_229, %c0_230] : memref<16x32xf32, #tpu.memory_space<vmem>>, vector<16x32xf32>
    tpu.vector_store %arg9[%c0_229, %c0_230], %675 {strides = array<i32>} : memref<16x32xf32, #tpu.memory_space<vmem>>, vector<16x32xf32>,
    return
  }
}

</mosaic_0001>

<bundles_post_ra>
// kernel: transformer_decoder.1
= control target key start
LH: loop header
LB: loop body
LE: loop exit
PB: predicated region body
PF: predicated region fallthrough
CT: control target
= control target key end

     0   :  { %14 = vsyncpa [#allocation3], 0  ;;  %s8400_s0 = inlined_call_operand.hbm [shape: f32[16,32], index: 0, kind: input, shape index: {}]   ;;  %s8401_s1 = inlined_call_operand.hbm [shape: f32[16,32], index: 1, kind: input, shape index: {}]   ;;  %s8402_s2 = inlined_call_operand.vmem [shape: f32[2,32,96], index: 2, kind: input, shape index: {}]   ;;  %s8403_s3 = inlined_call_operand.vmem [shape: f32[2,32,32], index: 3, kind: input, shape index: {}]   ;;  %s8404_s4 = inlined_call_operand.vmem [shape: f32[2,32,96], index: 4, kind: input, shape index: {}]   ;;  %s8405_s5 = inlined_call_operand.hbm [shape: f32[2,32,32], index: 5, kind: input, shape index: {}]   ;;  %s8406_s6 = inlined_call_operand.hbm [shape: f32[2,32,64], index: 6, kind: input, shape index: {}]   ;;  %s8407_s7 = inlined_call_operand.vmem [shape: f32[2,64,32], index: 7, kind: input, shape index: {}]   ;;  %s8408_s8 = inlined_call_operand.vmem [shape: f32[22,128], index: 8, kind: input, shape index: {}]   ;;  %s8409_s9 = inlined_call_operand.hbm [shape: f32[16,32], index: 9, kind: output, shape index: {}]  }
   0x1   :  { %15 = vsyncpa [#allocation6], 0 }
   0x2   :  { %16 = vsyncpa [#allocation9], 0 }
   0x3   :  { %17 = vsyncpa [#allocation4], 0  ;;  %s7534_s30 = smov [#allocation5]   ;;  %s7535_s11 = smov [#allocation2]  }
   0x4   :  { %s35_s10 = sshll.u32 %s7534_s30, 4  ;;  %s23_s12 = sshll.u32 %s7535_s11, 4  ;;  %s36_s10 = int_to_ptr.vmem [resolvable:$true] %s35_s10  ;;  %s7603_s12 = int_to_ptr.vmem [resolvable:$true] %s23_s12 }
   0x5   :  { %s7416_s15 = scalar_lea.hbm %s8401_s1, 256 }
   0x6   :  { %p7417_p0 = scmp.ne.s32.totalorder %s8401_s1, %s7416_s15  ;;  %p7420_p1 = scmp.lt.u32.totalorder %s7416_s15, %s8401_s1 }
   0x8   :  { %p7422_p2 = pnand %p7420_p1, %p7417_p0 }
   0xa   :  { %7425 = shalt.err (!%p7422_p2)
}
   0xb   :  { %s7426_s20 = scalar_lea.vmem %s36_s10, 256  ;;  %p7431_p4 = scmp.lt.s32.totalorder %s36_s10, %s36_s10 }
   0xc   :  { %p7427_p3 = scmp.ne.s32.totalorder %s36_s10, %s7426_s20  ;;  %p7432_p5 = scmp.lt.s32.totalorder %s7426_s20, %s7426_s20 }
   0xe   :  { %p7433_p6 = por %p7432_p5, %p7431_p4 }
  0x10   :  { %p7434_p7 = pnand %p7433_p6, %p7427_p3 }
  0x12   :  { %7437 = shalt.err (!%p7434_p7)
}
  0x13   :  { %s7536_s21 = smov 128   ;;  %s7537_s22 = smov 8  }
  0x14   :  { %41 = dma.hbm_to_vmem [thread:$0]  %s8401_s1, 256, %s36_s10, [#allocation6], %s7536_s21, %s7536_s21, %s7537_s22  }
  0x15   :  { %s7438_s27 = scalar_lea.hbm %s8400_s0, 256 }
  0x16   :  { %p7439_p8 = scmp.ne.s32.totalorder %s8400_s0, %s7438_s27  ;;  %p7442_p9 = scmp.lt.u32.totalorder %s7438_s27, %s8400_s0 }
  0x18   :  { %p7444_p10 = pnand %p7442_p9, %p7439_p8 }
  0x1a   :  { %7447 = shalt.err (!%p7444_p10)
}
  0x1b   :  { %s7448_s13 = scalar_lea.vmem %s7603_s12, 256  ;;  %p7453_p12 = scmp.lt.s32.totalorder %s7603_s12, %s7603_s12 }
  0x1c   :  { %p7449_p11 = scmp.ne.s32.totalorder %s7603_s12, %s7448_s13  ;;  %p7454_p13 = scmp.lt.s32.totalorder %s7448_s13, %s7448_s13 }
  0x1e   :  { %p7455_p0 = por %p7454_p13, %p7453_p12 }
  0x20   :  { %p7456_p1 = pnand %p7455_p0, %p7449_p11 }
  0x22   :  { %7459 = shalt.err (!%p7456_p1)
}
  0x23   :  { %29 = dma.hbm_to_vmem [thread:$0]  %s8400_s0, 256, %s7603_s12, [#allocation3], %s7536_s21, %s7536_s21, %s7537_s22  }
  0x24   :  { %s7538_s14 = smov [#allocation7]   ;;  %s7539_s16 = smov [#allocation8]  }
  0x25   :  { %s53_s15 = sshll.u32 %s7538_s14, 4  ;;  %s65_s17 = sshll.u32 %s7539_s16, 4  ;;  %s54_s15 = int_to_ptr.vmem [resolvable:$true] %s53_s15  ;;  %s7640_s17 = int_to_ptr.vmem [resolvable:$true] %s65_s17 }
  0x26   :  { %s7460_s20 = scalar_lea.hbm %s8405_s5, 1024 }
  0x27   :  { %p7461_p2 = scmp.ne.s32.totalorder %s8405_s5, %s7460_s20  ;;  %p7464_p3 = scmp.lt.u32.totalorder %s7460_s20, %s8405_s5 }
  0x29   :  { %p7466_p4 = pnand %p7464_p3, %p7461_p2 }
  0x2b   :  { %7469 = shalt.err (!%p7466_p4)
}
  0x2c   :  { %s7470_s0 = scalar_lea.vmem %s54_s15, 1024  ;;  %p7475_p6 = scmp.lt.s32.totalorder %s54_s15, %s54_s15 }
  0x2d   :  { %p7471_p5 = scmp.ne.s32.totalorder %s54_s15, %s7470_s0  ;;  %p7476_p7 = scmp.lt.s32.totalorder %s7470_s0, %s7470_s0 }
  0x2f   :  { %p7477_p8 = por %p7476_p7, %p7475_p6 }
  0x31   :  { %p7478_p9 = pnand %p7477_p8, %p7471_p5 }
  0x33   :  { %7481 = shalt.err (!%p7478_p9)
}
  0x34   :  { %59 = dma.hbm_to_vmem [thread:$0]  %s8405_s5, 1024, %s54_s15, [#allocation6], %s7536_s21, %s7536_s21, %s7537_s22  }
  0x35   :  { %s7482_s30 = scalar_lea.hbm %s8406_s6, 1024 }
  0x36   :  { %p7483_p10 = scmp.ne.s32.totalorder %s8406_s6, %s7482_s30  ;;  %p7486_p11 = scmp.lt.u32.totalorder %s7482_s30, %s8406_s6 }
  0x38   :  { %p7488_p12 = pnand %p7486_p11, %p7483_p10 }
  0x3a   :  { %7491 = shalt.err (!%p7488_p12)
}
  0x3b   :  { %s7492_s14 = scalar_lea.vmem %s7640_s17, 1024  ;;  %p7497_p0 = scmp.lt.s32.totalorder %s7640_s17, %s7640_s17 }
  0x3c   :  { %p7493_p13 = scmp.ne.s32.totalorder %s7640_s17, %s7492_s14  ;;  %p7498_p1 = scmp.lt.s32.totalorder %s7492_s14, %s7492_s14 }
  0x3e   :  { %p7499_p2 = por %p7498_p1, %p7497_p0 }
  0x40   :  { %p7500_p3 = pnand %p7499_p2, %p7493_p13 }
  0x42   :  { %7503 = shalt.err (!%p7500_p3)
}
  0x43   :  { %71 = dma.hbm_to_vmem [thread:$0]  %s8406_s6, 1024, %s7640_s17, [#allocation9], %s7536_s21, %s7536_s21, %s7537_s22  }
  0x44   :  { %7526 = dma.done.wait [#allocation3], 256  }
  0x45   :  { %7527 = vsyncadd [#allocation3], 4294967040 }
  0x46   :  { %7528 = dma.done.wait [#allocation6], 1280  }
  0x47   :  { %7529 = vsyncadd [#allocation6], 4294966016 }
  0x48   :  { %7530 = dma.done.wait [#allocation9], 1024  }
  0x49   :  { %7531 = vsyncadd [#allocation9], 4294966272  ;;  %vm153_vm0 = vcmask 261120   ;;  %v139_v0 = vld [vmem:[%s8402_s2] sm:$0xff]  ;;  %v140_v1 = vld [vmem:[%s8402_s2 + $0x8] sm:$0xff]  ;;  %vm243_vm1 = vcmask 64512   ;;  %v88_v33 = vlaneseq }
  0x4a   :  { %v141_v2 = vld [vmem:[%s8402_s2 + $0x10] sm:$0xff]  ;;  %v6789_v3 = vpack.c.bf16 %v140_v1, %v139_v0  ;;  %v142_v4 = vld [vmem:[%s8402_s2 + $0x18] sm:$0xff]  ;;  %v7689_v5 = vld [vmem:[#allocation2] sm:$0xff]  ;;  %s7540_s0 = smov 96   ;;  %s7541_s12 = smov 120   ;;  %vm329_vm5 = vcmask 130048  }
  0x4b   :  { %v6793_v6 = vpack.c.bf16 %v142_v4, %v141_v2  ;;  %6367 = vmatprep.mubr.msk.f32.mxu1 %vm153_vm0, %v7689_v5  ;;  %v7693_v7 = vld [vmem:[#allocation2 + $0x8] sm:$0xff]  ;;  %v5925_v8 = vld [vmem:[%s8408_s8] ss:$0 sm:$0xff]  ;;  %s7542_s27 = smov 88   ;;  %s7543_s28 = smov 80   ;;  %vm7724_vm2 = vmpackc.low %vm243_vm1, %vm243_vm1  ;;  %v89_v34 = vshrl.u32 %v88_v33, 7 }
  0x4c   :  { %6790 = vmatprep.subr.bf16.mxu1 %v6789_v3  ;;  %s7544_s29 = smov 112   ;;  %v116_v36 = vand.u32 127, %v88_v33  ;;  %v7545_v40 = vmov -1e+30   ;;  %s7546_s30 = smov 56   ;;  %vm2879_vm6 = vcmask 523264  }
  0x4d   :  { %6792 = vmatpush3.bf16.msra.mxu1 %v6789_v3  ;;  %v90_v35 = vadd.s32 8, %v89_v34  ;;  %v95_v39 = vand.u32 1, %v89_v34  ;;  %s7547_s11 = smov 72   ;;  %s7548_s13 = smov 64  }
  0x4e   :  { %6794 = vmatprep.subr.bf16.mxu1 %v6793_v6  ;;  %v121_v38 = vand.u32 1, %v116_v36  ;;  %s7549_s1 = smov 104   ;;  %s7550_s10 = smov 48  }
  0x4f   :  { %v102_v37 = vand.u32 1, %v90_v35  ;;  %s7551_s14 = smov 40  }
  0x50   :  { %vm129_vm4 = vcmp.eq.s32.totalorder %v95_v39, %v121_v38 }
  0x51   :  { %6796 = vmatpush3.bf16.msra.mxu1 %v6793_v6  ;;  %vm130_vm3 = vcmp.eq.s32.totalorder %v102_v37, %v121_v38  ;;  %v7748_v42 = vsel %vm129_vm4, 0.0, %v7545_v40 }
  0x52   :  { %v7746_v41 = vsel %vm130_vm3, 0.0, %v7545_v40 }
  0x54   :  { %6368 = vmatmul.mubr.msk.f32.vlgmr.msra.gmra.mrb[0].mxu1 %vm153_vm0, %v7693_v7 }
 0x127   :  { %v6369_v9 = vpop.f32.mrb[0].mxu1 }
 0x128   :  { %v232_v10 = vadd.f32 %v6369_v9, %v5925_v8  ;;  %v226_v11 = vpop.f32.mrb[1].mxu1 }
 0x129   :  { %v227_v12 = vadd.f32 %v5925_v8, %v226_v11 }
 0x12a   :  { %v7710_v15 = vmul.f32 0.35355338, %v232_v10 }
 0x12b   :  { %v7700_v13 = vpack.i.bf16 %v232_v10, %v227_v12  ;;  %v7702_v14 = vmul.f32 0.35355338, %v227_v12 }
 0x12d   :  { %7089 = vrot.lane.b32.xlu0 %v7700_v13, %s7540_s0  ;;  %439 = vrot.lane.b32.xlu1 %v7702_v14, %s7541_s12 }
 0x12e   :  { %6374 = vmatprep.mubr.msk.f32.mxu1 %vm243_vm1, %v7702_v14 }
 0x131   :  { %7094 = vrot.lane.b32.xlu0 %v7700_v13, %s7542_s27  ;;  %441 = vrot.lane.b32.xlu1 %v7710_v15, %s7541_s12 }
 0x135   :  { %7099 = vrot.lane.b32.xlu0 %v7700_v13, %s7543_s28  ;;  %801 = vrot.lane.b32.xlu1 %v7702_v14, %s7544_s29 }
 0x139   :  { %803 = vrot.lane.b32.xlu0 %v7710_v15, %s7544_s29 }
 0x19f   :  { %v7090_v16 = vpop.permute.xlu0 %7089  ;;  %v440_v26 = vpop.permute.xlu1 %439 }
 0x1a0   :  { %v7092_v17 = vunpack.i.h.bf16 %v7090_v16  ;;  %v7091_v18 = vunpack.i.l.bf16 %v7090_v16 }
 0x1a2   :  { %v6797_v20 = vpack.c.bf16 %v7092_v17, %v7091_v18 }
 0x1a3   :  { %v7095_v21 = vpop.permute.xlu0 %7094  ;;  %v442_v30 = vpop.permute.xlu1 %441 }
 0x1a4   :  { %v7097_v22 = vunpack.i.h.bf16 %v7095_v21  ;;  %v7096_v23 = vunpack.i.l.bf16 %v7095_v21  ;;  %6799 = vmatprep.subr.msk.bf16.mxu1 %vm7724_vm2, %v6797_v20 }
 0x1a5   :  { %6802 = vmatpush3.bf16.xpose.msk.msra.mxu1 %vm7724_vm2, %v6797_v20 }
 0x1a6   :  { %v6807_v24 = vpack.c.bf16 %v7097_v22, %v7096_v23 }
 0x1a7   :  { %v7100_v25 = vpop.permute.xlu0 %7099  ;;  %v802_v31 = vpop.permute.xlu1 %801 }
 0x1a8   :  { %v7102_v27 = vunpack.i.h.bf16 %v7100_v25  ;;  %v7101_v28 = vunpack.i.l.bf16 %v7100_v25  ;;  %6809 = vmatprep.subr.msk.bf16.mxu1 %vm7724_vm2, %v6807_v24 }
 0x1aa   :  { %v6817_v29 = vpack.c.bf16 %v7102_v27, %v7101_v28 }
 0x1ab   :  { %v804_v32 = vpop.permute.xlu0 %803 }
 0x1ac   :  { %6375 = vmatmul.mubr.msk.f32.vlgmr.msra.gmra.mrb[2].mxu1 %vm243_vm1, %v7710_v15 }
 0x1ad   :  { %6812 = vmatpush3.bf16.xpose.msk.msra.mxu1 %vm7724_vm2, %v6807_v24  ;;  %6388 = vmatprep.mubr.msk.f32.mxu1 %vm243_vm1, %v440_v26 }
 0x1ae   :  { %6819 = vmatprep.subr.msk.bf16.mxu1 %vm7724_vm2, %v6817_v29 }
 0x1b4   :  { %6389 = vmatmul.mubr.msk.f32.vlgmr.msra.gmra.mrb[4].mxu1 %vm243_vm1, %v442_v30 }
 0x1b5   :  { %6822 = vmatpush3.bf16.xpose.msk.msra.mxu1 %vm7724_vm2, %v6817_v29  ;;  %6412 = vmatprep.mubr.msk.f32.mxu1 %vm243_vm1, %v802_v31 }
 0x1bc   :  { %6413 = vmatmul.mubr.msk.f32.vlgmr.msra.gmra.mrb[6].mxu1 %vm243_vm1, %v804_v32 }
 0x27f   :  { %v6376_v43 = vpop.f32.mrb[2].mxu1 }
 0x280   :  { %v326_v44 = vadd.f32 %v6376_v43, %v7746_v41  ;;  %v320_v45 = vpop.f32.mrb[3].mxu1 }
 0x281   :  { %v321_v46 = vadd.f32 %v320_v45, %v7748_v42 }
 0x282   :  { %v333_v47 = vsel %vm329_vm5, %v326_v44, -inf }
 0x283   :  { %334 = vmax.xlane.f32.xlu0 %v333_v47  ;;  %v330_v48 = vsel %vm329_vm5, %v321_v46, -inf }
 0x284   :  { %331 = vmax.xlane.f32.xlu1 %v330_v48 }
 0x287   :  { %v6390_v49 = vpop.f32.mrb[4].mxu1 }
 0x288   :  { %v527_v50 = vadd.f32 %v6390_v49, %v7746_v41  ;;  %v521_v51 = vpop.f32.mrb[5].mxu1 }
 0x289   :  { %v522_v52 = vadd.f32 %v521_v51, %v7748_v42 }
 0x28a   :  { %v533_v53 = vsel %vm329_vm5, %v527_v50, -inf }
 0x28b   :  { %534 = vmax.xlane.f32.xlu1 %v533_v53  ;;  %v530_v54 = vsel %vm329_vm5, %v522_v52, -inf }
 0x28c   :  { %531 = vmax.xlane.f32.xlu0 %v530_v54 }
 0x28f   :  { %v6414_v55 = vpop.f32.mrb[6].mxu1 }
 0x290   :  { %v883_v56 = vpop.f32.mrb[7].mxu1  ;;  %v889_v20 = vadd.f32 %v6414_v55, %v7746_v41 }
 0x291   :  { %v884_v18 = vadd.f32 %v883_v56, %v7748_v42 }
 0x292   :  { %v895_v22 = vsel %vm329_vm5, %v889_v20, -inf }
 0x293   :  { %v892_v21 = vsel %vm329_vm5, %v884_v18, -inf }
 0x310   :  { %v335_v57 = vpop.xlane.xlu0 %334 }
 0x311   :  { %v337_v58 = vsub.f32 %v326_v44, %v335_v57  ;;  %v332_v59 = vpop.xlane.xlu1 %331 }
 0x312   :  { %v336_v60 = vsub.f32 %v321_v46, %v332_v59  ;;  %v144_v59 = vld [vmem:[%s8403_s3] sm:$0xff] }
 0x313   :  { %v340_v61 = vmul.f32 1.442695, %v337_v58  ;;  %v145_v58 = vld [vmem:[%s8403_s3 + $0x8] sm:$0xff] }
 0x314   :  { %v338_v62 = vmul.f32 1.442695, %v336_v60 }
 0x315   :  { %7258 = vpow2.f32 %v340_v61 }
 0x316   :  { %7260 = vpow2.f32 %v338_v62 }
 0x318   :  { %v535_v63 = vpop.xlane.xlu1 %534 }
 0x319   :  { %v537_v0 = vsub.f32 %v527_v50, %v535_v63  ;;  %v532_v1 = vpop.xlane.xlu0 %531 }
 0x31a   :  { %v536_v2 = vsub.f32 %v522_v52, %v532_v1 }
 0x31b   :  { %v540_v3 = vmul.f32 1.442695, %v537_v0 }
 0x31c   :  { %v538_v4 = vmul.f32 1.442695, %v536_v2 }
 0x31d   :  { %7262 = vpow2.f32 %v540_v3 }
 0x31e   :  { %7264 = vpow2.f32 %v538_v4 }
 0x31f   :  { %v7259_v6 = vpop.eup %7258 }
 0x320   :  { %v7261_v8 = vpop.eup %7260  ;;  %v345_v9 = vsel %vm329_vm5, %v7259_v6, 0.0 }
 0x321   :  { %346 = vadd.xlane.f32.xlu1 %v345_v9  ;;  %v342_v10 = vsel %vm329_vm5, %v7261_v8, 0.0 }
 0x322   :  { %343 = vadd.xlane.f32.xlu0 %v342_v10 }
 0x327   :  { %v7760_v11 = vpop.eup %7262 }
 0x328   :  { %v7265_v12 = vpop.eup %7264  ;;  %v545_v16 = vsel %vm329_vm5, %v7760_v11, 0.0 }
 0x329   :  { %546 = vadd.xlane.f32.xlu1 %v545_v16  ;;  %v542_v17 = vsel %vm329_vm5, %v7265_v12, 0.0 }
 0x32a   :  { %543 = vadd.xlane.f32.xlu0 %v542_v17 }
 0x33a   :  { %7109 = vrot.lane.b32.xlu1 %v7700_v13, %s7546_s30 }
 0x33e   :  { %7114 = vrot.lane.b32.xlu1 %v7700_v13, %s7547_s11 }
 0x340   :  { %7104 = vrot.lane.b32.xlu0 %v7700_v13, %s7548_s13 }
 0x342   :  { %1086 = vrot.lane.b32.xlu1 %v7710_v15, %s7549_s1 }
 0x344   :  { %1084 = vrot.lane.b32.xlu0 %v7702_v14, %s7549_s1 }
 0x363   :  { %893 = vmax.xlane.f32.xlu0 %v892_v21 }
 0x366   :  { %896 = vmax.xlane.f32.xlu1 %v895_v22 }
 0x377   :  { %7119 = vrot.lane.b32.xlu1 %v7700_v13, %s7550_s10 }
 0x37b   :  { %7124 = vrot.lane.b32.xlu1 %v7700_v13, %s7551_s14 }
 0x3ae   :  { %v347_v14 = vpop.xlane.xlu1 %346 }
 0x3af   :  { %v344_v15 = vpop.xlane.xlu0 %343 }
 0x3b0   :  { %7266 = vrcp.f32 %v344_v15 }
 0x3b1   :  { %7268 = vrcp.f32 %v347_v14 }
 0x3b6   :  { %v547_v23 = vpop.xlane.xlu1 %546 }
 0x3b7   :  { %v544_v24 = vpop.xlane.xlu0 %543 }
 0x3b8   :  { %7270 = vrcp.f32 %v544_v24 }
 0x3b9   :  { %7272 = vrcp.f32 %v547_v23 }
 0x3ba   :  { %v7267_v25 = vpop.eup %7266  ;;  %v7110_v26 = vpop.permute.xlu1 %7109 }
 0x3bb   :  { %v7105_v27 = vpop.permute.xlu0 %7104  ;;  %v350_v28 = vmul.f32 %v7267_v25, %v7261_v8  ;;  %v7112_v29 = vunpack.i.h.bf16 %v7110_v26  ;;  %v7111_v30 = vunpack.i.l.bf16 %v7110_v26  ;;  %v7269_v34 = vpop.eup %7268 }
 0x3bc   :  { %v7107_v31 = vunpack.i.h.bf16 %v7105_v27  ;;  %v7106_v32 = vunpack.i.l.bf16 %v7105_v27  ;;  %v351_v43 = vmul.f32 %v7269_v34, %v7259_v6 }
 0x3bd   :  { %6381 = vmatprep.mubr.msk.f32.mxu0 %vm329_vm5, %v350_v28  ;;  %v6813_v38 = vpack.c.bf16 %v7112_v29, %v7111_v30 }
 0x3be   :  { %v7115_v33 = vpop.permute.xlu1 %7114  ;;  %v6803_v13 = vpack.c.bf16 %v7107_v31, %v7106_v32 }
 0x3bf   :  { %v7117_v35 = vunpack.i.h.bf16 %v7115_v33  ;;  %v7116_v36 = vunpack.i.l.bf16 %v7115_v33  ;;  %v1085_v37 = vpop.permute.xlu0 %1084 }
 0x3c0   :  { %6804 = vmatprep.subr.bf16.mxu0 %v6803_v13  ;;  %6431 = vmatprep.mubr.msk.f32.mxu1 %vm243_vm1, %v1085_v37 }
 0x3c1   :  { %v6827_v39 = vpack.c.bf16 %v7117_v35, %v7116_v36  ;;  %6806 = vmatpush3.bf16.msra.mxu0 %v6803_v13  ;;  %v147_v36 = vld [vmem:[%s8403_s3 + $0x18] sm:$0xff] }
 0x3c2   :  { %v7271_v40 = vpop.eup %7270  ;;  %6814 = vmatprep.subr.bf16.mxu0 %v6813_v38  ;;  %v1087_v47 = vpop.permute.xlu1 %1086 }
 0x3c3   :  { %v7273_v44 = vpop.eup %7272  ;;  %6829 = vmatprep.subr.msk.bf16.mxu1 %vm7724_vm2, %v6827_v39  ;;  %v550_v45 = vmul.f32 %v7271_v40, %v7265_v12 }
 0x3c4   :  { %6382 = vmatmul.mubr.msk.f32.vlgmr.msra.gmra.mrb[0].mxu0 %vm329_vm5, %v351_v43  ;;  %6832 = vmatpush3.bf16.xpose.msk.msra.mxu1 %vm7724_vm2, %v6827_v39  ;;  %v551_v46 = vmul.f32 %v7273_v44, %v7760_v11 }
 0x3c5   :  { %6816 = vmatpush3.bf16.msra.mxu0 %v6813_v38  ;;  %6395 = vmatprep.mubr.msk.f32.mxu0 %vm329_vm5, %v550_v45 }
 0x3c6   :  { %6398 = vmatprep.subr.mxu0 %v145_v58 }
 0x3c8   :  { %6396 = vmatmul.mubr.msk.f32.vlgmr.msra.gmra.mrb[2].mxu0 %vm329_vm5, %v551_v46 }
 0x3c9   :  { %6399 = vmatpush3.msra.mxu0 %v145_v58 }
 0x3ca   :  { %6403 = vmatprep.subr.mxu0 %v144_v59 }
 0x3cb   :  { %6432 = vmatmul.mubr.msk.f32.vlgmr.msra.gmra.mrb[8].mxu1 %vm243_vm1, %v1087_v47  ;;  %v5960_v47 = vld [vmem:[%s8408_s8 + $0x1] ss:$0 sm:$0xff] }
 0x3f0   :  { %v894_v48 = vpop.xlane.xlu0 %893 }
 0x3f1   :  { %v898_v49 = vsub.f32 %v884_v18, %v894_v48 }
 0x3f3   :  { %v900_v50 = vmul.f32 1.442695, %v898_v49  ;;  %v897_v51 = vpop.xlane.xlu1 %896 }
 0x3f4   :  { %v899_v52 = vsub.f32 %v889_v20, %v897_v51  ;;  %v146_v20 = vld [vmem:[%s8403_s3 + $0x10] sm:$0xff] }
 0x3f5   :  { %7274 = vpow2.f32 %v900_v50 }
 0x3f6   :  { %v902_v53 = vmul.f32 1.442695, %v899_v52 }
 0x3f7   :  { %v7120_v61 = vpop.permute.xlu1 %7119 }
 0x3f8   :  { %7276 = vpow2.f32 %v902_v53  ;;  %v7122_v1 = vunpack.i.h.bf16 %v7120_v61  ;;  %v7121_v2 = vunpack.i.l.bf16 %v7120_v61 }
 0x3fa   :  { %v6823_v8 = vpack.c.bf16 %v7122_v1, %v7121_v2 }
 0x3fb   :  { %v7125_v17 = vpop.permute.xlu1 %7124 }
 0x3fc   :  { %v7127_v21 = vunpack.i.h.bf16 %v7125_v17  ;;  %v7126_v22 = vunpack.i.l.bf16 %v7125_v17 }
 0x3fe   :  { %v6833_v24 = vpack.c.bf16 %v7127_v21, %v7126_v22 }
 0x3ff   :  { %v7275_v54 = vpop.eup %7274 }
 0x400   :  { %v904_v55 = vsel %vm329_vm5, %v7275_v54, 0.0 }
 0x401   :  { %905 = vadd.xlane.f32.xlu0 %v904_v55 }
 0x402   :  { %v7277_v56 = vpop.eup %7276 }
 0x403   :  { %v907_v57 = vsel %vm329_vm5, %v7277_v56, 0.0 }
 0x405   :  { %908 = vadd.xlane.f32.xlu0 %v907_v57  ;;  %v1415_v57 = vld [vmem:[%s8404_s4 + $0x8] sm:$0xff] }
 0x48e   :  { %v906_v60 = vpop.xlane.xlu0 %905 }
 0x48f   :  { %7278 = vrcp.f32 %v906_v60 }
 0x492   :  { %v909_v63 = vpop.xlane.xlu0 %908 }
 0x493   :  { %7280 = vrcp.f32 %v909_v63 }
 0x497   :  { %v6383_v62 = vpop.f32.mrb[0].mxu0 }
 0x498   :  { %v430_v0 = vpop.f32.mrb[1].mxu0 }
 0x499   :  { %v7279_v16 = vpop.eup %7278 }
 0x49a   :  { %v912_v14 = vmul.f32 %v7279_v16, %v7275_v54 }
 0x49b   :  { %v6397_v3 = vpop.f32.mrb[2].mxu0 }
 0x49c   :  { %v630_v4 = vpop.f32.mrb[3].mxu0 }
 0x49d   :  { %6400 = vmatprep.mubr.msk.f32.mxu0 %vm243_vm1, %v630_v4  ;;  %v7281_v18 = vpop.eup %7280 }
 0x49e   :  { %6401 = vmatmul.mubr.msk.f32.vlgmr.msra.gmra.mrb[4].mxu0 %vm243_vm1, %v6397_v3  ;;  %v6433_v6 = vpop.f32.mrb[8].mxu1  ;;  %v913_v23 = vmul.f32 %v7281_v18, %v7277_v56  ;;  %v1414_v56 = vld [vmem:[%s8404_s4] sm:$0xff] }
 0x49f   :  { %6404 = vmatpush3.msra.mxu0 %v144_v59  ;;  %6405 = vmatprep.mubr.msk.f32.mxu0 %vm243_vm1, %v430_v0  ;;  %v1166_v9 = vpop.f32.mrb[9].mxu1  ;;  %v1172_v11 = vadd.f32 %v6433_v6, %v7746_v41  ;;  %v7128_v58 = vpack.i.bf16 %v1415_v57, %v1414_v56  ;;  %v6837_v16 = vpack.c.bf16 %v1415_v57, %v1414_v56  ;;  %v5963_v18 = vld [vmem:[%s8408_s8 + $0x2] ss:$0 sm:$0xff] }
 0x4a0   :  { %6824 = vmatprep.subr.bf16.mxu0 %v6823_v8  ;;  %v1167_v10 = vadd.f32 %v1166_v9, %v7748_v42  ;;  %v1416_v9 = vld [vmem:[%s8404_s4 + $0x10] sm:$0xff] }
 0x4a1   :  { %v1178_v15 = vsel %vm329_vm5, %v1172_v11, -inf  ;;  %6838 = vmatprep.subr.bf16.mxu1 %v6837_v16 }
 0x4a2   :  { %v1175_v12 = vsel %vm329_vm5, %v1167_v10, -inf  ;;  %6840 = vmatpush3.bf16.msra.mxu1 %v6837_v16 }
 0x4a3   :  { %1176 = vmax.xlane.f32.xlu0 %v1175_v12  ;;  %v135_v12 = vld [vmem:[#allocation5] sm:$0xff] }
 0x4a6   :  { %6406 = vmatmul.mubr.msk.f32.vlgmr.msra.gmra.mrb[4].mxu0 %vm243_vm1, %v6383_v62 }
 0x4a7   :  { %6826 = vmatpush3.bf16.msra.mxu0 %v6823_v8  ;;  %1179 = vmax.xlane.f32.xlu0 %v1178_v15 }
 0x4a8   :  { %6419 = vmatprep.mubr.msk.f32.mxu0 %vm329_vm5, %v912_v14  ;;  %6422 = vmatprep.subr.mxu0 %v146_v20 }
 0x4aa   :  { %6420 = vmatmul.mubr.msk.f32.vlgmr.msra.gmra.mrb[6].mxu0 %vm329_vm5, %v913_v23 }
 0x4ab   :  { %6423 = vmatpush3.msra.mxu0 %v146_v20 }
 0x4ac   :  { %6834 = vmatprep.subr.bf16.mxu0 %v6833_v24 }
 0x530   :  { %v1177_v25 = vpop.xlane.xlu0 %1176 }
 0x531   :  { %v1181_v26 = vsub.f32 %v1167_v10, %v1177_v25  ;;  %v1417_v10 = vld [vmem:[%s8404_s4 + $0x18] sm:$0xff] }
 0x532   :  { %v6841_v17 = vpack.c.bf16 %v1417_v10, %v1416_v9 }
 0x533   :  { %v1183_v27 = vmul.f32 1.442695, %v1181_v26 }
 0x534   :  { %v1180_v28 = vpop.xlane.xlu0 %1179  ;;  %6842 = vmatprep.subr.bf16.mxu1 %v6841_v17 }
 0x535   :  { %7282 = vpow2.f32 %v1183_v27  ;;  %v1182_v29 = vsub.f32 %v1172_v11, %v1180_v28  ;;  %v7133_v11 = vpack.i.bf16 %v1417_v10, %v1416_v9  ;;  %6844 = vmatpush3.bf16.msra.mxu1 %v6841_v17  ;;  %v136_v28 = vld [vmem:[#allocation5 + $0x8] sm:$0xff] }
 0x537   :  { %v1185_v30 = vmul.f32 1.442695, %v1182_v29 }
 0x539   :  { %7284 = vpow2.f32 %v1185_v30 }
 0x53f   :  { %v7283_v31 = vpop.eup %7282 }
 0x540   :  { %v1187_v32 = vsel %vm329_vm5, %v7283_v31, 0.0 }
 0x541   :  { %1188 = vadd.xlane.f32.xlu0 %v1187_v32 }
 0x543   :  { %v7285_v33 = vpop.eup %7284 }
 0x544   :  { %v1190_v13 = vsel %vm329_vm5, %v7285_v33, 0.0 }
 0x545   :  { %1191 = vadd.xlane.f32.xlu0 %v1190_v13 }
 0x57d   :  { %v6421_v34 = vpop.f32.mrb[6].mxu0 }
 0x57e   :  { %v992_v35 = vpop.f32.mrb[7].mxu0 }
 0x57f   :  { %6424 = vmatprep.mubr.msk.f32.mxu0 %vm243_vm1, %v992_v35 }
 0x580   :  { %6425 = vmatmul.mubr.msk.f32.vlgmr.msra.gmra.mrb[4].mxu0 %vm243_vm1, %v6421_v34  ;;  %v7864_v34 = vld [vmem:[%s8408_s8 + $0x5] ss:$0 sm:$0xff] }
 0x581   :  { %6836 = vmatpush3.bf16.msra.mxu0 %v6833_v24 }
 0x582   :  { %6441 = vmatprep.subr.mxu0 %v147_v36 }
 0x5ce   :  { %v1189_v37 = vpop.xlane.xlu0 %1188 }
 0x5cf   :  { %7286 = vrcp.f32 %v1189_v37 }
 0x5d2   :  { %v1192_v38 = vpop.xlane.xlu0 %1191 }
 0x5d3   :  { %7288 = vrcp.f32 %v1192_v38 }
 0x5d9   :  { %v7287_v39 = vpop.eup %7286 }
 0x5da   :  { %v1195_v40 = vmul.f32 %v7287_v39, %v7283_v31  ;;  %v7858_v31 = vld [vmem:[%s8408_s8 + $0x4] ss:$0 sm:$0xff] }
 0x5dc   :  { %6438 = vmatprep.mubr.msk.f32.mxu0 %vm329_vm5, %v1195_v40 }
 0x5dd   :  { %v7289_v43 = vpop.eup %7288 }
 0x5de   :  { %v1196_v44 = vmul.f32 %v7289_v43, %v7285_v33 }
 0x5e0   :  { %6439 = vmatmul.mubr.msk.f32.vlgmr.msra.gmra.mrb[8].mxu0 %vm329_vm5, %v1196_v44 }
 0x5e1   :  { %6442 = vmatpush3.msra.mxu0 %v147_v36 }
 0x6b3   :  { %v6440_v45 = vpop.f32.mrb[8].mxu0 }
 0x6b4   :  { %v1275_v46 = vpop.f32.mrb[9].mxu0 }
 0x6b5   :  { %6443 = vmatprep.mubr.msk.f32.mxu0 %vm243_vm1, %v1275_v46 }
 0x6b6   :  { %6444 = vmatmul.mubr.msk.f32.vlgmr.msra.gmra.mrb[4].mxu0 %vm243_vm1, %v6440_v45 }
 0x6b7   :  { %6465 = vmatprep.mubr.msk.f32.mxu0 %vm153_vm0, %v135_v12 }
 0x789   :  { %v6445_v48 = vpop.f32.mrb[4].mxu0 }
 0x78a   :  { %v1372_v49 = vadd.f32 %v6445_v48, %v5960_v47  ;;  %v1356_v50 = vpop.f32.mrb[5].mxu0 }
 0x78b   :  { %v1371_v51 = vadd.f32 %v5960_v47, %v1356_v50 }
 0x78c   :  { %v1374_v52 = vadd.f32 %v1372_v49, %v7693_v7 }
 0x78d   :  { %v1373_v53 = vadd.f32 %v1371_v51, %v7689_v5 }
 0x78e   :  { %v1378_v54 = vsel %vm153_vm0, %v1374_v52, 0.0 }
 0x78f   :  { %1379 = vadd.xlane.f32.xlu1 %v1378_v54  ;;  %v1375_v55 = vsel %vm153_vm0, %v1373_v53, 0.0 }
 0x790   :  { %1376 = vadd.xlane.f32.xlu0 %v1375_v55 }
 0x7a6   :  { %7129 = vrot.lane.b32.xlu0 %v7128_v58, %s7540_s0 }
 0x81c   :  { %v1380_v7 = vpop.xlane.xlu1 %1379 }
 0x81d   :  { %v1383_v59 = vmul.f32 0.03125, %v1380_v7  ;;  %v1377_v5 = vpop.xlane.xlu0 %1376 }
 0x81e   :  { %v1382_v60 = vmul.f32 0.03125, %v1377_v5 }
 0x81f   :  { %v1385_v61 = vsub.f32 %v1374_v52, %v1383_v59 }
 0x820   :  { %v1384_v62 = vsub.f32 %v1373_v53, %v1382_v60 }
 0x821   :  { %v1387_v63 = vmul.f32 %v1385_v61, %v1385_v61  ;;  %v7130_v0 = vpop.permute.xlu0 %7129 }
 0x822   :  { %v7132_v1 = vunpack.i.h.bf16 %v7130_v0  ;;  %v7131_v2 = vunpack.i.l.bf16 %v7130_v0  ;;  %v1386_v4 = vmul.f32 %v1384_v62, %v1384_v62 }
 0x823   :  { %v1391_v3 = vsel %vm153_vm0, %v1387_v63, 0.0 }
 0x824   :  { %1392 = vadd.xlane.f32.xlu0 %v1391_v3  ;;  %v6845_v6 = vpack.c.bf16 %v7132_v1, %v7131_v2  ;;  %v1388_v8 = vsel %vm153_vm0, %v1386_v4, 0.0 }
 0x826   :  { %6846 = vmatprep.subr.bf16.mxu0 %v6845_v6 }
 0x827   :  { %6848 = vmatpush3.bf16.msra.mxu0 %v6845_v6 }
 0x828   :  { %1389 = vadd.xlane.f32.xlu0 %v1388_v8 }
 0x83e   :  { %7134 = vrot.lane.b32.xlu0 %v7133_v11, %s7540_s0 }
 0x842   :  { %1526 = vrot.lane.b32.xlu0 %v5963_v18, %s7540_s0 }
 0x8b1   :  { %v1393_v20 = vpop.xlane.xlu0 %1392 }
 0x8b2   :  { %v1395_v21 = vmul.f32 0.03125, %v1393_v20 }
 0x8b4   :  { %v1397_v22 = vadd.f32 1e-05, %v1395_v21 }
 0x8b5   :  { %v1390_v15 = vpop.xlane.xlu0 %1389 }
 0x8b6   :  { %7290 = vrsqrt.f32 %v1397_v22  ;;  %v1394_v14 = vmul.f32 0.03125, %v1390_v15 }
 0x8b8   :  { %v1396_v23 = vadd.f32 1e-05, %v1394_v14 }
 0x8b9   :  { %v7135_v24 = vpop.permute.xlu0 %7134 }
 0x8ba   :  { %7292 = vrsqrt.f32 %v1396_v23  ;;  %v7137_v25 = vunpack.i.h.bf16 %v7135_v24  ;;  %v7136_v26 = vunpack.i.l.bf16 %v7135_v24 }
 0x8bc   :  { %v6849_v27 = vpack.c.bf16 %v7137_v25, %v7136_v26 }
 0x8bd   :  { %v1527_v38 = vpop.permute.xlu0 %1526 }
 0x8be   :  { %6850 = vmatprep.subr.bf16.mxu0 %v6849_v27 }
 0x8bf   :  { %6852 = vmatpush3.bf16.msra.mxu0 %v6849_v27 }
 0x8c0   :  { %v7291_v29 = vpop.eup %7290 }
 0x8c1   :  { %v1401_v30 = vmul.f32 %v7291_v29, %v1385_v61 }
 0x8c2   :  { %6466 = vmatmul.mubr.msk.f32.vlgmr.msra.gmra.mrb[10].mxu0 %vm153_vm0, %v136_v28 }
 0x8c3   :  { %v1407_v13 = vmul.f32 %v7858_v31, %v1401_v30 }
 0x8c4   :  { %v7293_v32 = vpop.eup %7292 }
 0x8c5   :  { %v1400_v33 = vmul.f32 %v7293_v32, %v1384_v62  ;;  %v7871_v37 = vadd.f32 %v7864_v34, %v1407_v13 }
 0x8c7   :  { %v1406_v35 = vmul.f32 %v7858_v31, %v1400_v33 }
 0x8c9   :  { %v7868_v36 = vadd.f32 %v7864_v34, %v1406_v35 }
 0x8cb   :  { %6454 = vmatprep.mubr.msk.f32.mxu1 %vm153_vm0, %v7868_v36 }
 0x8cc   :  { %6455 = vmatmul.mubr.msk.f32.vlgmr.msra.gmra.mrb[10].mxu1 %vm153_vm0, %v7871_v37 }
 0x995   :  { %v6467_v39 = vpop.f32.mrb[10].mxu0 }
 0x996   :  { %v1607_v40 = vadd.f32 %v6467_v39, %v1527_v38  ;;  %v1601_v43 = vpop.f32.mrb[11].mxu0 }
 0x997   :  { %v1602_v44 = vadd.f32 %v1601_v43, %v1527_v38 }
 0x999   :  { %v7877_v45 = vpack.i.bf16 %v1607_v40, %v1602_v44  ;;  %v6853_v46 = vpack.c.bf16 %v1607_v40, %v1602_v44 }
 0x99b   :  { %7139 = vrot.lane.b32.xlu1 %v7877_v45, %s7541_s12  ;;  %6855 = vmatprep.subr.msk.bf16.mxu1 %vm7724_vm2, %v6853_v46 }
 0x99c   :  { %6858 = vmatpush3.bf16.xpose.msk.msra.mxu1 %vm7724_vm2, %v6853_v46 }
 0x99f   :  { %v6456_v47 = vpop.f32.mrb[10].mxu1 }
 0x9a0   :  { %v1506_v48 = vadd.f32 %v6456_v47, %v5963_v18  ;;  %v1500_v49 = vpop.f32.mrb[11].mxu1 }
 0x9a1   :  { %v1501_v50 = vadd.f32 %v5963_v18, %v1500_v49 }
 0x9a2   :  { %v7885_v51 = vmul.f32 0.35355338, %v1506_v48 }
 0x9a3   :  { %v7887_v52 = vmul.f32 0.35355338, %v1501_v50 }
 0x9a4   :  { %2172 = vrot.lane.b32.xlu1 %v7885_v51, %s7544_s29 }
 0x9a5   :  { %1808 = vrot.lane.b32.xlu0 %v7887_v52, %s7541_s12  ;;  %6472 = vmatprep.mubr.msk.f32.mxu1 %vm243_vm1, %v7887_v52 }
 0x9a6   :  { %6473 = vmatmul.mubr.msk.f32.vlgmr.msra.gmra.mrb[12].mxu1 %vm243_vm1, %v7885_v51 }
 0x9a9   :  { %1810 = vrot.lane.b32.xlu0 %v7885_v51, %s7541_s12 }
 0x9ad   :  { %7144 = vrot.lane.b32.xlu0 %v7877_v45, %s7544_s29 }
 0x9b1   :  { %2170 = vrot.lane.b32.xlu0 %v7887_v52, %s7544_s29 }
 0xa0d   :  { %v7140_v53 = vpop.permute.xlu1 %7139 }
 0xa0e   :  { %v7142_v54 = vunpack.i.h.bf16 %v7140_v53  ;;  %v7141_v55 = vunpack.i.l.bf16 %v7140_v53 }
 0xa10   :  { %v6863_v56 = vpack.c.bf16 %v7142_v54, %v7141_v55 }
 0xa12   :  { %6865 = vmatprep.subr.msk.bf16.mxu1 %vm7724_vm2, %v6863_v56 }
 0xa13   :  { %6868 = vmatpush3.bf16.xpose.msk.msra.mxu1 %vm7724_vm2, %v6863_v56 }
 0xa16   :  { %v2173_v62 = vpop.permute.xlu1 %2172 }
 0xa17   :  { %v1809_v57 = vpop.permute.xlu0 %1808 }
 0xa18   :  { %6486 = vmatprep.mubr.msk.f32.mxu1 %vm243_vm1, %v1809_v57 }
 0xa1b   :  { %v1811_v58 = vpop.permute.xlu0 %1810 }
 0xa1c   :  { %6487 = vmatmul.mubr.msk.f32.vlgmr.msra.gmra.mrb[14].mxu1 %vm243_vm1, %v1811_v58 }
 0xa1f   :  { %v7145_v7 = vpop.permute.xlu0 %7144 }
 0xa20   :  { %v7147_v59 = vunpack.i.h.bf16 %v7145_v7  ;;  %v7146_v5 = vunpack.i.l.bf16 %v7145_v7 }
 0xa22   :  { %v6873_v60 = vpack.c.bf16 %v7147_v59, %v7146_v5 }
 0xa23   :  { %v2171_v61 = vpop.permute.xlu0 %2170 }
 0xa24   :  { %6875 = vmatprep.subr.msk.bf16.mxu1 %vm7724_vm2, %v6873_v60  ;;  %6510 = vmatprep.mubr.msk.f32.mxu1 %vm243_vm1, %v2171_v61 }
 0xa25   :  { %6878 = vmatpush3.bf16.xpose.msk.msra.mxu1 %vm7724_vm2, %v6873_v60 }
 0xa2c   :  { %6511 = vmatmul.mubr.msk.f32.vlgmr.msra.gmra.mrb[16].mxu1 %vm243_vm1, %v2173_v62 }
 0xa79   :  { %v6474_v63 = vpop.f32.mrb[12].mxu1 }
 0xa7a   :  { %v1696_v0 = vadd.f32 %v6474_v63, %v7746_v41  ;;  %v1690_v1 = vpop.f32.mrb[13].mxu1 }
 0xa7b   :  { %v1691_v2 = vadd.f32 %v1690_v1, %v7748_v42 }
 0xa7c   :  { %v1702_v3 = vsel %vm329_vm5, %v1696_v0, -inf }
 0xa7d   :  { %1703 = vmax.xlane.f32.xlu1 %v1702_v3  ;;  %v1699_v4 = vsel %vm329_vm5, %v1691_v2, -inf }
 0xa7e   :  { %1700 = vmax.xlane.f32.xlu0 %v1699_v4 }
 0xaef   :  { %v6488_v6 = vpop.f32.mrb[14].mxu1 }
 0xaf0   :  { %v1890_v8 = vpop.f32.mrb[15].mxu1  ;;  %v1896_v10 = vadd.f32 %v6488_v6, %v7746_v41 }
 0xaf1   :  { %v1891_v9 = vadd.f32 %v1890_v8, %v7748_v42 }
 0xaf2   :  { %v1902_v12 = vsel %vm329_vm5, %v1896_v10, -inf }
 0xaf3   :  { %v1899_v11 = vsel %vm329_vm5, %v1891_v9, -inf }
 0xaf4   :  { %1900 = vmax.xlane.f32.xlu0 %v1899_v11 }
 0xaf8   :  { %1903 = vmax.xlane.f32.xlu0 %v1902_v12 }
 0xaff   :  { %v6512_v16 = vpop.f32.mrb[16].mxu1 }
 0xb00   :  { %v2252_v17 = vpop.f32.mrb[17].mxu1  ;;  %v2258_v46 = vadd.f32 %v6512_v16, %v7746_v41 }
 0xb01   :  { %v2253_v47 = vadd.f32 %v2252_v17, %v7748_v42 }
 0xb02   :  { %v2264_v49 = vsel %vm329_vm5, %v2258_v46, -inf }
 0xb03   :  { %v2261_v48 = vsel %vm329_vm5, %v2253_v47, -inf }
 0xb0a   :  { %v1704_v18 = vpop.xlane.xlu1 %1703 }
 0xb0b   :  { %v1706_v20 = vsub.f32 %v1696_v0, %v1704_v18  ;;  %v1701_v21 = vpop.xlane.xlu0 %1700 }
 0xb0c   :  { %v1705_v22 = vsub.f32 %v1691_v2, %v1701_v21 }
 0xb0d   :  { %v1709_v15 = vmul.f32 1.442695, %v1706_v20 }
 0xb0e   :  { %v1707_v14 = vmul.f32 1.442695, %v1705_v22 }
 0xb0f   :  { %7294 = vpow2.f32 %v1709_v15  ;;  %v1420_v15 = vld [vmem:[#allocation7 + $0x8] sm:$0xff] }
 0xb10   :  { %7296 = vpow2.f32 %v1707_v14  ;;  %v1419_v14 = vld [vmem:[#allocation7] sm:$0xff] }
 0xb19   :  { %v7295_v23 = vpop.eup %7294 }
 0xb1a   :  { %v7297_v24 = vpop.eup %7296  ;;  %v1714_v25 = vsel %vm329_vm5, %v7295_v23, 0.0 }
 0xb1b   :  { %1715 = vadd.xlane.f32.xlu0 %v1714_v25  ;;  %v1711_v26 = vsel %vm329_vm5, %v7297_v24, 0.0 }
 0xb1c   :  { %1712 = vadd.xlane.f32.xlu1 %v1711_v26 }
 0xb81   :  { %v1901_v27 = vpop.xlane.xlu0 %1900 }
 0xb82   :  { %v1905_v28 = vsub.f32 %v1891_v9, %v1901_v27 }
 0xb84   :  { %v1907_v29 = vmul.f32 1.442695, %v1905_v28 }
 0xb85   :  { %v1904_v30 = vpop.xlane.xlu0 %1903 }
 0xb86   :  { %7298 = vpow2.f32 %v1907_v29  ;;  %v1906_v32 = vsub.f32 %v1896_v10, %v1904_v30 }
 0xb88   :  { %v1909_v33 = vmul.f32 1.442695, %v1906_v32 }
 0xb8a   :  { %7300 = vpow2.f32 %v1909_v33 }
 0xb90   :  { %v7299_v13 = vpop.eup %7298 }
 0xb91   :  { %v1911_v35 = vsel %vm329_vm5, %v7299_v13, 0.0 }
 0xb92   :  { %1912 = vadd.xlane.f32.xlu1 %v1911_v35 }
 0xb94   :  { %v7301_v38 = vpop.eup %7300 }
 0xb95   :  { %v1914_v39 = vsel %vm329_vm5, %v7301_v38, 0.0 }
 0xb96   :  { %1915 = vadd.xlane.f32.xlu0 %v1914_v39 }
 0xba3   :  { %7149 = vrot.lane.b32.xlu1 %v7877_v45, %s7540_s0 }
 0xba7   :  { %7159 = vrot.lane.b32.xlu1 %v7877_v45, %s7549_s1 }
 0xba8   :  { %v1716_v50 = vpop.xlane.xlu0 %1715 }
 0xba9   :  { %v1713_v40 = vpop.xlane.xlu1 %1712 }
 0xbaa   :  { %7302 = vrcp.f32 %v1713_v40 }
 0xbab   :  { %2453 = vrot.lane.b32.xlu1 %v7887_v52, %s7549_s1  ;;  %7304 = vrcp.f32 %v1716_v50 }
 0xbac   :  { %7154 = vrot.lane.b32.xlu0 %v7877_v45, %s7542_s27 }
 0xbb0   :  { %2455 = vrot.lane.b32.xlu0 %v7885_v51, %s7549_s1 }
 0xbb4   :  { %v7303_v43 = vpop.eup %7302 }
 0xbb5   :  { %v1719_v44 = vmul.f32 %v7303_v43, %v7297_v24  ;;  %v7305_v57 = vpop.eup %7304 }
 0xbb6   :  { %v1720_v0 = vmul.f32 %v7305_v57, %v7295_v23 }
 0xbb7   :  { %6479 = vmatprep.mubr.msk.f32.mxu0 %vm329_vm5, %v1719_v44 }
 0xbcf   :  { %2262 = vmax.xlane.f32.xlu1 %v2261_v48  ;;  %2265 = vmax.xlane.f32.xlu0 %v2264_v49  ;;  %v1421_v49 = vld [vmem:[#allocation7 + $0x10] sm:$0xff] }
 0xc1f   :  { %v1913_v52 = vpop.xlane.xlu1 %1912 }
 0xc20   :  { %7306 = vrcp.f32 %v1913_v52 }
 0xc23   :  { %v7150_v53 = vpop.permute.xlu1 %7149  ;;  %v1916_v51 = vpop.xlane.xlu0 %1915 }
 0xc24   :  { %v7152_v54 = vunpack.i.h.bf16 %v7150_v53  ;;  %v7151_v55 = vunpack.i.l.bf16 %v7150_v53  ;;  %7308 = vrcp.f32 %v1916_v51 }
 0xc26   :  { %v6859_v56 = vpack.c.bf16 %v7152_v54, %v7151_v55 }
 0xc27   :  { %v7160_v58 = vpop.permute.xlu1 %7159  ;;  %v7155_v7 = vpop.permute.xlu0 %7154 }
 0xc28   :  { %v7162_v59 = vunpack.i.h.bf16 %v7160_v58  ;;  %v7161_v5 = vunpack.i.l.bf16 %v7160_v58  ;;  %v7157_v60 = vunpack.i.h.bf16 %v7155_v7  ;;  %v7156_v61 = vunpack.i.l.bf16 %v7155_v7  ;;  %6860 = vmatprep.subr.bf16.mxu0 %v6859_v56 }
 0xc29   :  { %6862 = vmatpush3.bf16.msra.mxu0 %v6859_v56 }
 0xc2a   :  { %v7307_v62 = vpop.eup %7306  ;;  %v6883_v63 = vpack.c.bf16 %v7162_v59, %v7161_v5  ;;  %v6869_v1 = vpack.c.bf16 %v7157_v60, %v7156_v61 }
 0xc2b   :  { %v2454_v2 = vpop.permute.xlu1 %2453  ;;  %v1919_v3 = vmul.f32 %v7307_v62, %v7299_v13  ;;  %v2456_v8 = vpop.permute.xlu0 %2455 }
 0xc2c   :  { %6480 = vmatmul.mubr.msk.f32.vlgmr.msra.gmra.mrb[12].mxu0 %vm329_vm5, %v1720_v0  ;;  %6870 = vmatprep.subr.bf16.mxu0 %v6869_v1 }
 0xc2d   :  { %6885 = vmatprep.subr.msk.bf16.mxu1 %vm7724_vm2, %v6883_v63  ;;  %6529 = vmatprep.mubr.msk.f32.mxu1 %vm243_vm1, %v2454_v2  ;;  %v1422_v2 = vld [vmem:[#allocation7 + $0x18] sm:$0xff] }
 0xc2e   :  { %v7309_v4 = vpop.eup %7308  ;;  %6872 = vmatpush3.bf16.msra.mxu0 %v6869_v1  ;;  %6493 = vmatprep.mubr.msk.f32.mxu0 %vm329_vm5, %v1919_v3 }
 0xc2f   :  { %6888 = vmatpush3.bf16.xpose.msk.msra.mxu1 %vm7724_vm2, %v6883_v63  ;;  %v1920_v6 = vmul.f32 %v7309_v4, %v7301_v38  ;;  %6496 = vmatprep.subr.mxu0 %v1420_v15 }
 0xc31   :  { %6494 = vmatmul.mubr.msk.f32.vlgmr.msra.gmra.mrb[14].mxu0 %vm329_vm5, %v1920_v6 }
 0xc32   :  { %6497 = vmatpush3.msra.mxu0 %v1420_v15 }
 0xc33   :  { %6501 = vmatprep.subr.mxu0 %v1419_v14 }
 0xc36   :  { %6530 = vmatmul.mubr.msk.f32.vlgmr.msra.gmra.mrb[18].mxu1 %vm243_vm1, %v2456_v8 }
 0xc5c   :  { %v2263_v9 = vpop.xlane.xlu1 %2262  ;;  %v2266_v10 = vpop.xlane.xlu0 %2265 }
 0xc5d   :  { %v2267_v11 = vsub.f32 %v2253_v47, %v2263_v9  ;;  %v2268_v12 = vsub.f32 %v2258_v46, %v2266_v10  ;;  %v6000_v10 = vld [vmem:[%s8408_s8 + $0x3] ss:$0 sm:$0xff] }
 0xc5f   :  { %v2269_v16 = vmul.f32 1.442695, %v2267_v11  ;;  %v2271_v17 = vmul.f32 1.442695, %v2268_v12 }
 0xc61   :  { %7310 = vpow2.f32 %v2269_v16 }
 0xc62   :  { %7312 = vpow2.f32 %v2271_v17 }
 0xc6b   :  { %v7311_v18 = vpop.eup %7310 }
 0xc6c   :  { %v7313_v20 = vpop.eup %7312  ;;  %v2273_v21 = vsel %vm329_vm5, %v7311_v18, 0.0 }
 0xc6d   :  { %2274 = vadd.xlane.f32.xlu0 %v2273_v21  ;;  %v2276_v22 = vsel %vm329_vm5, %v7313_v20, 0.0 }
 0xc6e   :  { %2277 = vadd.xlane.f32.xlu1 %v2276_v22 }
 0xc83   :  { %7164 = vrot.lane.b32.xlu0 %v7877_v45, %s7543_s28 }
 0xcfa   :  { %v2275_v23 = vpop.xlane.xlu0 %2274 }
 0xcfb   :  { %v2278_v27 = vpop.xlane.xlu1 %2277  ;;  %7314 = vrcp.f32 %v2275_v23 }
 0xcfc   :  { %7316 = vrcp.f32 %v2278_v27 }
 0xcfe   :  { %v7165_v25 = vpop.permute.xlu0 %7164 }
 0xcff   :  { %v6481_v24 = vpop.f32.mrb[12].mxu0  ;;  %v7167_v28 = vunpack.i.h.bf16 %v7165_v25  ;;  %v7166_v29 = vunpack.i.l.bf16 %v7165_v25 }
 0xd00   :  { %v1799_v26 = vpop.f32.mrb[13].mxu0 }
 0xd01   :  { %v6879_v33 = vpack.c.bf16 %v7167_v28, %v7166_v29 }
 0xd04   :  { %v6495_v30 = vpop.f32.mrb[14].mxu0 }
 0xd05   :  { %v1999_v32 = vpop.f32.mrb[15].mxu0  ;;  %v7315_v38 = vpop.eup %7314 }
 0xd06   :  { %6498 = vmatprep.mubr.msk.f32.mxu0 %vm243_vm1, %v1999_v32  ;;  %v7317_v44 = vpop.eup %7316  ;;  %v2281_v46 = vmul.f32 %v7315_v38, %v7311_v18  ;;  %v2866_v38 = vld [vmem:[%s8407_s7] sm:$0xff] }
 0xd07   :  { %6499 = vmatmul.mubr.msk.f32.vlgmr.msra.gmra.mrb[16].mxu0 %vm243_vm1, %v6495_v30  ;;  %v2282_v47 = vmul.f32 %v7317_v44, %v7313_v20  ;;  %v2775_v30 = vld [vmem:[#allocation8 + $0x8] sm:$0xff]  ;;  %v2869_v44 = vld [vmem:[%s8407_s7 + $0x18] sm:$0xff] }
 0xd08   :  { %6502 = vmatpush3.msra.mxu0 %v1419_v14  ;;  %6503 = vmatprep.mubr.msk.f32.mxu0 %vm243_vm1, %v1799_v26 }
 0xd09   :  { %v6531_v13 = vpop.f32.mrb[18].mxu1  ;;  %6880 = vmatprep.subr.bf16.mxu0 %v6879_v33 }
 0xd0a   :  { %v2535_v35 = vpop.f32.mrb[19].mxu1  ;;  %v2541_v40 = vadd.f32 %v6531_v13, %v7746_v41  ;;  %v2777_v13 = vld [vmem:[#allocation8 + $0x18] sm:$0xff] }
 0xd0b   :  { %v2536_v39 = vadd.f32 %v2535_v35, %v7748_v42 }
 0xd0c   :  { %v2547_v48 = vsel %vm329_vm5, %v2541_v40, -inf }
 0xd0d   :  { %v2544_v43 = vsel %vm329_vm5, %v2536_v39, -inf }
 0xd0e   :  { %2545 = vmax.xlane.f32.xlu1 %v2544_v43 }
 0xd0f   :  { %6504 = vmatmul.mubr.msk.f32.vlgmr.msra.gmra.mrb[16].mxu0 %vm243_vm1, %v6481_v24 }
 0xd10   :  { %6882 = vmatpush3.bf16.msra.mxu0 %v6879_v33  ;;  %6517 = vmatprep.mubr.msk.f32.mxu0 %vm329_vm5, %v2281_v46  ;;  %v2776_v33 = vld [vmem:[#allocation8 + $0x10] sm:$0xff] }
 0xd11   :  { %6520 = vmatprep.subr.mxu0 %v1421_v49  ;;  %v6897_v35 = vpack.c.bf16 %v2777_v13, %v2776_v33 }
 0xd12   :  { %2548 = vmax.xlane.f32.xlu1 %v2547_v48  ;;  %v2871_v48 = vld [vmem:[%s8407_s7 + $0x28] sm:$0xff] }
 0xd13   :  { %6518 = vmatmul.mubr.msk.f32.vlgmr.msra.gmra.mrb[18].mxu0 %vm329_vm5, %v2282_v47  ;;  %v2870_v47 = vld [vmem:[%s8407_s7 + $0x20] sm:$0xff] }
 0xd14   :  { %6521 = vmatpush3.msra.mxu0 %v1421_v49  ;;  %v6909_v49 = vpack.c.bf16 %v2871_v48, %v2870_v47  ;;  %v6008_v47 = vld [vmem:[%s8408_s8 + $0x9] ss:$0 sm:$0xff] }
 0xd9b   :  { %v2546_v50 = vpop.xlane.xlu1 %2545 }
 0xd9c   :  { %v2550_v52 = vsub.f32 %v2536_v39, %v2546_v50  ;;  %v2867_v39 = vld [vmem:[%s8407_s7 + $0x8] sm:$0xff] }
 0xd9d   :  { %v6901_v43 = vpack.c.bf16 %v2867_v39, %v2866_v38 }
 0xd9e   :  { %v2552_v54 = vmul.f32 1.442695, %v2550_v52 }
 0xd9f   :  { %v2549_v53 = vpop.xlane.xlu1 %2548 }
 0xda0   :  { %v2551_v51 = vsub.f32 %v2541_v40, %v2549_v53  ;;  %v2868_v40 = vld [vmem:[%s8407_s7 + $0x10] sm:$0xff] }
 0xda1   :  { %v6905_v46 = vpack.c.bf16 %v2869_v44, %v2868_v40  ;;  %v6007_v44 = vld [vmem:[%s8408_s8 + $0x8] ss:$0 sm:$0xff] }
 0xda2   :  { %v2554_v55 = vmul.f32 1.442695, %v2551_v51 }
 0xda4   :  { %7318 = vpow2.f32 %v2554_v55 }
 0xda5   :  { %7320 = vpow2.f32 %v2552_v54 }
 0xdae   :  { %v7319_v56 = vpop.eup %7318 }
 0xdaf   :  { %v2559_v57 = vsel %vm329_vm5, %v7319_v56, 0.0  ;;  %v7321_v58 = vpop.eup %7320 }
 0xdb0   :  { %2560 = vadd.xlane.f32.xlu1 %v2559_v57  ;;  %v2556_v7 = vsel %vm329_vm5, %v7321_v58, 0.0 }
 0xdb4   :  { %2557 = vadd.xlane.f32.xlu1 %v2556_v7 }
 0xdc5   :  { %7169 = vrot.lane.b32.xlu1 %v7877_v45, %s7547_s11 }
 0xde6   :  { %v6519_v59 = vpop.f32.mrb[18].mxu0 }
 0xde7   :  { %v2361_v5 = vpop.f32.mrb[19].mxu0 }
 0xde8   :  { %6522 = vmatprep.mubr.msk.f32.mxu0 %vm243_vm1, %v2361_v5 }
 0xde9   :  { %6523 = vmatmul.mubr.msk.f32.vlgmr.msra.gmra.mrb[16].mxu0 %vm243_vm1, %v6519_v59 }
 0xe3d   :  { %v2561_v60 = vpop.xlane.xlu1 %2560 }
 0xe3e   :  { %7322 = vrcp.f32 %v2561_v60 }
 0xe41   :  { %v2558_v61 = vpop.xlane.xlu1 %2557 }
 0xe42   :  { %7324 = vrcp.f32 %v2558_v61 }
 0xe45   :  { %v7170_v62 = vpop.permute.xlu1 %7169 }
 0xe46   :  { %v7172_v63 = vunpack.i.h.bf16 %v7170_v62  ;;  %v7171_v0 = vunpack.i.l.bf16 %v7170_v62  ;;  %v2872_v62 = vld [vmem:[%s8407_s7 + $0x30] sm:$0xff] }
 0xe48   :  { %v6889_v1 = vpack.c.bf16 %v7172_v63, %v7171_v0  ;;  %v7323_v3 = vpop.eup %7322  ;;  %v2873_v63 = vld [vmem:[%s8407_s7 + $0x38] sm:$0xff] }
 0xe49   :  { %v2565_v6 = vmul.f32 %v7323_v3, %v7319_v56  ;;  %v6913_v0 = vpack.c.bf16 %v2873_v63, %v2872_v62 }
 0xe4a   :  { %6890 = vmatprep.subr.bf16.mxu0 %v6889_v1 }
 0xe4b   :  { %6892 = vmatpush3.bf16.msra.mxu0 %v6889_v1  ;;  %v6001_v1 = vld [vmem:[%s8408_s8 + $0x6] ss:$0 sm:$0xff] }
 0xe4c   :  { %v7325_v4 = vpop.eup %7324  ;;  %6539 = vmatprep.subr.mxu0 %v1422_v2 }
 0xe4d   :  { %v2564_v45 = vmul.f32 %v7325_v4, %v7321_v58 }
 0xe4f   :  { %6536 = vmatprep.mubr.msk.f32.mxu0 %vm329_vm5, %v2564_v45 }
 0xe50   :  { %6537 = vmatmul.mubr.msk.f32.vlgmr.msra.gmra.mrb[20].mxu0 %vm329_vm5, %v2565_v6  ;;  %v6004_v6 = vld [vmem:[%s8408_s8 + $0x7] ss:$0 sm:$0xff] }
 0xe51   :  { %6540 = vmatpush3.msra.mxu0 %v1422_v2 }
 0xe52   :  { %6902 = vmatprep.subr.bf16.mxu0 %v6901_v43 }
 0xf23   :  { %v6538_v8 = vpop.f32.mrb[20].mxu0 }
 0xf24   :  { %v2644_v9 = vpop.f32.mrb[21].mxu0 }
 0xf25   :  { %6541 = vmatprep.mubr.msk.f32.mxu0 %vm243_vm1, %v2644_v9 }
 0xf26   :  { %6542 = vmatmul.mubr.msk.f32.vlgmr.msra.gmra.mrb[16].mxu0 %vm243_vm1, %v6538_v8 }
 0xf27   :  { %6904 = vmatpush3.bf16.msra.mxu0 %v6901_v43 }
 0xf28   :  { %6906 = vmatprep.subr.bf16.mxu0 %v6905_v46 }
 0xf2b   :  { %6908 = vmatpush3.bf16.msra.mxu0 %v6905_v46 }
 0xf2c   :  { %6910 = vmatprep.subr.bf16.mxu0 %v6909_v49 }
 0xf2f   :  { %6912 = vmatpush3.bf16.msra.mxu0 %v6909_v49 }
 0xf30   :  { %6914 = vmatprep.subr.bf16.mxu0 %v6913_v0 }
 0xf33   :  { %6916 = vmatpush3.bf16.msra.mxu0 %v6913_v0 }
 0xff9   :  { %v6543_v11 = vpop.f32.mrb[16].mxu0 }
 0xffa   :  { %v2741_v12 = vadd.f32 %v6543_v11, %v6000_v10  ;;  %v2725_v16 = vpop.f32.mrb[17].mxu0 }
 0xffb   :  { %v2740_v17 = vadd.f32 %v6000_v10, %v2725_v16 }
 0xffc   :  { %v2743_v18 = vadd.f32 %v2741_v12, %v7871_v37 }
 0xffd   :  { %v2742_v20 = vadd.f32 %v2740_v17, %v7868_v36  ;;  %v2774_v36 = vld [vmem:[#allocation8] sm:$0xff] }
 0xffe   :  { %v2747_v21 = vsel %vm153_vm0, %v2743_v18, 0.0  ;;  %v6893_v32 = vpack.c.bf16 %v2775_v30, %v2774_v36  ;;  %v6011_v36 = vld [vmem:[%s8402_s2 + $0x30] sm:$0xff]  ;;  %v6012_v30 = vld [vmem:[%s8402_s2 + $0x38] sm:$0xff] }
 0xfff   :  { %2748 = vadd.xlane.f32.xlu1 %v2747_v21  ;;  %v2744_v22 = vsel %vm153_vm0, %v2742_v20, 0.0 }
0x1000   :  { %2745 = vadd.xlane.f32.xlu0 %v2744_v22  ;;  %6894 = vmatprep.subr.bf16.mxu1 %v6893_v32 }
0x1001   :  { %6896 = vmatpush3.bf16.msra.mxu1 %v6893_v32  ;;  %v6921_v32 = vpack.c.bf16 %v6012_v30, %v6011_v36 }
0x1002   :  { %6898 = vmatprep.subr.bf16.mxu1 %v6897_v35 }
0x1005   :  { %6900 = vmatpush3.bf16.msra.mxu1 %v6897_v35 }
0x108c   :  { %v2749_v15 = vpop.xlane.xlu1 %2748 }
0x108d   :  { %v2751_v14 = vmul.f32 0.03125, %v2749_v15  ;;  %v2746_v23 = vpop.xlane.xlu0 %2745 }
0x108e   :  { %v2750_v24 = vmul.f32 0.03125, %v2746_v23 }
0x108f   :  { %v2753_v25 = vsub.f32 %v2743_v18, %v2751_v14 }
0x1090   :  { %v2752_v26 = vsub.f32 %v2742_v20, %v2750_v24 }
0x1091   :  { %v2755_v29 = vmul.f32 %v2753_v25, %v2753_v25 }
0x1092   :  { %v2754_v27 = vmul.f32 %v2752_v26, %v2752_v26 }
0x1093   :  { %v2759_v37 = vsel %vm153_vm0, %v2755_v29, 0.0  ;;  %v6010_v29 = vld [vmem:[%s8402_s2 + $0x28] sm:$0xff] }
0x1094   :  { %v2756_v28 = vsel %vm153_vm0, %v2754_v27, 0.0 }
0x1095   :  { %2757 = vadd.xlane.f32.xlu0 %v2756_v28  ;;  %v6009_v28 = vld [vmem:[%s8402_s2 + $0x20] sm:$0xff] }
0x1099   :  { %2760 = vadd.xlane.f32.xlu0 %v2759_v37  ;;  %v6917_v37 = vpack.c.bf16 %v6010_v29, %v6009_v28 }
0x109b   :  { %6918 = vmatprep.subr.bf16.mxu1 %v6917_v37 }
0x1122   :  { %v2758_v50 = vpop.xlane.xlu0 %2757 }
0x1123   :  { %v2762_v52 = vmul.f32 0.03125, %v2758_v50 }
0x1125   :  { %v2764_v53 = vadd.f32 1e-05, %v2762_v52 }
0x1126   :  { %v2761_v51 = vpop.xlane.xlu0 %2760 }
0x1127   :  { %7326 = vrsqrt.f32 %v2764_v53  ;;  %v2763_v54 = vmul.f32 0.03125, %v2761_v51 }
0x1129   :  { %v2765_v55 = vadd.f32 1e-05, %v2763_v54  ;;  %v6017_v54 = vld [vmem:[%s8408_s8 + $0xa] ss:$0 sm:$0xff] }
0x112b   :  { %7328 = vrsqrt.f32 %v2765_v55 }
0x1131   :  { %v7327_v56 = vpop.eup %7326 }
0x1132   :  { %v2768_v57 = vmul.f32 %v7327_v56, %v2752_v26 }
0x1134   :  { %v2770_v58 = vmul.f32 %v7858_v31, %v2768_v57 }
0x1135   :  { %v7329_v7 = vpop.eup %7328 }
0x1136   :  { %v2769_v59 = vmul.f32 %v7329_v7, %v2753_v25  ;;  %v2772_v5 = vadd.f32 %v7864_v34, %v2770_v58 }
0x1138   :  { %6552 = vmatprep.mubr.msk.f32.mxu1 %vm153_vm0, %v2772_v5  ;;  %v2771_v60 = vmul.f32 %v7858_v31, %v2769_v59 }
0x113a   :  { %v2773_v61 = vadd.f32 %v7864_v34, %v2771_v60 }
0x113c   :  { %6553 = vmatmul.mubr.msk.f32.vlgmr.msra.gmra.mrb[20].mxu1 %vm153_vm0, %v2773_v61 }
0x113d   :  { %6920 = vmatpush3.bf16.msra.mxu1 %v6917_v37 }
0x113e   :  { %6922 = vmatprep.subr.bf16.mxu1 %v6921_v32 }
0x1141   :  { %6924 = vmatpush3.bf16.msra.mxu1 %v6921_v32 }
0x120f   :  { %v6554_v31 = vpop.f32.mrb[20].mxu1 }
0x1210   :  { %v2861_v2 = vadd.f32 %v6554_v31, %v6001_v1  ;;  %v2855_v34 = vpop.f32.mrb[21].mxu1 }
0x1211   :  { %v2856_v3 = vadd.f32 %v6001_v1, %v2855_v34 }
0x1212   :  { %v2865_v45 = vmax.f32 %v2861_v2, 0.0 }
0x1213   :  { %v2864_v4 = vmax.f32 %v2856_v3, 0.0 }
0x1215   :  { %6571 = vmatprep.mubr.msk.f32.mxu0 %vm2879_vm6, %v2864_v4 }
0x1216   :  { %6572 = vmatmul.mubr.msk.f32.vlgmr.msra.gmra.mrb[22].mxu0 %vm2879_vm6, %v2865_v45 }
0x12e9   :  { %v6573_v8 = vpop.f32.mrb[22].mxu0 }
0x12ea   :  { %v2952_v9 = vpop.f32.mrb[23].mxu0  ;;  %v2958_v10 = vadd.f32 %v6573_v8, %v6004_v6 }
0x12eb   :  { %v2953_v11 = vadd.f32 %v6004_v6, %v2952_v9 }
0x12ec   :  { %v2962_v17 = vadd.f32 %v2958_v10, %v2773_v61 }
0x12ed   :  { %v2961_v12 = vadd.f32 %v2953_v11, %v2772_v5 }
0x12ee   :  { %v2968_v18 = vsel %vm153_vm0, %v2962_v17, 0.0 }
0x12ef   :  { %v2965_v16 = vsel %vm153_vm0, %v2961_v12, 0.0 }
0x12f0   :  { %2966 = vadd.xlane.f32.xlu0 %v2965_v16 }
0x12f4   :  { %2969 = vadd.xlane.f32.xlu0 %v2968_v18 }
0x137d   :  { %v2967_v20 = vpop.xlane.xlu0 %2966 }
0x137e   :  { %v2971_v21 = vmul.f32 0.03125, %v2967_v20 }
0x1380   :  { %v2973_v22 = vsub.f32 %v2961_v12, %v2971_v21 }
0x1381   :  { %v2970_v15 = vpop.xlane.xlu0 %2969 }
0x1382   :  { %v2972_v14 = vmul.f32 0.03125, %v2970_v15  ;;  %v2975_v23 = vmul.f32 %v2973_v22, %v2973_v22 }
0x1384   :  { %v2974_v24 = vsub.f32 %v2962_v17, %v2972_v14  ;;  %v2977_v25 = vsel %vm153_vm0, %v2975_v23, 0.0 }
0x1385   :  { %2978 = vadd.xlane.f32.xlu0 %v2977_v25 }
0x1386   :  { %v2976_v26 = vmul.f32 %v2974_v24, %v2974_v24 }
0x1388   :  { %v2980_v27 = vsel %vm153_vm0, %v2976_v26, 0.0 }
0x1389   :  { %2981 = vadd.xlane.f32.xlu1 %v2980_v27 }
0x1412   :  { %v2979_v33 = vpop.xlane.xlu0 %2978 }
0x1413   :  { %v2983_v13 = vmul.f32 0.03125, %v2979_v33 }
0x1415   :  { %v2985_v35 = vadd.f32 1e-05, %v2983_v13 }
0x1416   :  { %v2982_v38 = vpop.xlane.xlu1 %2981 }
0x1417   :  { %7330 = vrsqrt.f32 %v2985_v35  ;;  %v2984_v39 = vmul.f32 0.03125, %v2982_v38 }
0x1419   :  { %v2986_v40 = vadd.f32 1e-05, %v2984_v39 }
0x141b   :  { %7332 = vrsqrt.f32 %v2986_v40 }
0x1421   :  { %v7331_v43 = vpop.eup %7330 }
0x1422   :  { %v2989_v46 = vmul.f32 %v7331_v43, %v2973_v22 }
0x1424   :  { %v2995_v48 = vmul.f32 %v6007_v44, %v2989_v46 }
0x1425   :  { %v7333_v49 = vpop.eup %7332 }
0x1426   :  { %v2990_v50 = vmul.f32 %v7333_v49, %v2974_v24  ;;  %v8044_v52 = vadd.f32 %v6008_v47, %v2995_v48 }
0x1428   :  { %v2996_v53 = vmul.f32 %v6007_v44, %v2990_v50  ;;  %6582 = vmatprep.mubr.msk.f32.mxu1 %vm153_vm0, %v8044_v52 }
0x142a   :  { %v8048_v51 = vadd.f32 %v6008_v47, %v2996_v53 }
0x142c   :  { %6583 = vmatmul.mubr.msk.f32.vlgmr.msra.gmra.mrb[22].mxu1 %vm153_vm0, %v8048_v51 }
0x14ff   :  { %v6584_v55 = vpop.f32.mrb[22].mxu1 }
0x1500   :  { %v3099_v56 = vadd.f32 %v6584_v55, %v6017_v54  ;;  %v3093_v57 = vpop.f32.mrb[23].mxu1 }
0x1501   :  { %v3094_v58 = vadd.f32 %v6017_v54, %v3093_v57 }
0x1502   :  { %v8065_v5 = vmul.f32 0.35355338, %v3099_v56 }
0x1503   :  { %v8055_v7 = vpack.i.bf16 %v3099_v56, %v3094_v58  ;;  %v8057_v59 = vmul.f32 0.35355338, %v3094_v58 }
0x1505   :  { %7179 = vrot.lane.b32.xlu1 %v8055_v7, %s7542_s27  ;;  %7174 = vrot.lane.b32.xlu0 %v8055_v7, %s7540_s0 }
0x1506   :  { %6589 = vmatprep.mubr.msk.f32.mxu1 %vm243_vm1, %v8057_v59 }
0x1509   :  { %3306 = vrot.lane.b32.xlu0 %v8065_v5, %s7541_s12  ;;  %3304 = vrot.lane.b32.xlu1 %v8057_v59, %s7541_s12 }
0x150d   :  { %3666 = vrot.lane.b32.xlu0 %v8057_v59, %s7544_s29  ;;  %7184 = vrot.lane.b32.xlu1 %v8055_v7, %s7543_s28 }
0x1511   :  { %3668 = vrot.lane.b32.xlu1 %v8065_v5, %s7544_s29 }
0x1577   :  { %v7180_v60 = vpop.permute.xlu1 %7179  ;;  %v7175_v61 = vpop.permute.xlu0 %7174 }
0x1578   :  { %v7182_v62 = vunpack.i.h.bf16 %v7180_v60  ;;  %v7181_v63 = vunpack.i.l.bf16 %v7180_v60  ;;  %v7177_v0 = vunpack.i.h.bf16 %v7175_v61  ;;  %v7176_v1 = vunpack.i.l.bf16 %v7175_v61 }
0x157a   :  { %v6925_v31 = vpack.c.bf16 %v7177_v0, %v7176_v1  ;;  %v6935_v34 = vpack.c.bf16 %v7182_v62, %v7181_v63 }
0x157b   :  { %v3305_v2 = vpop.permute.xlu1 %3304  ;;  %v3307_v8 = vpop.permute.xlu0 %3306 }
0x157c   :  { %6927 = vmatprep.subr.msk.bf16.mxu1 %vm7724_vm2, %v6925_v31 }
0x157d   :  { %6930 = vmatpush3.bf16.xpose.msk.msra.mxu1 %vm7724_vm2, %v6925_v31 }
0x157e   :  { %6937 = vmatprep.subr.msk.bf16.mxu1 %vm7724_vm2, %v6935_v34 }
0x157f   :  { %v7185_v3 = vpop.permute.xlu1 %7184  ;;  %v3667_v9 = vpop.permute.xlu0 %3666 }
0x1580   :  { %v7187_v4 = vunpack.i.h.bf16 %v7185_v3  ;;  %v7186_v45 = vunpack.i.l.bf16 %v7185_v3 }
0x1582   :  { %v6945_v6 = vpack.c.bf16 %v7187_v4, %v7186_v45 }
0x1583   :  { %v3669_v10 = vpop.permute.xlu1 %3668 }
0x1584   :  { %6590 = vmatmul.mubr.msk.f32.vlgmr.msra.gmra.mrb[24].mxu1 %vm243_vm1, %v8065_v5 }
0x1585   :  { %6940 = vmatpush3.bf16.xpose.msk.msra.mxu1 %vm7724_vm2, %v6935_v34  ;;  %6603 = vmatprep.mubr.msk.f32.mxu1 %vm243_vm1, %v3305_v2 }
0x1586   :  { %6947 = vmatprep.subr.msk.bf16.mxu1 %vm7724_vm2, %v6945_v6 }
0x158c   :  { %6604 = vmatmul.mubr.msk.f32.vlgmr.msra.gmra.mrb[26].mxu1 %vm243_vm1, %v3307_v8 }
0x158d   :  { %6950 = vmatpush3.bf16.xpose.msk.msra.mxu1 %vm7724_vm2, %v6945_v6  ;;  %6627 = vmatprep.mubr.msk.f32.mxu1 %vm243_vm1, %v3667_v9 }
0x1594   :  { %6628 = vmatmul.mubr.msk.f32.vlgmr.msra.gmra.mrb[28].mxu1 %vm243_vm1, %v3669_v10 }
0x1657   :  { %v6591_v11 = vpop.f32.mrb[24].mxu1 }
0x1658   :  { %v3192_v12 = vadd.f32 %v6591_v11, %v7746_v41  ;;  %v3186_v16 = vpop.f32.mrb[25].mxu1 }
0x1659   :  { %v3187_v17 = vadd.f32 %v3186_v16, %v7748_v42 }
0x165a   :  { %v3198_v18 = vsel %vm329_vm5, %v3192_v12, -inf }
0x165b   :  { %3199 = vmax.xlane.f32.xlu1 %v3198_v18  ;;  %v3195_v20 = vsel %vm329_vm5, %v3187_v17, -inf }
0x165c   :  { %3196 = vmax.xlane.f32.xlu0 %v3195_v20 }
0x165f   :  { %v6605_v21 = vpop.f32.mrb[26].mxu1 }
0x1660   :  { %v3386_v22 = vpop.f32.mrb[27].mxu1  ;;  %v3392_v14 = vadd.f32 %v6605_v21, %v7746_v41 }
0x1661   :  { %v3387_v15 = vadd.f32 %v3386_v22, %v7748_v42 }
0x1662   :  { %v3398_v25 = vsel %vm329_vm5, %v3392_v14, -inf }
0x1663   :  { %v3395_v23 = vsel %vm329_vm5, %v3387_v15, -inf }
0x1664   :  { %3396 = vmax.xlane.f32.xlu0 %v3395_v23 }
0x1667   :  { %v6629_v24 = vpop.f32.mrb[28].mxu1 }
0x1668   :  { %v3748_v26 = vpop.f32.mrb[29].mxu1  ;;  %3399 = vmax.xlane.f32.xlu0 %v3398_v25  ;;  %v3754_v53 = vadd.f32 %v6629_v24, %v7746_v41 }
0x1669   :  { %v3749_v54 = vadd.f32 %v3748_v26, %v7748_v42 }
0x166a   :  { %v3760_v56 = vsel %vm329_vm5, %v3754_v53, -inf }
0x166b   :  { %v3757_v55 = vsel %vm329_vm5, %v3749_v54, -inf }
0x16e8   :  { %v3200_v27 = vpop.xlane.xlu1 %3199 }
0x16e9   :  { %v3202_v28 = vsub.f32 %v3192_v12, %v3200_v27  ;;  %v3197_v29 = vpop.xlane.xlu0 %3196 }
0x16ea   :  { %v3201_v37 = vsub.f32 %v3187_v17, %v3197_v29  ;;  %v6014_v29 = vld [vmem:[%s8403_s3 + $0x28] sm:$0xff] }
0x16eb   :  { %v3205_v36 = vmul.f32 1.442695, %v3202_v28 }
0x16ec   :  { %v3203_v30 = vmul.f32 1.442695, %v3201_v37  ;;  %v6013_v37 = vld [vmem:[%s8403_s3 + $0x20] sm:$0xff] }
0x16ed   :  { %7334 = vpow2.f32 %v3205_v36 }
0x16ee   :  { %7336 = vpow2.f32 %v3203_v30 }
0x16f1   :  { %v3397_v32 = vpop.xlane.xlu0 %3396 }
0x16f2   :  { %v3401_v33 = vsub.f32 %v3387_v15, %v3397_v32 }
0x16f4   :  { %v3403_v13 = vmul.f32 1.442695, %v3401_v33 }
0x16f5   :  { %v3400_v35 = vpop.xlane.xlu0 %3399 }
0x16f6   :  { %7338 = vpow2.f32 %v3403_v13  ;;  %v3402_v38 = vsub.f32 %v3392_v14, %v3400_v35 }
0x16f7   :  { %v7335_v39 = vpop.eup %7334 }
0x16f8   :  { %v7337_v40 = vpop.eup %7336  ;;  %v3405_v43 = vmul.f32 1.442695, %v3402_v38  ;;  %v3210_v44 = vsel %vm329_vm5, %v7335_v39, 0.0 }
0x16f9   :  { %3211 = vadd.xlane.f32.xlu0 %v3210_v44  ;;  %v3207_v46 = vsel %vm329_vm5, %v7337_v40, 0.0 }
0x16fa   :  { %7340 = vpow2.f32 %v3405_v43  ;;  %3208 = vadd.xlane.f32.xlu1 %v3207_v46 }
0x1700   :  { %v7339_v47 = vpop.eup %7338 }
0x1701   :  { %v3407_v48 = vsel %vm329_vm5, %v7339_v47, 0.0 }
0x1702   :  { %3408 = vadd.xlane.f32.xlu1 %v3407_v48 }
0x1704   :  { %v7341_v49 = vpop.eup %7340 }
0x1705   :  { %v3410_v50 = vsel %vm329_vm5, %v7341_v49, 0.0 }
0x1706   :  { %3411 = vadd.xlane.f32.xlu0 %v3410_v50 }
0x1713   :  { %7189 = vrot.lane.b32.xlu1 %v8055_v7, %s7548_s13 }
0x1717   :  { %7199 = vrot.lane.b32.xlu1 %v8055_v7, %s7547_s11 }
0x171b   :  { %3949 = vrot.lane.b32.xlu1 %v8057_v59, %s7549_s1 }
0x171c   :  { %7194 = vrot.lane.b32.xlu0 %v8055_v7, %s7546_s30 }
0x1720   :  { %3951 = vrot.lane.b32.xlu0 %v8065_v5, %s7549_s1 }
0x173f   :  { %3758 = vmax.xlane.f32.xlu1 %v3757_v55  ;;  %3761 = vmax.xlane.f32.xlu0 %v3760_v56 }
0x1786   :  { %v3212_v58 = vpop.xlane.xlu0 %3211 }
0x1787   :  { %v3209_v57 = vpop.xlane.xlu1 %3208 }
0x1788   :  { %7342 = vrcp.f32 %v3209_v57  ;;  %v6015_v57 = vld [vmem:[%s8403_s3 + $0x30] sm:$0xff] }
0x1789   :  { %7344 = vrcp.f32 %v3212_v58 }
0x178f   :  { %v3409_v59 = vpop.xlane.xlu1 %3408 }
0x1790   :  { %7346 = vrcp.f32 %v3409_v59 }
0x1792   :  { %v7343_v60 = vpop.eup %7342 }
0x1793   :  { %v7190_v61 = vpop.permute.xlu1 %7189  ;;  %v3412_v62 = vpop.xlane.xlu0 %3411  ;;  %v3215_v5 = vmul.f32 %v7343_v60, %v7337_v40 }
0x1794   :  { %v7192_v63 = vunpack.i.h.bf16 %v7190_v61  ;;  %v7191_v0 = vunpack.i.l.bf16 %v7190_v61  ;;  %7348 = vrcp.f32 %v3412_v62  ;;  %v7345_v31 = vpop.eup %7344 }
0x1795   :  { %6596 = vmatprep.mubr.msk.f32.mxu0 %vm329_vm5, %v3215_v5  ;;  %v3216_v9 = vmul.f32 %v7345_v31, %v7335_v39 }
0x1796   :  { %v6931_v1 = vpack.c.bf16 %v7192_v63, %v7191_v0 }
0x1797   :  { %v7200_v2 = vpop.permute.xlu1 %7199  ;;  %v7195_v34 = vpop.permute.xlu0 %7194 }
0x1798   :  { %v7202_v3 = vunpack.i.h.bf16 %v7200_v2  ;;  %v7201_v4 = vunpack.i.l.bf16 %v7200_v2  ;;  %v7197_v45 = vunpack.i.h.bf16 %v7195_v34  ;;  %v7196_v6 = vunpack.i.l.bf16 %v7195_v34  ;;  %6932 = vmatprep.subr.bf16.mxu0 %v6931_v1 }
0x1799   :  { %6934 = vmatpush3.bf16.msra.mxu0 %v6931_v1 }
0x179a   :  { %v7347_v8 = vpop.eup %7346  ;;  %v6955_v10 = vpack.c.bf16 %v7202_v3, %v7201_v4  ;;  %v6941_v11 = vpack.c.bf16 %v7197_v45, %v7196_v6 }
0x179b   :  { %v3950_v12 = vpop.permute.xlu1 %3949  ;;  %v3415_v16 = vmul.f32 %v7347_v8, %v7339_v47  ;;  %v3952_v20 = vpop.permute.xlu0 %3951 }
0x179c   :  { %6597 = vmatmul.mubr.msk.f32.vlgmr.msra.gmra.mrb[24].mxu0 %vm329_vm5, %v3216_v9  ;;  %6942 = vmatprep.subr.bf16.mxu0 %v6941_v11 }
0x179d   :  { %6957 = vmatprep.subr.msk.bf16.mxu1 %vm7724_vm2, %v6955_v10  ;;  %6646 = vmatprep.mubr.msk.f32.mxu1 %vm243_vm1, %v3950_v12 }
0x179e   :  { %v7349_v17 = vpop.eup %7348  ;;  %6944 = vmatpush3.bf16.msra.mxu0 %v6941_v11  ;;  %6610 = vmatprep.mubr.msk.f32.mxu0 %vm329_vm5, %v3415_v16 }
0x179f   :  { %v3416_v18 = vmul.f32 %v7349_v17, %v7341_v49  ;;  %6960 = vmatpush3.bf16.xpose.msk.msra.mxu1 %vm7724_vm2, %v6955_v10  ;;  %6613 = vmatprep.subr.mxu0 %v6014_v29  ;;  %v6016_v10 = vld [vmem:[%s8403_s3 + $0x38] sm:$0xff] }
0x17a1   :  { %6611 = vmatmul.mubr.msk.f32.vlgmr.msra.gmra.mrb[26].mxu0 %vm329_vm5, %v3416_v18 }
0x17a2   :  { %6614 = vmatpush3.msra.mxu0 %v6014_v29  ;;  %v6058_v29 = vld [vmem:[%s8404_s4 + $0x38] sm:$0xff] }
0x17a3   :  { %6618 = vmatprep.subr.mxu0 %v6013_v37 }
0x17a6   :  { %6647 = vmatmul.mubr.msk.f32.vlgmr.msra.gmra.mrb[30].mxu1 %vm243_vm1, %v3952_v20  ;;  %v7414_v20 = vld [vmem:[#allocation5] sm:$0xff] }
0x17cc   :  { %v3759_v21 = vpop.xlane.xlu1 %3758  ;;  %v3762_v22 = vpop.xlane.xlu0 %3761 }
0x17cd   :  { %v3763_v15 = vsub.f32 %v3749_v54, %v3759_v21  ;;  %v3764_v14 = vsub.f32 %v3754_v53, %v3762_v22  ;;  %v6052_v21 = vld [vmem:[%s8408_s8 + $0xb] ss:$0 sm:$0xff] }
0x17cf   :  { %v3765_v23 = vmul.f32 1.442695, %v3763_v15  ;;  %v3767_v24 = vmul.f32 1.442695, %v3764_v14 }
0x17d1   :  { %7350 = vpow2.f32 %v3765_v23 }
0x17d2   :  { %7352 = vpow2.f32 %v3767_v24 }
0x17db   :  { %v7351_v25 = vpop.eup %7350 }
0x17dc   :  { %v7353_v26 = vpop.eup %7352  ;;  %v3769_v27 = vsel %vm329_vm5, %v7351_v25, 0.0 }
0x17dd   :  { %3770 = vadd.xlane.f32.xlu0 %v3769_v27  ;;  %v3772_v28 = vsel %vm329_vm5, %v7353_v26, 0.0 }
0x17de   :  { %3773 = vadd.xlane.f32.xlu1 %v3772_v28  ;;  %v6057_v28 = vld [vmem:[%s8404_s4 + $0x30] sm:$0xff] }
0x17f3   :  { %7204 = vrot.lane.b32.xlu0 %v8055_v7, %s7550_s10 }
0x186a   :  { %v3771_v36 = vpop.xlane.xlu0 %3770 }
0x186b   :  { %v3774_v13 = vpop.xlane.xlu1 %3773  ;;  %7354 = vrcp.f32 %v3771_v36 }
0x186c   :  { %7356 = vrcp.f32 %v3774_v13 }
0x186e   :  { %v7205_v32 = vpop.permute.xlu0 %7204 }
0x186f   :  { %v6598_v30 = vpop.f32.mrb[24].mxu0  ;;  %v7207_v35 = vunpack.i.h.bf16 %v7205_v32  ;;  %v7206_v38 = vunpack.i.l.bf16 %v7205_v32 }
0x1870   :  { %v3295_v33 = vpop.f32.mrb[25].mxu0 }
0x1871   :  { %v6951_v43 = vpack.c.bf16 %v7207_v35, %v7206_v38 }
0x1874   :  { %v6612_v39 = vpop.f32.mrb[26].mxu0 }
0x1875   :  { %v3495_v40 = vpop.f32.mrb[27].mxu0  ;;  %v7355_v47 = vpop.eup %7354 }
0x1876   :  { %6615 = vmatprep.mubr.msk.f32.mxu0 %vm243_vm1, %v3495_v40  ;;  %v7357_v53 = vpop.eup %7356  ;;  %v3777_v54 = vmul.f32 %v7355_v47, %v7351_v25  ;;  %v6055_v40 = vld [vmem:[%s8404_s4 + $0x20] sm:$0xff]  ;;  %v6969_v47 = vpack.c.bf16 %v6058_v29, %v6057_v28 }
0x1877   :  { %6616 = vmatmul.mubr.msk.f32.vlgmr.msra.gmra.mrb[28].mxu0 %vm243_vm1, %v6612_v39  ;;  %v3778_v55 = vmul.f32 %v7357_v53, %v7353_v26 }
0x1878   :  { %6619 = vmatpush3.msra.mxu0 %v6013_v37  ;;  %6620 = vmatprep.mubr.msk.f32.mxu0 %vm243_vm1, %v3295_v33  ;;  %v7218_v37 = vpack.i.bf16 %v6058_v29, %v6057_v28 }
0x1879   :  { %v6648_v44 = vpop.f32.mrb[30].mxu1  ;;  %6952 = vmatprep.subr.bf16.mxu0 %v6951_v43 }
0x187a   :  { %v4031_v46 = vpop.f32.mrb[31].mxu1  ;;  %v4037_v49 = vadd.f32 %v6648_v44, %v7746_v41 }
0x187b   :  { %v4032_v48 = vadd.f32 %v4031_v46, %v7748_v42 }
0x187c   :  { %v4043_v56 = vsel %vm329_vm5, %v4037_v49, -inf }
0x187d   :  { %v4040_v50 = vsel %vm329_vm5, %v4032_v48, -inf }
0x187e   :  { %4041 = vmax.xlane.f32.xlu1 %v4040_v50 }
0x187f   :  { %6621 = vmatmul.mubr.msk.f32.vlgmr.msra.gmra.mrb[28].mxu0 %vm243_vm1, %v6598_v30 }
0x1880   :  { %6954 = vmatpush3.bf16.msra.mxu0 %v6951_v43  ;;  %6634 = vmatprep.mubr.msk.f32.mxu0 %vm329_vm5, %v3777_v54  ;;  %v6056_v43 = vld [vmem:[%s8404_s4 + $0x28] sm:$0xff] }
0x1881   :  { %6637 = vmatprep.subr.mxu0 %v6015_v57  ;;  %v7213_v44 = vpack.i.bf16 %v6056_v43, %v6055_v40  ;;  %v6965_v46 = vpack.c.bf16 %v6056_v43, %v6055_v40 }
0x1882   :  { %4044 = vmax.xlane.f32.xlu1 %v4043_v56 }
0x1883   :  { %6635 = vmatmul.mubr.msk.f32.vlgmr.msra.gmra.mrb[30].mxu0 %vm329_vm5, %v3778_v55  ;;  %6966 = vmatprep.subr.bf16.mxu1 %v6965_v46 }
0x1884   :  { %6638 = vmatpush3.msra.mxu0 %v6015_v57  ;;  %6968 = vmatpush3.bf16.msra.mxu1 %v6965_v46 }
0x1885   :  { %6970 = vmatprep.subr.bf16.mxu1 %v6969_v47 }
0x1888   :  { %6972 = vmatpush3.bf16.msra.mxu1 %v6969_v47 }
0x190b   :  { %v4042_v58 = vpop.xlane.xlu1 %4041 }
0x190c   :  { %v4046_v59 = vsub.f32 %v4032_v48, %v4042_v58  ;;  %v6059_v48 = vld [vmem:[%s8408_s8 + $0xc] ss:$0 sm:$0xff] }
0x190e   :  { %v4048_v62 = vmul.f32 1.442695, %v4046_v59 }
0x190f   :  { %v4045_v60 = vpop.xlane.xlu1 %4044 }
0x1910   :  { %v4047_v61 = vsub.f32 %v4037_v49, %v4045_v60 }
0x1912   :  { %v4050_v5 = vmul.f32 1.442695, %v4047_v61 }
0x1914   :  { %7358 = vpow2.f32 %v4050_v5 }
0x1915   :  { %7360 = vpow2.f32 %v4048_v62 }
0x191e   :  { %v7359_v63 = vpop.eup %7358 }
0x191f   :  { %v4055_v0 = vsel %vm329_vm5, %v7359_v63, 0.0  ;;  %v7361_v1 = vpop.eup %7360 }
0x1920   :  { %4056 = vadd.xlane.f32.xlu1 %v4055_v0  ;;  %v4052_v31 = vsel %vm329_vm5, %v7361_v1, 0.0 }
0x1924   :  { %4053 = vadd.xlane.f32.xlu1 %v4052_v31  ;;  %v8198_v31 = vld [vmem:[%s8408_s8 + $0xe] ss:$0 sm:$0xff] }
0x1935   :  { %7209 = vrot.lane.b32.xlu1 %v8055_v7, %s7551_s14 }
0x1956   :  { %v6636_v2 = vpop.f32.mrb[30].mxu0 }
0x1957   :  { %v3857_v34 = vpop.f32.mrb[31].mxu0 }
0x1958   :  { %6639 = vmatprep.mubr.msk.f32.mxu0 %vm243_vm1, %v3857_v34 }
0x1959   :  { %6640 = vmatmul.mubr.msk.f32.vlgmr.msra.gmra.mrb[28].mxu0 %vm243_vm1, %v6636_v2 }
0x19ad   :  { %v4057_v3 = vpop.xlane.xlu1 %4056 }
0x19ae   :  { %7362 = vrcp.f32 %v4057_v3  ;;  %v7415_v3 = vld [vmem:[#allocation5 + $0x8] sm:$0xff] }
0x19b1   :  { %v4054_v4 = vpop.xlane.xlu1 %4053 }
0x19b2   :  { %7364 = vrcp.f32 %v4054_v4 }
0x19b5   :  { %v7210_v45 = vpop.permute.xlu1 %7209 }
0x19b6   :  { %v7212_v6 = vunpack.i.h.bf16 %v7210_v45  ;;  %v7211_v8 = vunpack.i.l.bf16 %v7210_v45  ;;  %v8205_v45 = vld [vmem:[%s8408_s8 + $0xf] ss:$0 sm:$0xff] }
0x19b8   :  { %v6961_v9 = vpack.c.bf16 %v7212_v6, %v7211_v8  ;;  %v7363_v7 = vpop.eup %7362 }
0x19b9   :  { %v4061_v16 = vmul.f32 %v7363_v7, %v7359_v63 }
0x19ba   :  { %6962 = vmatprep.subr.bf16.mxu0 %v6961_v9 }
0x19bb   :  { %6964 = vmatpush3.bf16.msra.mxu0 %v6961_v9 }
0x19bc   :  { %v7365_v11 = vpop.eup %7364  ;;  %6656 = vmatprep.subr.mxu0 %v6016_v10 }
0x19bd   :  { %v4060_v12 = vmul.f32 %v7365_v11, %v7361_v1 }
0x19bf   :  { %6653 = vmatprep.mubr.msk.f32.mxu0 %vm329_vm5, %v4060_v12 }
0x19c0   :  { %6654 = vmatmul.mubr.msk.f32.vlgmr.msra.gmra.mrb[32].mxu0 %vm329_vm5, %v4061_v16 }
0x19c1   :  { %6657 = vmatpush3.msra.mxu0 %v6016_v10 }
0x1a93   :  { %v6655_v17 = vpop.f32.mrb[32].mxu0 }
0x1a94   :  { %v4140_v18 = vpop.f32.mrb[33].mxu0 }
0x1a95   :  { %6658 = vmatprep.mubr.msk.f32.mxu0 %vm243_vm1, %v4140_v18 }
0x1a96   :  { %6659 = vmatmul.mubr.msk.f32.vlgmr.msra.gmra.mrb[28].mxu0 %vm243_vm1, %v6655_v17 }
0x1a97   :  { %6680 = vmatprep.mubr.msk.f32.mxu0 %vm153_vm0, %v7414_v20 }
0x1b69   :  { %v6660_v22 = vpop.f32.mrb[28].mxu0 }
0x1b6a   :  { %v4237_v15 = vadd.f32 %v6660_v22, %v6052_v21  ;;  %v4221_v14 = vpop.f32.mrb[29].mxu0 }
0x1b6b   :  { %v4236_v23 = vadd.f32 %v6052_v21, %v4221_v14 }
0x1b6c   :  { %v4239_v24 = vadd.f32 %v4237_v15, %v8048_v51 }
0x1b6d   :  { %v4238_v25 = vadd.f32 %v4236_v23, %v8044_v52 }
0x1b6e   :  { %v4243_v26 = vsel %vm153_vm0, %v4239_v24, 0.0 }
0x1b6f   :  { %4244 = vadd.xlane.f32.xlu1 %v4243_v26  ;;  %v4240_v27 = vsel %vm153_vm0, %v4238_v25, 0.0 }
0x1b70   :  { %4241 = vadd.xlane.f32.xlu0 %v4240_v27 }
0x1b80   :  { %7219 = vrot.lane.b32.xlu1 %v7218_v37, %s7540_s0 }
0x1bfc   :  { %v4245_v51 = vpop.xlane.xlu1 %4244 }
0x1bfd   :  { %v4247_v36 = vmul.f32 0.03125, %v4245_v51  ;;  %v4242_v52 = vpop.xlane.xlu0 %4241 }
0x1bfe   :  { %v4246_v30 = vmul.f32 0.03125, %v4242_v52 }
0x1bff   :  { %v4249_v32 = vsub.f32 %v4239_v24, %v4247_v36 }
0x1c00   :  { %v4248_v33 = vsub.f32 %v4238_v25, %v4246_v30  ;;  %v7220_v55 = vpop.permute.xlu1 %7219 }
0x1c01   :  { %v4251_v13 = vmul.f32 %v4249_v32, %v4249_v32  ;;  %v7222_v58 = vunpack.i.h.bf16 %v7220_v55  ;;  %v7221_v59 = vunpack.i.l.bf16 %v7220_v55 }
0x1c02   :  { %v4250_v38 = vmul.f32 %v4248_v33, %v4248_v33 }
0x1c03   :  { %v4255_v35 = vsel %vm153_vm0, %v4251_v13, 0.0  ;;  %v6977_v63 = vpack.c.bf16 %v7222_v58, %v7221_v59 }
0x1c04   :  { %4256 = vadd.xlane.f32.xlu0 %v4255_v35  ;;  %v4252_v39 = vsel %vm153_vm0, %v4250_v38, 0.0 }
0x1c08   :  { %4253 = vadd.xlane.f32.xlu0 %v4252_v39 }
0x1c1e   :  { %7214 = vrot.lane.b32.xlu0 %v7213_v44, %s7540_s0 }
0x1c22   :  { %4392 = vrot.lane.b32.xlu0 %v6059_v48, %s7540_s0 }
0x1c91   :  { %v4257_v49 = vpop.xlane.xlu0 %4256 }
0x1c92   :  { %v4259_v50 = vmul.f32 0.03125, %v4257_v49 }
0x1c94   :  { %v4261_v53 = vadd.f32 1e-05, %v4259_v50 }
0x1c95   :  { %v4254_v54 = vpop.xlane.xlu0 %4253 }
0x1c96   :  { %7366 = vrsqrt.f32 %v4261_v53  ;;  %v4258_v56 = vmul.f32 0.03125, %v4254_v54 }
0x1c98   :  { %v4260_v57 = vadd.f32 1e-05, %v4258_v56 }
0x1c99   :  { %v7215_v60 = vpop.permute.xlu0 %7214 }
0x1c9a   :  { %7368 = vrsqrt.f32 %v4260_v57  ;;  %v7217_v61 = vunpack.i.h.bf16 %v7215_v60  ;;  %v7216_v62 = vunpack.i.l.bf16 %v7215_v60 }
0x1c9c   :  { %v6973_v5 = vpack.c.bf16 %v7217_v61, %v7216_v62 }
0x1c9d   :  { %v4393_v10 = vpop.permute.xlu0 %4392 }
0x1c9e   :  { %6974 = vmatprep.subr.bf16.mxu0 %v6973_v5 }
0x1c9f   :  { %6976 = vmatpush3.bf16.msra.mxu0 %v6973_v5 }
0x1ca0   :  { %v7367_v0 = vpop.eup %7366  ;;  %6978 = vmatprep.subr.bf16.mxu0 %v6977_v63 }
0x1ca1   :  { %v4265_v1 = vmul.f32 %v7367_v0, %v4249_v32 }
0x1ca3   :  { %6980 = vmatpush3.bf16.msra.mxu0 %v6977_v63  ;;  %v4271_v4 = vmul.f32 %v8198_v31, %v4265_v1 }
0x1ca4   :  { %v7369_v2 = vpop.eup %7368 }
0x1ca5   :  { %v4264_v34 = vmul.f32 %v7369_v2, %v4248_v33  ;;  %v8212_v9 = vadd.f32 %v8205_v45, %v4271_v4 }
0x1ca6   :  { %6681 = vmatmul.mubr.msk.f32.vlgmr.msra.gmra.mrb[34].mxu0 %vm153_vm0, %v7415_v3 }
0x1ca7   :  { %v4270_v6 = vmul.f32 %v8198_v31, %v4264_v34 }
0x1ca9   :  { %v8209_v8 = vadd.f32 %v8205_v45, %v4270_v6 }
0x1cab   :  { %6669 = vmatprep.mubr.msk.f32.mxu1 %vm153_vm0, %v8209_v8 }
0x1cac   :  { %6670 = vmatmul.mubr.msk.f32.vlgmr.msra.gmra.mrb[32].mxu1 %vm153_vm0, %v8212_v9 }
0x1d79   :  { %v6682_v7 = vpop.f32.mrb[34].mxu0 }
0x1d7a   :  { %v4467_v11 = vadd.f32 %v6682_v7, %v4393_v10  ;;  %v4461_v12 = vpop.f32.mrb[35].mxu0 }
0x1d7b   :  { %v4462_v16 = vadd.f32 %v4461_v12, %v4393_v10 }
0x1d7d   :  { %v8218_v17 = vpack.i.bf16 %v4467_v11, %v4462_v16  ;;  %v6981_v18 = vpack.c.bf16 %v4467_v11, %v4462_v16 }
0x1d7f   :  { %v6671_v20 = vpop.f32.mrb[32].mxu1  ;;  %7224 = vrot.lane.b32.xlu0 %v8218_v17, %s7541_s12  ;;  %6983 = vmatprep.subr.msk.bf16.mxu1 %vm7724_vm2, %v6981_v18 }
0x1d80   :  { %v4372_v21 = vadd.f32 %v6671_v20, %v6059_v48  ;;  %v4366_v22 = vpop.f32.mrb[33].mxu1  ;;  %6986 = vmatpush3.bf16.xpose.msk.msra.mxu1 %vm7724_vm2, %v6981_v18 }
0x1d81   :  { %v4367_v15 = vadd.f32 %v6059_v48, %v4366_v22 }
0x1d82   :  { %v8226_v14 = vmul.f32 0.35355338, %v4372_v21 }
0x1d83   :  { %v8228_v23 = vmul.f32 0.35355338, %v4367_v15 }
0x1d84   :  { %4670 = vrot.lane.b32.xlu0 %v8226_v14, %s7541_s12 }
0x1d85   :  { %4668 = vrot.lane.b32.xlu1 %v8228_v23, %s7541_s12  ;;  %6687 = vmatprep.mubr.msk.f32.mxu1 %vm243_vm1, %v8228_v23 }
0x1d87   :  { %6688 = vmatmul.mubr.msk.f32.vlgmr.msra.gmra.mrb[34].mxu1 %vm243_vm1, %v8226_v14 }
0x1d88   :  { %5030 = vrot.lane.b32.xlu0 %v8228_v23, %s7544_s29 }
0x1d89   :  { %7229 = vrot.lane.b32.xlu1 %v8218_v17, %s7544_s29 }
0x1d8d   :  { %5032 = vrot.lane.b32.xlu1 %v8226_v14, %s7544_s29 }
0x1df1   :  { %v7225_v24 = vpop.permute.xlu0 %7224 }
0x1df2   :  { %v7227_v25 = vunpack.i.h.bf16 %v7225_v24  ;;  %v7226_v26 = vunpack.i.l.bf16 %v7225_v24 }
0x1df4   :  { %v6991_v27 = vpack.c.bf16 %v7227_v25, %v7226_v26 }
0x1df6   :  { %6993 = vmatprep.subr.msk.bf16.mxu1 %vm7724_vm2, %v6991_v27  ;;  %v4671_v29 = vpop.permute.xlu0 %4670 }
0x1df7   :  { %v4669_v28 = vpop.permute.xlu1 %4668  ;;  %6996 = vmatpush3.bf16.xpose.msk.msra.mxu1 %vm7724_vm2, %v6991_v27 }
0x1df8   :  { %6701 = vmatprep.mubr.msk.f32.mxu1 %vm243_vm1, %v4669_v28 }
0x1dfa   :  { %v5031_v52 = vpop.permute.xlu0 %5030 }
0x1dfb   :  { %v7230_v37 = vpop.permute.xlu1 %7229 }
0x1dfc   :  { %v7232_v51 = vunpack.i.h.bf16 %v7230_v37  ;;  %v7231_v36 = vunpack.i.l.bf16 %v7230_v37 }
0x1dfe   :  { %v7001_v30 = vpack.c.bf16 %v7232_v51, %v7231_v36  ;;  %6702 = vmatmul.mubr.msk.f32.vlgmr.msra.gmra.mrb[36].mxu1 %vm243_vm1, %v4671_v29 }
0x1dff   :  { %6725 = vmatprep.mubr.msk.f32.mxu1 %vm243_vm1, %v5031_v52  ;;  %v5033_v32 = vpop.permute.xlu1 %5032 }
0x1e00   :  { %7003 = vmatprep.subr.msk.bf16.mxu1 %vm7724_vm2, %v7001_v30 }
0x1e01   :  { %7006 = vmatpush3.bf16.xpose.msk.msra.mxu1 %vm7724_vm2, %v7001_v30 }
0x1e08   :  { %6726 = vmatmul.mubr.msk.f32.vlgmr.msra.gmra.mrb[38].mxu1 %vm243_vm1, %v5033_v32 }
0x1e5a   :  { %v6689_v33 = vpop.f32.mrb[34].mxu1 }
0x1e5b   :  { %v4556_v13 = vadd.f32 %v6689_v33, %v7746_v41  ;;  %v4550_v35 = vpop.f32.mrb[35].mxu1 }
0x1e5c   :  { %v4551_v38 = vadd.f32 %v4550_v35, %v7748_v42 }
0x1e5d   :  { %v4562_v39 = vsel %vm329_vm5, %v4556_v13, -inf }
0x1e5e   :  { %4563 = vmax.xlane.f32.xlu1 %v4562_v39  ;;  %v4559_v40 = vsel %vm329_vm5, %v4551_v38, -inf }
0x1e5f   :  { %4560 = vmax.xlane.f32.xlu0 %v4559_v40 }
0x1ed1   :  { %v6703_v43 = vpop.f32.mrb[36].mxu1 }
0x1ed2   :  { %v4750_v44 = vpop.f32.mrb[37].mxu1  ;;  %v4756_v47 = vadd.f32 %v6703_v43, %v7746_v41 }
0x1ed3   :  { %v4751_v46 = vadd.f32 %v4750_v44, %v7748_v42 }
0x1ed4   :  { %v4762_v49 = vsel %vm329_vm5, %v4756_v47, -inf }
0x1ed5   :  { %v4759_v48 = vsel %vm329_vm5, %v4751_v46, -inf }
0x1ed6   :  { %4760 = vmax.xlane.f32.xlu0 %v4759_v48 }
0x1eda   :  { %4763 = vmax.xlane.f32.xlu0 %v4762_v49 }
0x1edb   :  { %v6727_v50 = vpop.f32.mrb[38].mxu1 }
0x1edc   :  { %v5112_v53 = vpop.f32.mrb[39].mxu1  ;;  %v5118_v18 = vadd.f32 %v6727_v50, %v7746_v41 }
0x1edd   :  { %v5113_v20 = vadd.f32 %v5112_v53, %v7748_v42 }
0x1ede   :  { %v5124_v22 = vsel %vm329_vm5, %v5118_v18, -inf }
0x1edf   :  { %v5121_v21 = vsel %vm329_vm5, %v5113_v20, -inf }
0x1eeb   :  { %v4564_v54 = vpop.xlane.xlu1 %4563 }
0x1eec   :  { %v4566_v55 = vsub.f32 %v4556_v13, %v4564_v54  ;;  %v4561_v56 = vpop.xlane.xlu0 %4560 }
0x1eed   :  { %v4565_v57 = vsub.f32 %v4551_v38, %v4561_v56 }
0x1eee   :  { %v4569_v58 = vmul.f32 1.442695, %v4566_v55 }
0x1eef   :  { %v4567_v59 = vmul.f32 1.442695, %v4565_v57  ;;  %v4286_v57 = vld [vmem:[#allocation7 + $0x28] sm:$0xff] }
0x1ef0   :  { %7370 = vpow2.f32 %v4569_v58  ;;  %v4285_v58 = vld [vmem:[#allocation7 + $0x20] sm:$0xff] }
0x1ef1   :  { %7372 = vpow2.f32 %v4567_v59 }
0x1efa   :  { %v7371_v60 = vpop.eup %7370 }
0x1efb   :  { %v7373_v61 = vpop.eup %7372  ;;  %v4574_v62 = vsel %vm329_vm5, %v7371_v60, 0.0 }
0x1efc   :  { %4575 = vadd.xlane.f32.xlu0 %v4574_v62  ;;  %v4571_v5 = vsel %vm329_vm5, %v7373_v61, 0.0 }
0x1efd   :  { %4572 = vadd.xlane.f32.xlu1 %v4571_v5 }
0x1f63   :  { %v4761_v63 = vpop.xlane.xlu0 %4760 }
0x1f64   :  { %v4765_v0 = vsub.f32 %v4751_v46, %v4761_v63 }
0x1f66   :  { %v4767_v1 = vmul.f32 1.442695, %v4765_v0 }
0x1f67   :  { %v4764_v2 = vpop.xlane.xlu0 %4763 }
0x1f68   :  { %7374 = vpow2.f32 %v4767_v1  ;;  %v4766_v34 = vsub.f32 %v4756_v47, %v4764_v2 }
0x1f6a   :  { %v4769_v3 = vmul.f32 1.442695, %v4766_v34 }
0x1f6c   :  { %7376 = vpow2.f32 %v4769_v3 }
0x1f72   :  { %v7375_v4 = vpop.eup %7374 }
0x1f73   :  { %v4771_v6 = vsel %vm329_vm5, %v7375_v4, 0.0 }
0x1f74   :  { %4772 = vadd.xlane.f32.xlu1 %v4771_v6 }
0x1f76   :  { %v7377_v10 = vpop.eup %7376 }
0x1f77   :  { %v4774_v7 = vsel %vm329_vm5, %v7377_v10, 0.0 }
0x1f78   :  { %4775 = vadd.xlane.f32.xlu0 %v4774_v7 }
0x1f85   :  { %7234 = vrot.lane.b32.xlu1 %v8218_v17, %s7540_s0 }
0x1f89   :  { %7244 = vrot.lane.b32.xlu1 %v8218_v17, %s7549_s1  ;;  %v4576_v15 = vpop.xlane.xlu0 %4575 }
0x1f8a   :  { %v4573_v11 = vpop.xlane.xlu1 %4572 }
0x1f8b   :  { %7378 = vrcp.f32 %v4573_v11 }
0x1f8c   :  { %7380 = vrcp.f32 %v4576_v15 }
0x1f8d   :  { %5313 = vrot.lane.b32.xlu1 %v8228_v23, %s7549_s1 }
0x1f8e   :  { %7239 = vrot.lane.b32.xlu0 %v8218_v17, %s7542_s27 }
0x1f92   :  { %5315 = vrot.lane.b32.xlu0 %v8226_v14, %s7549_s1 }
0x1f95   :  { %v7379_v12 = vpop.eup %7378 }
0x1f96   :  { %v4579_v16 = vmul.f32 %v7379_v12, %v7373_v61  ;;  %v7381_v28 = vpop.eup %7380 }
0x1f97   :  { %v4580_v33 = vmul.f32 %v7381_v28, %v7371_v60 }
0x1f98   :  { %6694 = vmatprep.mubr.msk.f32.mxu0 %vm329_vm5, %v4579_v16 }
0x1fb1   :  { %5122 = vmax.xlane.f32.xlu1 %v5121_v21  ;;  %5125 = vmax.xlane.f32.xlu0 %v5124_v22  ;;  %v4287_v21 = vld [vmem:[#allocation7 + $0x30] sm:$0xff] }
0x2001   :  { %v4773_v23 = vpop.xlane.xlu1 %4772 }
0x2002   :  { %7382 = vrcp.f32 %v4773_v23 }
0x2005   :  { %v7235_v24 = vpop.permute.xlu1 %7234  ;;  %v4776_v14 = vpop.xlane.xlu0 %4775 }
0x2006   :  { %v7237_v25 = vunpack.i.h.bf16 %v7235_v24  ;;  %v7236_v26 = vunpack.i.l.bf16 %v7235_v24  ;;  %7384 = vrcp.f32 %v4776_v14 }
0x2008   :  { %v6987_v27 = vpack.c.bf16 %v7237_v25, %v7236_v26 }
0x2009   :  { %v7245_v29 = vpop.permute.xlu1 %7244  ;;  %v7240_v37 = vpop.permute.xlu0 %7239 }
0x200a   :  { %v7247_v51 = vunpack.i.h.bf16 %v7245_v29  ;;  %v7246_v36 = vunpack.i.l.bf16 %v7245_v29  ;;  %v7242_v52 = vunpack.i.h.bf16 %v7240_v37  ;;  %v7241_v30 = vunpack.i.l.bf16 %v7240_v37  ;;  %6988 = vmatprep.subr.bf16.mxu0 %v6987_v27 }
0x200b   :  { %6990 = vmatpush3.bf16.msra.mxu0 %v6987_v27 }
0x200c   :  { %v7383_v32 = vpop.eup %7382  ;;  %v7011_v13 = vpack.c.bf16 %v7247_v51, %v7246_v36  ;;  %v6997_v35 = vpack.c.bf16 %v7242_v52, %v7241_v30 }
0x200d   :  { %v5314_v38 = vpop.permute.xlu1 %5313  ;;  %v4779_v39 = vmul.f32 %v7383_v32, %v7375_v4  ;;  %v5316_v44 = vpop.permute.xlu0 %5315 }
0x200e   :  { %6695 = vmatmul.mubr.msk.f32.vlgmr.msra.gmra.mrb[36].mxu0 %vm329_vm5, %v4580_v33  ;;  %6998 = vmatprep.subr.bf16.mxu0 %v6997_v35  ;;  %v4288_v33 = vld [vmem:[#allocation7 + $0x38] sm:$0xff] }
0x200f   :  { %7013 = vmatprep.subr.msk.bf16.mxu1 %vm7724_vm2, %v7011_v13  ;;  %6744 = vmatprep.mubr.msk.f32.mxu1 %vm243_vm1, %v5314_v38 }
0x2010   :  { %v7385_v40 = vpop.eup %7384  ;;  %7000 = vmatpush3.bf16.msra.mxu0 %v6997_v35  ;;  %6708 = vmatprep.mubr.msk.f32.mxu0 %vm329_vm5, %v4779_v39 }
0x2011   :  { %v4780_v43 = vmul.f32 %v7385_v40, %v7377_v10  ;;  %7016 = vmatpush3.bf16.xpose.msk.msra.mxu1 %vm7724_vm2, %v7011_v13  ;;  %6711 = vmatprep.subr.mxu0 %v4286_v57 }
0x2013   :  { %6709 = vmatmul.mubr.msk.f32.vlgmr.msra.gmra.mrb[38].mxu0 %vm329_vm5, %v4780_v43  ;;  %v6096_v43 = vld [vmem:[%s8408_s8 + $0xd] ss:$0 sm:$0xff] }
0x2014   :  { %6712 = vmatpush3.msra.mxu0 %v4286_v57 }
0x2015   :  { %6716 = vmatprep.subr.mxu0 %v4285_v58 }
0x2018   :  { %6745 = vmatmul.mubr.msk.f32.vlgmr.msra.gmra.mrb[40].mxu1 %vm243_vm1, %v5316_v44 }
0x203e   :  { %v5123_v46 = vpop.xlane.xlu1 %5122  ;;  %v5126_v47 = vpop.xlane.xlu0 %5125 }
0x203f   :  { %v5127_v48 = vsub.f32 %v5113_v20, %v5123_v46  ;;  %v5128_v49 = vsub.f32 %v5118_v18, %v5126_v47 }
0x2041   :  { %v5129_v50 = vmul.f32 1.442695, %v5127_v48  ;;  %v5131_v53 = vmul.f32 1.442695, %v5128_v49 }
0x2043   :  { %7386 = vpow2.f32 %v5129_v50 }
0x2044   :  { %7388 = vpow2.f32 %v5131_v53 }
0x204d   :  { %v7387_v54 = vpop.eup %7386 }
0x204e   :  { %v7389_v55 = vpop.eup %7388  ;;  %v5133_v56 = vsel %vm329_vm5, %v7387_v54, 0.0 }
0x204f   :  { %5134 = vadd.xlane.f32.xlu0 %v5133_v56  ;;  %v5136_v19 = vsel %vm329_vm5, %v7389_v55, 0.0 }
0x2050   :  { %5137 = vadd.xlane.f32.xlu1 %v5136_v19 }
0x2065   :  { %7249 = vrot.lane.b32.xlu0 %v8218_v17, %s7543_s28  ;;  %s7552_s28 = smov [#allocation10]  }
0x2066   :  { %s5911_s29 = sshll.u32 %s7552_s28, 4  ;;  %s5912_s29 = int_to_ptr.vmem [resolvable:$true] %s5911_s29 }
0x2067   :  { %p7509_p5 = scmp.lt.s32.totalorder %s5912_s29, %s5912_s29 }
0x20dc   :  { %v5135_v59 = vpop.xlane.xlu0 %5134 }
0x20dd   :  { %v5138_v5 = vpop.xlane.xlu1 %5137  ;;  %7390 = vrcp.f32 %v5135_v59 }
0x20de   :  { %7392 = vrcp.f32 %v5138_v5  ;;  %v5636_v5 = vld [vmem:[#allocation8 + $0x28] sm:$0xff] }
0x20e0   :  { %v7250_v61 = vpop.permute.xlu0 %7249 }
0x20e1   :  { %v6696_v60 = vpop.f32.mrb[36].mxu0  ;;  %v7252_v63 = vunpack.i.h.bf16 %v7250_v61  ;;  %v7251_v0 = vunpack.i.l.bf16 %v7250_v61 }
0x20e2   :  { %v4659_v62 = vpop.f32.mrb[37].mxu0 }
0x20e3   :  { %v7007_v34 = vpack.c.bf16 %v7252_v63, %v7251_v0  ;;  %v5637_v0 = vld [vmem:[#allocation8 + $0x30] sm:$0xff] }
0x20e6   :  { %v6710_v1 = vpop.f32.mrb[38].mxu0 }
0x20e7   :  { %v4859_v2 = vpop.f32.mrb[39].mxu0  ;;  %v7391_v6 = vpop.eup %7390 }
0x20e8   :  { %6713 = vmatprep.mubr.msk.f32.mxu0 %vm243_vm1, %v4859_v2  ;;  %v7393_v12 = vpop.eup %7392  ;;  %v5141_v16 = vmul.f32 %v7391_v6, %v7387_v54 }
0x20e9   :  { %6714 = vmatmul.mubr.msk.f32.vlgmr.msra.gmra.mrb[40].mxu0 %vm243_vm1, %v6710_v1  ;;  %v5142_v18 = vmul.f32 %v7393_v12, %v7389_v55  ;;  %v5638_v1 = vld [vmem:[#allocation8 + $0x38] sm:$0xff]  ;;  %v6105_v12 = vld [vmem:[%s8407_s7 + $0x68] sm:$0xff] }
0x20ea   :  { %6717 = vmatpush3.msra.mxu0 %v4285_v58  ;;  %6718 = vmatprep.mubr.msk.f32.mxu0 %vm243_vm1, %v4659_v62  ;;  %v7025_v2 = vpack.c.bf16 %v5638_v1, %v5637_v0  ;;  %v6112_v0 = vld [vmem:[%s8408_s8 + $0x13] ss:$0 sm:$0xff] }
0x20eb   :  { %v6746_v3 = vpop.f32.mrb[40].mxu1  ;;  %7008 = vmatprep.subr.bf16.mxu0 %v7007_v34 }
0x20ec   :  { %v5395_v4 = vpop.f32.mrb[41].mxu1  ;;  %v5401_v7 = vadd.f32 %v6746_v3, %v7746_v41  ;;  %v6101_v3 = vld [vmem:[%s8407_s7 + $0x48] sm:$0xff] }
0x20ed   :  { %v5396_v10 = vadd.f32 %v5395_v4, %v7748_v42  ;;  %v6102_v4 = vld [vmem:[%s8407_s7 + $0x50] sm:$0xff] }
0x20ee   :  { %v5407_v20 = vsel %vm329_vm5, %v5401_v7, -inf }
0x20ef   :  { %v5404_v11 = vsel %vm329_vm5, %v5396_v10, -inf }
0x20f0   :  { %5405 = vmax.xlane.f32.xlu1 %v5404_v11  ;;  %v6104_v11 = vld [vmem:[%s8407_s7 + $0x60] sm:$0xff] }
0x20f1   :  { %6719 = vmatmul.mubr.msk.f32.vlgmr.msra.gmra.mrb[40].mxu0 %vm243_vm1, %v6696_v60 }
0x20f2   :  { %7010 = vmatpush3.bf16.msra.mxu0 %v7007_v34  ;;  %6732 = vmatprep.mubr.msk.f32.mxu0 %vm329_vm5, %v5141_v16  ;;  %v6100_v34 = vld [vmem:[%s8407_s7 + $0x40] sm:$0xff]  ;;  %v7037_v16 = vpack.c.bf16 %v6105_v12, %v6104_v11 }
0x20f3   :  { %6735 = vmatprep.subr.mxu0 %v4287_v21  ;;  %v7029_v6 = vpack.c.bf16 %v6101_v3, %v6100_v34 }
0x20f4   :  { %5408 = vmax.xlane.f32.xlu1 %v5407_v20 }
0x20f5   :  { %6733 = vmatmul.mubr.msk.f32.vlgmr.msra.gmra.mrb[42].mxu0 %vm329_vm5, %v5142_v18 }
0x20f6   :  { %6736 = vmatpush3.msra.mxu0 %v4287_v21 }
0x217d   :  { %v5406_v41 = vpop.xlane.xlu1 %5405 }
0x217e   :  { %v5410_v42 = vsub.f32 %v5396_v10, %v5406_v41  ;;  %v6103_v10 = vld [vmem:[%s8407_s7 + $0x58] sm:$0xff] }
0x2180   :  { %v5412_v23 = vmul.f32 1.442695, %v5410_v42 }
0x2181   :  { %v5409_v22 = vpop.xlane.xlu1 %5408 }
0x2182   :  { %v5411_v15 = vsub.f32 %v5401_v7, %v5409_v22  ;;  %v7033_v7 = vpack.c.bf16 %v6103_v10, %v6102_v4 }
0x2184   :  { %v5414_v24 = vmul.f32 1.442695, %v5411_v15 }
0x2186   :  { %7394 = vpow2.f32 %v5414_v24 }
0x2187   :  { %7396 = vpow2.f32 %v5412_v23 }
0x2190   :  { %v7395_v14 = vpop.eup %7394 }
0x2191   :  { %v5419_v25 = vsel %vm329_vm5, %v7395_v14, 0.0  ;;  %v7397_v26 = vpop.eup %7396 }
0x2192   :  { %5420 = vadd.xlane.f32.xlu1 %v5419_v25  ;;  %v5416_v27 = vsel %vm329_vm5, %v7397_v26, 0.0 }
0x2196   :  { %5417 = vadd.xlane.f32.xlu1 %v5416_v27 }
0x21a7   :  { %7254 = vrot.lane.b32.xlu1 %v8218_v17, %s7547_s11  ;;  %s7504_s11 = scalar_lea.vmem %s5912_s29, 256 }
0x21a8   :  { %p7505_p4 = scmp.ne.s32.totalorder %s5912_s29, %s7504_s11  ;;  %p7510_p6 = scmp.lt.s32.totalorder %s7504_s11, %s7504_s11 }
0x21aa   :  { %p7511_p7 = por %p7510_p6, %p7509_p5 }
0x21ac   :  { %p7512_p8 = pnand %p7511_p7, %p7505_p4 }
0x21c8   :  { %v6734_v28 = vpop.f32.mrb[42].mxu0 }
0x21c9   :  { %v5221_v29 = vpop.f32.mrb[43].mxu0 }
0x21ca   :  { %6737 = vmatprep.mubr.msk.f32.mxu0 %vm243_vm1, %v5221_v29  ;;  %v6106_v29 = vld [vmem:[%s8407_s7 + $0x70] sm:$0xff] }
0x21cb   :  { %6738 = vmatmul.mubr.msk.f32.vlgmr.msra.gmra.mrb[40].mxu0 %vm243_vm1, %v6734_v28 }
0x221f   :  { %v5421_v37 = vpop.xlane.xlu1 %5420 }
0x2220   :  { %7398 = vrcp.f32 %v5421_v37  ;;  %v6107_v37 = vld [vmem:[%s8407_s7 + $0x78] sm:$0xff] }
0x2223   :  { %v5418_v51 = vpop.xlane.xlu1 %5417 }
0x2224   :  { %7400 = vrcp.f32 %v5418_v51  ;;  %v7041_v51 = vpack.c.bf16 %v6107_v37, %v6106_v29  ;;  %v6113_v29 = vld [vmem:[%s8408_s8 + $0x14] ss:$0 sm:$0xff] }
0x2227   :  { %v7255_v36 = vpop.permute.xlu1 %7254 }
0x2228   :  { %v7257_v52 = vunpack.i.h.bf16 %v7255_v36  ;;  %v7256_v30 = vunpack.i.l.bf16 %v7255_v36  ;;  %v6097_v36 = vld [vmem:[%s8408_s8 + $0x10] ss:$0 sm:$0xff] }
0x222a   :  { %v7017_v32 = vpack.c.bf16 %v7257_v52, %v7256_v30  ;;  %v7399_v13 = vpop.eup %7398 }
0x222b   :  { %v5425_v38 = vmul.f32 %v7399_v13, %v7395_v14  ;;  %v6108_v13 = vld [vmem:[%s8408_s8 + $0x11] ss:$0 sm:$0xff] }
0x222c   :  { %7018 = vmatprep.subr.bf16.mxu0 %v7017_v32 }
0x222d   :  { %7020 = vmatpush3.bf16.msra.mxu0 %v7017_v32 }
0x222e   :  { %v7401_v35 = vpop.eup %7400  ;;  %6754 = vmatprep.subr.mxu0 %v4288_v33 }
0x222f   :  { %v5424_v17 = vmul.f32 %v7401_v35, %v7397_v26 }
0x2231   :  { %6751 = vmatprep.mubr.msk.f32.mxu0 %vm329_vm5, %v5424_v17 }
0x2232   :  { %6752 = vmatmul.mubr.msk.f32.vlgmr.msra.gmra.mrb[44].mxu0 %vm329_vm5, %v5425_v38 }
0x2233   :  { %6755 = vmatpush3.msra.mxu0 %v4288_v33 }
0x2234   :  { %7030 = vmatprep.subr.bf16.mxu0 %v7029_v6 }
0x2305   :  { %v6753_v39 = vpop.f32.mrb[44].mxu0 }
0x2306   :  { %v5504_v40 = vpop.f32.mrb[45].mxu0 }
0x2307   :  { %6756 = vmatprep.mubr.msk.f32.mxu0 %vm243_vm1, %v5504_v40 }
0x2308   :  { %6757 = vmatmul.mubr.msk.f32.vlgmr.msra.gmra.mrb[40].mxu0 %vm243_vm1, %v6753_v39 }
0x2309   :  { %7032 = vmatpush3.bf16.msra.mxu0 %v7029_v6 }
0x230a   :  { %7034 = vmatprep.subr.bf16.mxu0 %v7033_v7 }
0x230d   :  { %7036 = vmatpush3.bf16.msra.mxu0 %v7033_v7 }
0x230e   :  { %7038 = vmatprep.subr.bf16.mxu0 %v7037_v16 }
0x2311   :  { %7040 = vmatpush3.bf16.msra.mxu0 %v7037_v16 }
0x2312   :  { %7042 = vmatprep.subr.bf16.mxu0 %v7041_v51 }
0x2315   :  { %7044 = vmatpush3.bf16.msra.mxu0 %v7041_v51  ;;  %v6114_v51 = vld [vmem:[%s8408_s8 + $0x15] ss:$0 sm:$0xff] }
0x23db   :  { %v6758_v44 = vpop.f32.mrb[40].mxu0 }
0x23dc   :  { %v5601_v46 = vadd.f32 %v6758_v44, %v6096_v43  ;;  %v5585_v47 = vpop.f32.mrb[41].mxu0 }
0x23dd   :  { %v5600_v48 = vadd.f32 %v6096_v43, %v5585_v47 }
0x23de   :  { %v5603_v49 = vadd.f32 %v5601_v46, %v8212_v9 }
0x23df   :  { %v5602_v50 = vadd.f32 %v5600_v48, %v8209_v8  ;;  %v5635_v8 = vld [vmem:[#allocation8 + $0x20] sm:$0xff] }
0x23e0   :  { %v5607_v53 = vsel %vm153_vm0, %v5603_v49, 0.0  ;;  %v7021_v63 = vpack.c.bf16 %v5636_v5, %v5635_v8  ;;  %v6111_v5 = vld [vmem:[%s8408_s8 + $0x12] ss:$0 sm:$0xff] }
0x23e1   :  { %5608 = vadd.xlane.f32.xlu1 %v5607_v53  ;;  %v5604_v54 = vsel %vm153_vm0, %v5602_v50, 0.0 }
0x23e2   :  { %5605 = vadd.xlane.f32.xlu0 %v5604_v54  ;;  %7022 = vmatprep.subr.bf16.mxu1 %v7021_v63 }
0x23e3   :  { %7024 = vmatpush3.bf16.msra.mxu1 %v7021_v63 }
0x23e4   :  { %7026 = vmatprep.subr.bf16.mxu1 %v7025_v2 }
0x23e7   :  { %7028 = vmatpush3.bf16.msra.mxu1 %v7025_v2 }
0x246e   :  { %v5609_v55 = vpop.xlane.xlu1 %5608 }
0x246f   :  { %v5611_v56 = vmul.f32 0.03125, %v5609_v55  ;;  %v5606_v19 = vpop.xlane.xlu0 %5605 }
0x2470   :  { %v5610_v57 = vmul.f32 0.03125, %v5606_v19 }
0x2471   :  { %v5613_v58 = vsub.f32 %v5603_v49, %v5611_v56 }
0x2472   :  { %v5612_v59 = vsub.f32 %v5602_v50, %v5610_v57 }
0x2473   :  { %v5615_v62 = vmul.f32 %v5613_v58, %v5613_v58 }
0x2474   :  { %v5614_v60 = vmul.f32 %v5612_v59, %v5612_v59 }
0x2475   :  { %v5619_v9 = vsel %vm153_vm0, %v5615_v62, 0.0 }
0x2476   :  { %v5616_v61 = vsel %vm153_vm0, %v5614_v60, 0.0 }
0x2477   :  { %5617 = vadd.xlane.f32.xlu0 %v5616_v61 }
0x247b   :  { %5620 = vadd.xlane.f32.xlu0 %v5619_v9 }
0x2504   :  { %v5618_v18 = vpop.xlane.xlu0 %5617 }
0x2505   :  { %v5622_v20 = vmul.f32 0.03125, %v5618_v18 }
0x2507   :  { %v5624_v21 = vadd.f32 1e-05, %v5622_v20 }
0x2508   :  { %v5621_v41 = vpop.xlane.xlu0 %5620 }
0x2509   :  { %7402 = vrsqrt.f32 %v5624_v21  ;;  %v5623_v42 = vmul.f32 0.03125, %v5621_v41 }
0x250b   :  { %v5625_v22 = vadd.f32 1e-05, %v5623_v42 }
0x250d   :  { %7404 = vrsqrt.f32 %v5625_v22 }
0x2513   :  { %v7403_v15 = vpop.eup %7402 }
0x2514   :  { %v5628_v23 = vmul.f32 %v7403_v15, %v5612_v59 }
0x2516   :  { %v5630_v24 = vmul.f32 %v8198_v31, %v5628_v23 }
0x2517   :  { %v7405_v14 = vpop.eup %7404 }
0x2518   :  { %v5629_v25 = vmul.f32 %v7405_v14, %v5613_v58  ;;  %v5632_v26 = vadd.f32 %v8205_v45, %v5630_v24 }
0x251a   :  { %6767 = vmatprep.mubr.msk.f32.mxu1 %vm153_vm0, %v5632_v26  ;;  %v5631_v27 = vmul.f32 %v8198_v31, %v5629_v25 }
0x251c   :  { %v5633_v28 = vadd.f32 %v8205_v45, %v5631_v27 }
0x251e   :  { %6768 = vmatmul.mubr.msk.f32.vlgmr.msra.gmra.mrb[42].mxu1 %vm153_vm0, %v5633_v28 }
0x25f1   :  { %v6769_v31 = vpop.f32.mrb[42].mxu1 }
0x25f2   :  { %v5722_v52 = vadd.f32 %v6769_v31, %v6097_v36  ;;  %v5716_v45 = vpop.f32.mrb[43].mxu1 }
0x25f3   :  { %v5717_v30 = vadd.f32 %v6097_v36, %v5716_v45 }
0x25f4   :  { %v5726_v33 = vmax.f32 %v5722_v52, 0.0 }
0x25f5   :  { %v5725_v32 = vmax.f32 %v5717_v30, 0.0 }
0x25f7   :  { %6786 = vmatprep.mubr.msk.f32.mxu0 %vm2879_vm6, %v5725_v32 }
0x25f8   :  { %6787 = vmatmul.mubr.msk.f32.vlgmr.msra.gmra.mrb[46].mxu0 %vm2879_vm6, %v5726_v33 }
0x26cb   :  { %v6788_v35 = vpop.f32.mrb[46].mxu0 }
0x26cc   :  { %v5813_v17 = vpop.f32.mrb[47].mxu0  ;;  %v5819_v38 = vadd.f32 %v6788_v35, %v6108_v13 }
0x26cd   :  { %v5814_v39 = vadd.f32 %v6108_v13, %v5813_v17 }
0x26ce   :  { %v5823_v43 = vadd.f32 %v5819_v38, %v5633_v28 }
0x26cf   :  { %v5822_v40 = vadd.f32 %v5814_v39, %v5632_v26 }
0x26d0   :  { %v5829_v46 = vsel %vm153_vm0, %v5823_v43, 0.0 }
0x26d1   :  { %v5826_v44 = vsel %vm153_vm0, %v5822_v40, 0.0 }
0x26d2   :  { %5827 = vadd.xlane.f32.xlu0 %v5826_v44 }
0x26d6   :  { %5830 = vadd.xlane.f32.xlu0 %v5829_v46 }
0x275f   :  { %v5828_v47 = vpop.xlane.xlu0 %5827 }
0x2760   :  { %v5832_v48 = vmul.f32 0.03125, %v5828_v47 }
0x2762   :  { %v5834_v49 = vsub.f32 %v5822_v40, %v5832_v48 }
0x2763   :  { %v5831_v50 = vpop.xlane.xlu0 %5830 }
0x2764   :  { %v5833_v53 = vmul.f32 0.03125, %v5831_v50  ;;  %v5836_v54 = vmul.f32 %v5834_v49, %v5834_v49 }
0x2766   :  { %v5835_v55 = vsub.f32 %v5823_v43, %v5833_v53  ;;  %v5838_v56 = vsel %vm153_vm0, %v5836_v54, 0.0 }
0x2767   :  { %5839 = vadd.xlane.f32.xlu0 %v5838_v56 }
0x2768   :  { %v5837_v19 = vmul.f32 %v5835_v55, %v5835_v55 }
0x276a   :  { %v5841_v57 = vsel %vm153_vm0, %v5837_v19, 0.0 }
0x276b   :  { %5842 = vadd.xlane.f32.xlu1 %v5841_v57 }
0x27f4   :  { %v5840_v58 = vpop.xlane.xlu0 %5839 }
0x27f5   :  { %v5844_v59 = vmul.f32 0.03125, %v5840_v58 }
0x27f7   :  { %v5846_v60 = vadd.f32 1e-05, %v5844_v59 }
0x27f8   :  { %v5843_v61 = vpop.xlane.xlu1 %5842 }
0x27f9   :  { %7406 = vrsqrt.f32 %v5846_v60  ;;  %v5845_v62 = vmul.f32 0.03125, %v5843_v61 }
0x27fb   :  { %v5847_v9 = vadd.f32 1e-05, %v5845_v62 }
0x27fd   :  { %7408 = vrsqrt.f32 %v5847_v9 }
0x2803   :  { %v7407_v8 = vpop.eup %7406 }
0x2804   :  { %v5850_v63 = vmul.f32 %v7407_v8, %v5834_v49 }
0x2806   :  { %v5856_v1 = vmul.f32 %v6111_v5, %v5850_v63 }
0x2807   :  { %v7409_v2 = vpop.eup %7408 }
0x2808   :  { %v5862_v34 = vadd.f32 %v6112_v0, %v5856_v1  ;;  %v5851_v3 = vmul.f32 %v7409_v2, %v5835_v55 }
0x280a   :  { %v5866_v4 = vsel %vm153_vm0, %v5862_v34, 0.0  ;;  %v5857_v6 = vmul.f32 %v6111_v5, %v5851_v3 }
0x280b   :  { %5867 = vadd.xlane.f32.xlu0 %v5866_v4 }
0x280c   :  { %v5863_v10 = vadd.f32 %v6112_v0, %v5857_v6 }
0x280e   :  { %v5869_v7 = vsel %vm153_vm0, %v5863_v10, 0.0 }
0x280f   :  { %5870 = vadd.xlane.f32.xlu1 %v5869_v7 }
0x2898   :  { %v5868_v11 = vpop.xlane.xlu0 %5867 }
0x2899   :  { %v5872_v12 = vmul.f32 0.03125, %v5868_v11 }
0x289b   :  { %v5874_v16 = vsub.f32 %v5862_v34, %v5872_v12 }
0x289c   :  { %v5871_v18 = vpop.xlane.xlu1 %5870 }
0x289d   :  { %v5873_v20 = vmul.f32 0.03125, %v5871_v18  ;;  %v5876_v21 = vmul.f32 %v5874_v16, %v5874_v16 }
0x289f   :  { %v5875_v41 = vsub.f32 %v5863_v10, %v5873_v20  ;;  %v5878_v42 = vsel %vm153_vm0, %v5876_v21, 0.0 }
0x28a0   :  { %5879 = vadd.xlane.f32.xlu0 %v5878_v42 }
0x28a1   :  { %v5877_v22 = vmul.f32 %v5875_v41, %v5875_v41 }
0x28a3   :  { %v5881_v15 = vsel %vm153_vm0, %v5877_v22, 0.0 }
0x28a4   :  { %5882 = vadd.xlane.f32.xlu1 %v5881_v15 }
0x292d   :  { %v5880_v23 = vpop.xlane.xlu0 %5879 }
0x292e   :  { %v5884_v24 = vmul.f32 0.03125, %v5880_v23 }
0x2930   :  { %v5886_v14 = vadd.f32 1e-05, %v5884_v24 }
0x2931   :  { %v5883_v25 = vpop.xlane.xlu1 %5882 }
0x2932   :  { %7410 = vrsqrt.f32 %v5886_v14  ;;  %v5885_v26 = vmul.f32 0.03125, %v5883_v25 }
0x2934   :  { %v5887_v27 = vadd.f32 1e-05, %v5885_v26 }
0x2936   :  { %7412 = vrsqrt.f32 %v5887_v27 }
0x293c   :  { %v7411_v28 = vpop.eup %7410 }
0x293d   :  { %v5890_v37 = vmul.f32 %v7411_v28, %v5874_v16 }
0x293f   :  { %v5896_v36 = vmul.f32 %v6113_v29, %v5890_v37 }
0x2940   :  { %v7413_v31 = vpop.eup %7412 }
0x2941   :  { %v5891_v52 = vmul.f32 %v7413_v31, %v5875_v41  ;;  %v5902_v45 = vadd.f32 %v6114_v51, %v5896_v36 }
0x2943   :  { %v5897_v30 = vmul.f32 %v6113_v29, %v5891_v52  ;;  %5904 = vst.msk [vmem:[#allocation10] sm:$0xff] %vm153_vm0, %v5902_v45 }
0x2945   :  { %v5903_v32 = vadd.f32 %v6114_v51, %v5897_v30 }
0x2947   :  { %5905 = vst.msk [vmem:[#allocation10 + $0x8] sm:$0xff] %vm153_vm0, %v5903_v32 }
0x2948   :  { %7515 = shalt.err (!%p7512_p8)
}
0x2949   :  { %s7516_s15 = scalar_lea.hbm %s8409_s9, 256 }
0x294a   :  { %p7517_p9 = scmp.ne.s32.totalorder %s8409_s9, %s7516_s15  ;;  %p7520_p10 = scmp.lt.u32.totalorder %s7516_s15, %s8409_s9 }
0x294c   :  { %p7522_p11 = pnand %p7520_p10, %p7517_p9 }
0x294e   :  { %7525 = shalt.err (!%p7522_p11)
}
0x294f   :  { %5917 = dma.vmem_to_hbm [thread:$0]  %s5912_s29, 256, %s8409_s9, [#allocation4], %s7536_s21, %s7536_s21, %s7537_s22  }
0x2950   :  { %7532 = dma.done.wait [#allocation4], 256  }
0x2951   :  { %7533 = vsyncadd [#allocation4], 4294967040 }
0x2952   :  { %5921 = vsyncpa [#allocation3], 1 }
0x2953   :  { %5922 = vsyncpa [#allocation6], 1 }
0x2954   :  { %5923 = vsyncpa [#allocation9], 1 }
0x2955   :  { %5924 = vsyncpa [#allocation4], 1 }

</bundles_post_ra>
